<compile_context>
chip_gen: v5e
topology: v5e:2x2
jax: 0.10.0
libtpu: 0.0.40
codegen_flags: <defaults>
</compile_context>

<pallas_src>
import functools

import jax
import jax.numpy as jnp
from jax.experimental import pallas as pl
from jax.experimental.pallas import tpu as pltpu


# ------------------------------- Pallas kernel ------------------------------ #

def _conv_bn_relu_pool(x, t_ref, shift_ref, pr_ref, pc_ref, h_out):
    """One stage on one image, entirely in VMEM/vregs.

    x: (H, W*Cin) value.  3x3 valid conv as 3 row-shifted MXU dots against
    block-Toeplitz slabs, + folded-BN shift + ReLU + 2x2 avg-pool (Pr @ y @ Pc).
    Returns pooled (Hp, Wp*Cout) f32."""
    kh = t_ref.shape[0]
    acc = jnp.zeros((h_out, t_ref.shape[-1]), jnp.float32)
    for ki in range(kh):                                    # static, unrolled (3)
        xk = x[ki:ki + h_out, :].astype(jnp.bfloat16)       # (Ho, W*Cin)
        acc = acc + jnp.dot(xk, t_ref[ki], preferred_element_type=jnp.float32)
    y = jnp.maximum(acc + shift_ref[...], 0.0)              # (Ho, Wo*Cout)
    return jnp.dot(pr_ref[...],
                   jnp.dot(y, pc_ref[...], preferred_element_type=jnp.float32),
                   preferred_element_type=jnp.float32)      # (Hp, Wp*Cout)


def _ann_fused_kernel(x_ref,
                      t0_ref, s0_ref, pr0_ref, pc0_ref,
                      t1_ref, s1_ref, pr1_ref, pc1_ref,
                      t2_ref, s2_ref, pr2_ref, pc2_ref,
                      wfc_ref, bfc_ref, o_ref, *, h_outs):
    """Whole network for one image: 3 fused conv stages + Flatten + Linear."""
    x = x_ref[0]                                            # (H, W*Cin) bf16
    p = _conv_bn_relu_pool(x, t0_ref, s0_ref, pr0_ref, pc0_ref, h_outs[0])
    p = _conv_bn_relu_pool(p, t1_ref, s1_ref, pr1_ref, pc1_ref, h_outs[1])
    p = _conv_bn_relu_pool(p, t2_ref, s2_ref, pr2_ref, pc2_ref, h_outs[2])
    # p is (1, 32) == Flatten output; fuse the final Linear.
    logits = jnp.dot(p, wfc_ref[...],
                     preferred_element_type=jnp.float32) + bfc_ref[...]
    o_ref[0] = logits                                       # (1, num_classes)


# ----------------------- host-side constant preparation --------------------- #

def _build_row_toeplitz(w_hwio, w_in):
    """(kh,kw,Cin,Cout) conv weights -> (kh, W*Cin, Wo*Cout) block-Toeplitz slabs
    so the conv along W becomes a dense matmul; the kh kernel rows stay as
    row-shifted slices inside the kernel."""
    kh, kw, cin, cout = w_hwio.shape
    wo = w_in - kw + 1
    t = jnp.zeros((kh, w_in, wo, cin, cout), jnp.float32)
    iw = jnp.arange(wo)
    for ki in range(kh):
        for kj in range(kw):
            t = t.at[ki, iw + kj, iw].add(w_hwio[ki, kj].astype(jnp.float32))
    # rows ordered (w_in, cin), cols ordered (w_out, cout)
    return t.transpose(0, 1, 3, 2, 4).reshape(kh, w_in * cin, wo * cout)


def _pool_matrices(h_in, w_in, cout):
    """2x2 avg-pool (floor cropping, like nn.AvgPool2d(2,2)) as Pr @ y @ Pc."""
    hp, wp = h_in // 2, w_in // 2
    ih = jnp.arange(hp)
    pr = (jnp.zeros((hp, h_in), jnp.float32)
          .at[ih, 2 * ih].set(0.5).at[ih, 2 * ih + 1].set(0.5))
    iw = jnp.arange(wp)
    pw = (jnp.zeros((w_in, wp), jnp.float32)
          .at[2 * iw, iw].set(0.5).at[2 * iw + 1, iw].set(0.5))
    pc = jnp.kron(pw, jnp.eye(cout, dtype=jnp.float32))
    return pr, pc


_EPS = (1e-5, 1e-5, 1e-3)   # BN eps per layer (layer 3 uses 1e-3 per the module)


def prepare_params(params, input_hw=(28, 28)):
    """Fold eval-mode BN into the conv weights / per-channel shift and build the
    per-stage constant operands (bf16 Toeplitz weights, pool matrices)."""
    h, w = input_hw
    stages = []
    for li in range(3):
        wconv = params[f"w{li}"].astype(jnp.float32)                 # (3,3,Cin,32) HWIO
        scale = params[f"gamma{li}"] / jnp.sqrt(params[f"var{li}"] + _EPS[li])
        shift = params[f"beta{li}"] + (params[f"b{li}"] - params[f"mean{li}"]) * scale
        w_folded = wconv * scale                                     # fold BN scale in f32
        ho, wo = h - 2, w - 2
        cout = wconv.shape[-1]
        t = _build_row_toeplitz(w_folded, w).astype(jnp.bfloat16)    # bf16 MXU operand
        shift_w = jnp.tile(shift.astype(jnp.float32), wo).reshape(1, wo * cout)
        pr, pc = _pool_matrices(ho, wo, cout)
        stages.append({"t": t, "shift": shift_w, "pr": pr, "pc": pc})
        h, w = ho // 2, wo // 2
    fc = {"w": params["wfc"].astype(jnp.float32),
          "b": params["bfc"].reshape(1, -1).astype(jnp.float32)}
    return {"stages": stages, "fc": fc}


# ---------------------------------- forward --------------------------------- #

def ann_forward(x_nchw, prep):
    """x_nchw: (B, 1, H, W) float. Returns (B, num_classes) logits."""
    B, C, H, W = x_nchw.shape
    # Cin == 1, so NCHW -> lane-dense (B, H, W*Cin) is a free reshape; bf16 halves
    # the per-image input DMA (the kernel uses bf16 MXU operands anyway).
    x = x_nchw.astype(jnp.bfloat16).reshape(B, H, W * C)

    s0, s1, s2 = prep["stages"]
    wfc, bfc = prep["fc"]["w"], prep["fc"]["b"]
    nc = wfc.shape[1]
    h_outs = tuple(s["pr"].shape[1] for s in (s0, s1, s2))   # conv output heights

    def full(a):  # whole-array resident block, DMA'd once (constant index_map)
        return pl.BlockSpec(a.shape, lambda b: (0,) * a.ndim)

    in_specs = [pl.BlockSpec((1, H, W * C), lambda b: (b, 0, 0))]  # per-image input
    operands = [x]
    for s in (s0, s1, s2):
        for key in ("t", "shift", "pr", "pc"):
            in_specs.append(full(s[key]))
            operands.append(s[key])
    in_specs += [full(wfc), full(bfc)]
    operands += [wfc, bfc]

    kernel = functools.partial(_ann_fused_kernel, h_outs=h_outs)
    out = pl.pallas_call(
        kernel,
        out_shape=jax.ShapeDtypeStruct((B, 1, nc), jnp.float32),
        grid=(B,),
        in_specs=in_specs,
        out_specs=pl.BlockSpec((1, 1, nc), lambda b: (b, 0, 0)),
        compiler_params=pltpu.CompilerParams(
            dimension_semantics=("parallel",)),
    )(*operands)
    return out.reshape(B, nc)


# -------------------------------- init params -------------------------------- #

def init_params(key, num_classes):
    ks = list(jax.random.split(key, 32))
    nxt = iter(ks)

    def nrm(shape, s=0.1):
        return s * jax.random.normal(next(nxt), shape, jnp.float32)

    p = {}
    cins = [1, 32, 32]
    for li in range(3):
        p[f"w{li}"] = nrm((3, 3, cins[li], 32))       # conv weight (HWIO)
        p[f"b{li}"] = nrm((32,))                      # conv bias
        p[f"gamma{li}"] = 1.0 + nrm((32,))            # BN weight
        p[f"beta{li}"] = nrm((32,))                   # BN bias
        p[f"mean{li}"] = nrm((32,))                   # BN running_mean
        p[f"var{li}"] = jnp.abs(nrm((32,))) + 0.5     # BN running_var (>0)
    p["wfc"] = nrm((32, num_classes))
    p["bfc"] = nrm((1, num_classes))
    return p


# ------------------------------------ main ----------------------------------- #

if __name__ == "__main__":
    num_classes = 10
    key = jax.random.PRNGKey(0)
    k_x, k_p = jax.random.split(key)
    # MNIST-like input so Flatten yields 32 features, matching Linear(32, nc).
    x = jax.random.normal(k_x, (2, 1, 28, 28), jnp.float32)
    params = init_params(k_p, num_classes)
    prep = prepare_params(params, input_hw=(28, 28))   # BN fold + Toeplitz/pool constants

    fwd = jax.jit(ann_forward)
    out = jax.block_until_ready(fwd(x, prep))

    assert out.shape == (2, num_classes), out.shape
    assert bool(jnp.all(jnp.isfinite(out)))
    print("KERNEL_OK")
</pallas_src>

<mosaic_0001>
module attributes {stable_mosaic.version = 11 : i64} {
  func.func @_ann_fused_kernel(%arg0: i32, %arg1: memref<1x28x28xbf16, #tpu.memory_space<vmem>>, %arg2: memref<3x28x832xbf16, #tpu.memory_space<vmem>>, %arg3: memref<1x832xf32, #tpu.memory_space<vmem>>, %arg4: memref<13x26xf32, #tpu.memory_space<vmem>>, %arg5: memref<832x416xf32, #tpu.memory_space<vmem>>, %arg6: memref<3x416x352xbf16, #tpu.memory_space<vmem>>, %arg7: memref<1x352xf32, #tpu.memory_space<vmem>>, %arg8: memref<5x11xf32, #tpu.memory_space<vmem>>, %arg9: memref<352x160xf32, #tpu.memory_space<vmem>>, %arg10: memref<3x160x96xbf16, #tpu.memory_space<vmem>>, %arg11: memref<1x96xf32, #tpu.memory_space<vmem>>, %arg12: memref<1x3xf32, #tpu.memory_space<vmem>>, %arg13: memref<96x32xf32, #tpu.memory_space<vmem>>, %arg14: memref<32x10xf32, #tpu.memory_space<vmem>>, %arg15: memref<1x10xf32, #tpu.memory_space<vmem>>, %arg16: memref<1x1x10xf32, #tpu.memory_space<vmem>>) attributes {dimension_semantics = [#tpu.dimension_semantics<parallel>], iteration_bounds = array<i64: 2>, scalar_prefetch = 0 : i64, scratch_operands = 0 : i64, tpu.core_type = #tpu.core_type<tc>, window_params = [{transform_indices = @transform_0, window_bounds = array<i64: 1, 28, 28>}, {pipeline_mode = #tpu.pipeline_mode<synchronous>, transform_indices = @transform_1, window_bounds = array<i64: 3, 28, 832>}, {pipeline_mode = #tpu.pipeline_mode<synchronous>, transform_indices = @transform_2, window_bounds = array<i64: 1, 832>}, {pipeline_mode = #tpu.pipeline_mode<synchronous>, transform_indices = @transform_3, window_bounds = array<i64: 13, 26>}, {pipeline_mode = #tpu.pipeline_mode<synchronous>, transform_indices = @transform_4, window_bounds = array<i64: 832, 416>}, {pipeline_mode = #tpu.pipeline_mode<synchronous>, transform_indices = @transform_5, window_bounds = array<i64: 3, 416, 352>}, {pipeline_mode = #tpu.pipeline_mode<synchronous>, transform_indices = @transform_6, window_bounds = array<i64: 1, 352>}, {pipeline_mode = #tpu.pipeline_mode<synchronous>, transform_indices = @transform_7, window_bounds = array<i64: 5, 11>}, {pipeline_mode = #tpu.pipeline_mode<synchronous>, transform_indices = @transform_8, window_bounds = array<i64: 352, 160>}, {pipeline_mode = #tpu.pipeline_mode<synchronous>, transform_indices = @transform_9, window_bounds = array<i64: 3, 160, 96>}, {pipeline_mode = #tpu.pipeline_mode<synchronous>, transform_indices = @transform_10, window_bounds = array<i64: 1, 96>}, {pipeline_mode = #tpu.pipeline_mode<synchronous>, transform_indices = @transform_11, window_bounds = array<i64: 1, 3>}, {pipeline_mode = #tpu.pipeline_mode<synchronous>, transform_indices = @transform_12, window_bounds = array<i64: 96, 32>}, {pipeline_mode = #tpu.pipeline_mode<synchronous>, transform_indices = @transform_13, window_bounds = array<i64: 32, 10>}, {pipeline_mode = #tpu.pipeline_mode<synchronous>, transform_indices = @transform_14, window_bounds = array<i64: 1, 10>}, {transform_indices = @transform_15, window_bounds = array<i64: 1, 1, 10>}]} {
    %c0 = arith.constant 0 : index
    %c0_0 = arith.constant 0 : index
    %c0_1 = arith.constant 0 : index
    %0 = vector.load %arg1[%c0, %c0_0, %c0_1] : memref<1x28x28xbf16, #tpu.memory_space<vmem>>, vector<1x28x28xbf16>
    %1 = vector.shape_cast %0 : vector<1x28x28xbf16> to vector<28x28xbf16>
    %cst = arith.constant 0.000000e+00 : f32
    %2 = vector.broadcast %cst : f32 to vector<26x832xf32>
    %3 = vector.extract_strided_slice %1 {offsets = [0, 0], sizes = [26, 28], strides = [1, 1]} : vector<28x28xbf16> to vector<26x28xbf16>
    %c0_2 = arith.constant 0 : index
    %c0_3 = arith.constant 0 : index
    %c0_4 = arith.constant 0 : index
    %4 = vector.load %arg2[%c0_2, %c0_3, %c0_4] : memref<3x28x832xbf16, #tpu.memory_space<vmem>>, vector<1x28x832xbf16>
    %5 = vector.shape_cast %4 : vector<1x28x832xbf16> to vector<28x832xbf16>
    %cst_5 = arith.constant dense<0.000000e+00> : vector<26x832xf32>
    %6 = tpu.matmul %3, %5, %cst_5 {dimension_numbers = #tpu.dot_dimension_numbers<[1], [0], [0], [1], [0, 0, 1, 1], [], []>} : vector<26x28xbf16>, vector<28x832xbf16>, vector<26x832xf32> -> vector<26x832xf32>
    %7 = arith.addf %2, %6 : vector<26x832xf32>
    %8 = vector.extract_strided_slice %1 {offsets = [1, 0], sizes = [26, 28], strides = [1, 1]} : vector<28x28xbf16> to vector<26x28xbf16>
    %c1 = arith.constant 1 : index
    %c0_6 = arith.constant 0 : index
    %c0_7 = arith.constant 0 : index
    %9 = vector.load %arg2[%c1, %c0_6, %c0_7] : memref<3x28x832xbf16, #tpu.memory_space<vmem>>, vector<1x28x832xbf16>
    %10 = vector.shape_cast %9 : vector<1x28x832xbf16> to vector<28x832xbf16>
    %cst_8 = arith.constant dense<0.000000e+00> : vector<26x832xf32>
    %11 = tpu.matmul %8, %10, %cst_8 {dimension_numbers = #tpu.dot_dimension_numbers<[1], [0], [0], [1], [0, 0, 1, 1], [], []>} : vector<26x28xbf16>, vector<28x832xbf16>, vector<26x832xf32> -> vector<26x832xf32>
    %12 = arith.addf %7, %11 : vector<26x832xf32>
    %13 = vector.extract_strided_slice %1 {offsets = [2, 0], sizes = [26, 28], strides = [1, 1]} : vector<28x28xbf16> to vector<26x28xbf16>
    %c2 = arith.constant 2 : index
    %c0_9 = arith.constant 0 : index
    %c0_10 = arith.constant 0 : index
    %14 = vector.load %arg2[%c2, %c0_9, %c0_10] : memref<3x28x832xbf16, #tpu.memory_space<vmem>>, vector<1x28x832xbf16>
    %15 = vector.shape_cast %14 : vector<1x28x832xbf16> to vector<28x832xbf16>
    %cst_11 = arith.constant dense<0.000000e+00> : vector<26x832xf32>
    %16 = tpu.matmul %13, %15, %cst_11 {dimension_numbers = #tpu.dot_dimension_numbers<[1], [0], [0], [1], [0, 0, 1, 1], [], []>} : vector<26x28xbf16>, vector<28x832xbf16>, vector<26x832xf32> -> vector<26x832xf32>
    %17 = arith.addf %12, %16 : vector<26x832xf32>
    %c0_12 = arith.constant 0 : index
    %c0_13 = arith.constant 0 : index
    %18 = vector.load %arg3[%c0_12, %c0_13] : memref<1x832xf32, #tpu.memory_space<vmem>>, vector<1x832xf32>
    %19 = vector.broadcast %18 : vector<1x832xf32> to vector<26x832xf32>
    %20 = arith.addf %17, %19 : vector<26x832xf32>
    %cst_14 = arith.constant 0.000000e+00 : f32
    %21 = vector.broadcast %cst_14 : f32 to vector<26x832xf32>
    %22 = arith.maximumf %20, %21 : vector<26x832xf32>
    %c0_15 = arith.constant 0 : index
    %c0_16 = arith.constant 0 : index
    %23 = vector.load %arg4[%c0_15, %c0_16] : memref<13x26xf32, #tpu.memory_space<vmem>>, vector<13x26xf32>
    %c0_17 = arith.constant 0 : index
    %c0_18 = arith.constant 0 : index
    %24 = vector.load %arg5[%c0_17, %c0_18] : memref<832x416xf32, #tpu.memory_space<vmem>>, vector<832x416xf32>
    %cst_19 = arith.constant dense<0.000000e+00> : vector<26x416xf32>
    %25 = tpu.matmul %22, %24, %cst_19 {dimension_numbers = #tpu.dot_dimension_numbers<[1], [0], [0], [1], [0, 0, 1, 1], [], []>} : vector<26x832xf32>, vector<832x416xf32>, vector<26x416xf32> -> vector<26x416xf32>
    %cst_20 = arith.constant dense<0.000000e+00> : vector<13x416xf32>
    %26 = tpu.matmul %23, %25, %cst_20 {dimension_numbers = #tpu.dot_dimension_numbers<[1], [0], [0], [1], [0, 0, 1, 1], [], []>} : vector<13x26xf32>, vector<26x416xf32>, vector<13x416xf32> -> vector<13x416xf32>
    %cst_21 = arith.constant 0.000000e+00 : f32
    %27 = vector.broadcast %cst_21 : f32 to vector<11x352xf32>
    %28 = vector.extract_strided_slice %26 {offsets = [0, 0], sizes = [11, 416], strides = [1, 1]} : vector<13x416xf32> to vector<11x416xf32>
    %29 = arith.truncf %28 : vector<11x416xf32> to vector<11x416xbf16>
    %c0_22 = arith.constant 0 : index
    %c0_23 = arith.constant 0 : index
    %c0_24 = arith.constant 0 : index
    %30 = vector.load %arg6[%c0_22, %c0_23, %c0_24] : memref<3x416x352xbf16, #tpu.memory_space<vmem>>, vector<1x416x352xbf16>
    %31 = vector.shape_cast %30 : vector<1x416x352xbf16> to vector<416x352xbf16>
    %cst_25 = arith.constant dense<0.000000e+00> : vector<11x352xf32>
    %32 = tpu.matmul %29, %31, %cst_25 {dimension_numbers = #tpu.dot_dimension_numbers<[1], [0], [0], [1], [0, 0, 1, 1], [], []>} : vector<11x416xbf16>, vector<416x352xbf16>, vector<11x352xf32> -> vector<11x352xf32>
    %33 = arith.addf %27, %32 : vector<11x352xf32>
    %34 = vector.extract_strided_slice %26 {offsets = [1, 0], sizes = [11, 416], strides = [1, 1]} : vector<13x416xf32> to vector<11x416xf32>
    %35 = arith.truncf %34 : vector<11x416xf32> to vector<11x416xbf16>
    %c1_26 = arith.constant 1 : index
    %c0_27 = arith.constant 0 : index
    %c0_28 = arith.constant 0 : index
    %36 = vector.load %arg6[%c1_26, %c0_27, %c0_28] : memref<3x416x352xbf16, #tpu.memory_space<vmem>>, vector<1x416x352xbf16>
    %37 = vector.shape_cast %36 : vector<1x416x352xbf16> to vector<416x352xbf16>
    %cst_29 = arith.constant dense<0.000000e+00> : vector<11x352xf32>
    %38 = tpu.matmul %35, %37, %cst_29 {dimension_numbers = #tpu.dot_dimension_numbers<[1], [0], [0], [1], [0, 0, 1, 1], [], []>} : vector<11x416xbf16>, vector<416x352xbf16>, vector<11x352xf32> -> vector<11x352xf32>
    %39 = arith.addf %33, %38 : vector<11x352xf32>
    %40 = vector.extract_strided_slice %26 {offsets = [2, 0], sizes = [11, 416], strides = [1, 1]} : vector<13x416xf32> to vector<11x416xf32>
    %41 = arith.truncf %40 : vector<11x416xf32> to vector<11x416xbf16>
    %c2_30 = arith.constant 2 : index
    %c0_31 = arith.constant 0 : index
    %c0_32 = arith.constant 0 : index
    %42 = vector.load %arg6[%c2_30, %c0_31, %c0_32] : memref<3x416x352xbf16, #tpu.memory_space<vmem>>, vector<1x416x352xbf16>
    %43 = vector.shape_cast %42 : vector<1x416x352xbf16> to vector<416x352xbf16>
    %cst_33 = arith.constant dense<0.000000e+00> : vector<11x352xf32>
    %44 = tpu.matmul %41, %43, %cst_33 {dimension_numbers = #tpu.dot_dimension_numbers<[1], [0], [0], [1], [0, 0, 1, 1], [], []>} : vector<11x416xbf16>, vector<416x352xbf16>, vector<11x352xf32> -> vector<11x352xf32>
    %45 = arith.addf %39, %44 : vector<11x352xf32>
    %c0_34 = arith.constant 0 : index
    %c0_35 = arith.constant 0 : index
    %46 = vector.load %arg7[%c0_34, %c0_35] : memref<1x352xf32, #tpu.memory_space<vmem>>, vector<1x352xf32>
    %47 = vector.broadcast %46 : vector<1x352xf32> to vector<11x352xf32>
    %48 = arith.addf %45, %47 : vector<11x352xf32>
    %cst_36 = arith.constant 0.000000e+00 : f32
    %49 = vector.broadcast %cst_36 : f32 to vector<11x352xf32>
    %50 = arith.maximumf %48, %49 : vector<11x352xf32>
    %c0_37 = arith.constant 0 : index
    %c0_38 = arith.constant 0 : index
    %51 = vector.load %arg8[%c0_37, %c0_38] : memref<5x11xf32, #tpu.memory_space<vmem>>, vector<5x11xf32>
    %c0_39 = arith.constant 0 : index
    %c0_40 = arith.constant 0 : index
    %52 = vector.load %arg9[%c0_39, %c0_40] : memref<352x160xf32, #tpu.memory_space<vmem>>, vector<352x160xf32>
    %cst_41 = arith.constant dense<0.000000e+00> : vector<11x160xf32>
    %53 = tpu.matmul %50, %52, %cst_41 {dimension_numbers = #tpu.dot_dimension_numbers<[1], [0], [0], [1], [0, 0, 1, 1], [], []>} : vector<11x352xf32>, vector<352x160xf32>, vector<11x160xf32> -> vector<11x160xf32>
    %cst_42 = arith.constant dense<0.000000e+00> : vector<5x160xf32>
    %54 = tpu.matmul %51, %53, %cst_42 {dimension_numbers = #tpu.dot_dimension_numbers<[1], [0], [0], [1], [0, 0, 1, 1], [], []>} : vector<5x11xf32>, vector<11x160xf32>, vector<5x160xf32> -> vector<5x160xf32>
    %cst_43 = arith.constant 0.000000e+00 : f32
    %55 = vector.broadcast %cst_43 : f32 to vector<3x96xf32>
    %56 = vector.extract_strided_slice %54 {offsets = [0, 0], sizes = [3, 160], strides = [1, 1]} : vector<5x160xf32> to vector<3x160xf32>
    %57 = arith.truncf %56 : vector<3x160xf32> to vector<3x160xbf16>
    %c0_44 = arith.constant 0 : index
    %c0_45 = arith.constant 0 : index
    %c0_46 = arith.constant 0 : index
    %58 = vector.load %arg10[%c0_44, %c0_45, %c0_46] : memref<3x160x96xbf16, #tpu.memory_space<vmem>>, vector<1x160x96xbf16>
    %59 = vector.shape_cast %58 : vector<1x160x96xbf16> to vector<160x96xbf16>
    %cst_47 = arith.constant dense<0.000000e+00> : vector<3x96xf32>
    %60 = tpu.matmul %57, %59, %cst_47 {dimension_numbers = #tpu.dot_dimension_numbers<[1], [0], [0], [1], [0, 0, 1, 1], [], []>} : vector<3x160xbf16>, vector<160x96xbf16>, vector<3x96xf32> -> vector<3x96xf32>
    %61 = arith.addf %55, %60 : vector<3x96xf32>
    %62 = vector.extract_strided_slice %54 {offsets = [1, 0], sizes = [3, 160], strides = [1, 1]} : vector<5x160xf32> to vector<3x160xf32>
    %63 = arith.truncf %62 : vector<3x160xf32> to vector<3x160xbf16>
    %c1_48 = arith.constant 1 : index
    %c0_49 = arith.constant 0 : index
    %c0_50 = arith.constant 0 : index
    %64 = vector.load %arg10[%c1_48, %c0_49, %c0_50] : memref<3x160x96xbf16, #tpu.memory_space<vmem>>, vector<1x160x96xbf16>
    %65 = vector.shape_cast %64 : vector<1x160x96xbf16> to vector<160x96xbf16>
    %cst_51 = arith.constant dense<0.000000e+00> : vector<3x96xf32>
    %66 = tpu.matmul %63, %65, %cst_51 {dimension_numbers = #tpu.dot_dimension_numbers<[1], [0], [0], [1], [0, 0, 1, 1], [], []>} : vector<3x160xbf16>, vector<160x96xbf16>, vector<3x96xf32> -> vector<3x96xf32>
    %67 = arith.addf %61, %66 : vector<3x96xf32>
    %68 = vector.extract_strided_slice %54 {offsets = [2, 0], sizes = [3, 160], strides = [1, 1]} : vector<5x160xf32> to vector<3x160xf32>
    %69 = arith.truncf %68 : vector<3x160xf32> to vector<3x160xbf16>
    %c2_52 = arith.constant 2 : index
    %c0_53 = arith.constant 0 : index
    %c0_54 = arith.constant 0 : index
    %70 = vector.load %arg10[%c2_52, %c0_53, %c0_54] : memref<3x160x96xbf16, #tpu.memory_space<vmem>>, vector<1x160x96xbf16>
    %71 = vector.shape_cast %70 : vector<1x160x96xbf16> to vector<160x96xbf16>
    %cst_55 = arith.constant dense<0.000000e+00> : vector<3x96xf32>
    %72 = tpu.matmul %69, %71, %cst_55 {dimension_numbers = #tpu.dot_dimension_numbers<[1], [0], [0], [1], [0, 0, 1, 1], [], []>} : vector<3x160xbf16>, vector<160x96xbf16>, vector<3x96xf32> -> vector<3x96xf32>
    %73 = arith.addf %67, %72 : vector<3x96xf32>
    %c0_56 = arith.constant 0 : index
    %c0_57 = arith.constant 0 : index
    %74 = vector.load %arg11[%c0_56, %c0_57] : memref<1x96xf32, #tpu.memory_space<vmem>>, vector<1x96xf32>
    %75 = vector.broadcast %74 : vector<1x96xf32> to vector<3x96xf32>
    %76 = arith.addf %73, %75 : vector<3x96xf32>
    %cst_58 = arith.constant 0.000000e+00 : f32
    %77 = vector.broadcast %cst_58 : f32 to vector<3x96xf32>
    %78 = arith.maximumf %76, %77 : vector<3x96xf32>
    %c0_59 = arith.constant 0 : index
    %c0_60 = arith.constant 0 : index
    %79 = vector.load %arg12[%c0_59, %c0_60] : memref<1x3xf32, #tpu.memory_space<vmem>>, vector<1x3xf32>
    %c0_61 = arith.constant 0 : index
    %c0_62 = arith.constant 0 : index
    %80 = vector.load %arg13[%c0_61, %c0_62] : memref<96x32xf32, #tpu.memory_space<vmem>>, vector<96x32xf32>
    %cst_63 = arith.constant dense<0.000000e+00> : vector<3x32xf32>
    %81 = tpu.matmul %78, %80, %cst_63 {dimension_numbers = #tpu.dot_dimension_numbers<[1], [0], [0], [1], [0, 0, 1, 1], [], []>} : vector<3x96xf32>, vector<96x32xf32>, vector<3x32xf32> -> vector<3x32xf32>
    %cst_64 = arith.constant dense<0.000000e+00> : vector<1x32xf32>
    %82 = tpu.matmul %79, %81, %cst_64 {dimension_numbers = #tpu.dot_dimension_numbers<[1], [0], [0], [1], [0, 0, 1, 1], [], []>} : vector<1x3xf32>, vector<3x32xf32>, vector<1x32xf32> -> vector<1x32xf32>
    %c0_65 = arith.constant 0 : index
    %c0_66 = arith.constant 0 : index
    %83 = vector.load %arg14[%c0_65, %c0_66] : memref<32x10xf32, #tpu.memory_space<vmem>>, vector<32x10xf32>
    %cst_67 = arith.constant dense<0.000000e+00> : vector<1x10xf32>
    %84 = tpu.matmul %82, %83, %cst_67 {dimension_numbers = #tpu.dot_dimension_numbers<[1], [0], [0], [1], [0, 0, 1, 1], [], []>} : vector<1x32xf32>, vector<32x10xf32>, vector<1x10xf32> -> vector<1x10xf32>
    %c0_68 = arith.constant 0 : index
    %c0_69 = arith.constant 0 : index
    %85 = vector.load %arg15[%c0_68, %c0_69] : memref<1x10xf32, #tpu.memory_space<vmem>>, vector<1x10xf32>
    %86 = arith.addf %84, %85 : vector<1x10xf32>
    %c0_70 = arith.constant 0 : index
    %c0_71 = arith.constant 0 : index
    %c0_72 = arith.constant 0 : index
    %87 = vector.load %arg16[%c0_70, %c0_71, %c0_72] : memref<1x1x10xf32, #tpu.memory_space<vmem>>, vector<1x1x10xf32>
    %88 = vector.shape_cast %87 : vector<1x1x10xf32> to vector<1x10xf32>
    %89 = vector.shape_cast %86 : vector<1x10xf32> to vector<1x1x10xf32>
    tpu.vector_store %arg16[%c0_70, %c0_71, %c0_72], %89 {strides = array<i32>} : memref<1x1x10xf32, #tpu.memory_space<vmem>>, vector<1x1x10xf32>,
    return
  }
  func.func @transform_0(%arg0: i32) -> (i32, i32, i32) {
    %c0_i32 = arith.constant 0 : i32
    %c0_i32_0 = arith.constant 0 : i32
    %c0_i32_1 = arith.constant 0 : i32
    return %arg0, %c0_i32, %c0_i32_0 : i32, i32, i32
  }
  func.func @transform_1(%arg0: i32) -> (i32, i32, i32) {
    %c0_i32 = arith.constant 0 : i32
    %c0_i32_0 = arith.constant 0 : i32
    %c0_i32_1 = arith.constant 0 : i32
    %c0_i32_2 = arith.constant 0 : i32
    return %c0_i32, %c0_i32_0, %c0_i32_1 : i32, i32, i32
  }
  func.func @transform_2(%arg0: i32) -> (i32, i32) {
    %c0_i32 = arith.constant 0 : i32
    %c0_i32_0 = arith.constant 0 : i32
    %c0_i32_1 = arith.constant 0 : i32
    return %c0_i32, %c0_i32_0 : i32, i32
  }
  func.func @transform_3(%arg0: i32) -> (i32, i32) {
    %c0_i32 = arith.constant 0 : i32
    %c0_i32_0 = arith.constant 0 : i32
    %c0_i32_1 = arith.constant 0 : i32
    return %c0_i32, %c0_i32_0 : i32, i32
  }
  func.func @transform_4(%arg0: i32) -> (i32, i32) {
    %c0_i32 = arith.constant 0 : i32
    %c0_i32_0 = arith.constant 0 : i32
    %c0_i32_1 = arith.constant 0 : i32
    return %c0_i32, %c0_i32_0 : i32, i32
  }
  func.func @transform_5(%arg0: i32) -> (i32, i32, i32) {
    %c0_i32 = arith.constant 0 : i32
    %c0_i32_0 = arith.constant 0 : i32
    %c0_i32_1 = arith.constant 0 : i32
    %c0_i32_2 = arith.constant 0 : i32
    return %c0_i32, %c0_i32_0, %c0_i32_1 : i32, i32, i32
  }
  func.func @transform_6(%arg0: i32) -> (i32, i32) {
    %c0_i32 = arith.constant 0 : i32
    %c0_i32_0 = arith.constant 0 : i32
    %c0_i32_1 = arith.constant 0 : i32
    return %c0_i32, %c0_i32_0 : i32, i32
  }
  func.func @transform_7(%arg0: i32) -> (i32, i32) {
    %c0_i32 = arith.constant 0 : i32
    %c0_i32_0 = arith.constant 0 : i32
    %c0_i32_1 = arith.constant 0 : i32
    return %c0_i32, %c0_i32_0 : i32, i32
  }
  func.func @transform_8(%arg0: i32) -> (i32, i32) {
    %c0_i32 = arith.constant 0 : i32
    %c0_i32_0 = arith.constant 0 : i32
    %c0_i32_1 = arith.constant 0 : i32
    return %c0_i32, %c0_i32_0 : i32, i32
  }
  func.func @transform_9(%arg0: i32) -> (i32, i32, i32) {
    %c0_i32 = arith.constant 0 : i32
    %c0_i32_0 = arith.constant 0 : i32
    %c0_i32_1 = arith.constant 0 : i32
    %c0_i32_2 = arith.constant 0 : i32
    return %c0_i32, %c0_i32_0, %c0_i32_1 : i32, i32, i32
  }
  func.func @transform_10(%arg0: i32) -> (i32, i32) {
    %c0_i32 = arith.constant 0 : i32
    %c0_i32_0 = arith.constant 0 : i32
    %c0_i32_1 = arith.constant 0 : i32
    return %c0_i32, %c0_i32_0 : i32, i32
  }
  func.func @transform_11(%arg0: i32) -> (i32, i32) {
    %c0_i32 = arith.constant 0 : i32
    %c0_i32_0 = arith.constant 0 : i32
    %c0_i32_1 = arith.constant 0 : i32
    return %c0_i32, %c0_i32_0 : i32, i32
  }
  func.func @transform_12(%arg0: i32) -> (i32, i32) {
    %c0_i32 = arith.constant 0 : i32
    %c0_i32_0 = arith.constant 0 : i32
    %c0_i32_1 = arith.constant 0 : i32
    return %c0_i32, %c0_i32_0 : i32, i32
  }
  func.func @transform_13(%arg0: i32) -> (i32, i32) {
    %c0_i32 = arith.constant 0 : i32
    %c0_i32_0 = arith.constant 0 : i32
    %c0_i32_1 = arith.constant 0 : i32
    return %c0_i32, %c0_i32_0 : i32, i32
  }
  func.func @transform_14(%arg0: i32) -> (i32, i32) {
    %c0_i32 = arith.constant 0 : i32
    %c0_i32_0 = arith.constant 0 : i32
    %c0_i32_1 = arith.constant 0 : i32
    return %c0_i32, %c0_i32_0 : i32, i32
  }
  func.func @transform_15(%arg0: i32) -> (i32, i32, i32) {
    %c0_i32 = arith.constant 0 : i32
    %c0_i32_0 = arith.constant 0 : i32
    %c0_i32_1 = arith.constant 0 : i32
    return %arg0, %c0_i32, %c0_i32_0 : i32, i32, i32
  }
}

</mosaic_0001>

<bundles_post_ra>
// kernel: ann_forward.1
= control target key start
LH: loop header
LB: loop body
LE: loop exit
PB: predicated region body
PF: predicated region fallthrough
CT: control target
= control target key end

     0   :  { %s12044_s0 = inlined_call_operand.vmem [shape: bf16[2,28,28], index: 0, kind: input, shape index: {}]   ;;  %s12045_s1 = inlined_call_operand.vmem [shape: bf16[3,28,832], index: 1, kind: input, shape index: {}]   ;;  %s12046_s2 = inlined_call_operand.vmem [shape: f32[1,832], index: 2, kind: input, shape index: {}]   ;;  %s12047_s3 = inlined_call_operand.vmem [shape: f32[13,26], index: 3, kind: input, shape index: {}]   ;;  %s12048_s4 = inlined_call_operand.vmem [shape: f32[832,416], index: 4, kind: input, shape index: {}]   ;;  %s12049_s5 = inlined_call_operand.vmem [shape: bf16[3,416,352], index: 5, kind: input, shape index: {}]   ;;  %s12050_s6 = inlined_call_operand.vmem [shape: f32[1,352], index: 6, kind: input, shape index: {}]   ;;  %s12051_s7 = inlined_call_operand.vmem [shape: f32[5,11], index: 7, kind: input, shape index: {}]   ;;  %s12052_s8 = inlined_call_operand.vmem [shape: f32[352,160], index: 8, kind: input, shape index: {}]   ;;  %s12053_s9 = inlined_call_operand.vmem [shape: bf16[3,160,96], index: 9, kind: input, shape index: {}]   ;;  %s12054_s10 = inlined_call_operand.vmem [shape: f32[1,96], index: 10, kind: input, shape index: {}]   ;;  %s12055_s11 = inlined_call_operand.vmem [shape: f32[1,3], index: 11, kind: input, shape index: {}]   ;;  %s12056_s12 = inlined_call_operand.vmem [shape: f32[96,32], index: 12, kind: input, shape index: {}]   ;;  %s12057_s13 = inlined_call_operand.vmem [shape: f32[32,10], index: 13, kind: input, shape index: {}]   ;;  %s12058_s14 = inlined_call_operand.vmem [shape: f32[1,10], index: 14, kind: input, shape index: {}]   ;;  %s12059_s15 = inlined_call_operand.hbm [shape: f32[2,1,10], index: 15, kind: output, shape index: {}]  }
   0x1   :  { %12072 = sst [smem:[#allocation15_spill]] %s12044_s0 }
   0x2   :  { %20 = vsyncpa [#allocation3], 0 }
   0x3   :  { %22 = vsyncpa [#allocation3 + $0x1], 0  ;;  %s7764_s18 = smov 0   ;;  %s7766_s19 = smov 0  }
   0x4   :  { %s7768_s20 = smov 0   ;;  %s7770_s21 = smov 0  }
   0x5 LB: > { %12073 = sst [smem:[#allocation5_spill]] %s7670_s18  ;;  %s7785_s22 = sadd.s32 4294967295, %s7682_s21   ;;  %s7682_s21 = sphi %s7770_s21, %s12093_s21   ;;  %s7678_s20 = sphi %s7768_s20, %s12095_s20   ;;  %s7674_s19 = sphi %s7766_s19, %s12097_s19   ;;  %s7670_s18 = sphi %s7764_s18, %s12096_s18  }
   0x6   : > { %12074 = sst [smem:[#allocation6_spill]] %s7678_s20  ;;  %s5657_s23 = sadd.s32 4294967294, %s7682_s21  }
   0x7   : > { %12075 = sst [smem:[#allocation7_spill]] %s7682_s21  ;;  %s7789_s24 = sadd.s32 1, %s7682_s21  }
   0x8   : > { %12076 = sst [smem:[#allocation8_spill]] %s7789_s24  ;;  %s355_s25 = sadd.s32 1, %s7678_s20 }
   0x9   : > { %s352_s26 = ssub.s32 %s7682_s21, %s7789_s24  ;;  %p365_p0 = scmp.ne.s32.totalorder %s7678_s20, %s7674_s19 }
   0xa   : > { %p353_p1 = scmp.eq.s32.totalorder %s352_s26, 0  ;;  %p366_p2 = scmp.eq.s32.totalorder %s7785_s22, 1 }
   0xb   : > { %p371_p3 = scmp.ne.s32.totalorder %s7674_s19, %s7670_s18  ;;  %p372_p4 = scmp.eq.s32.totalorder %s5657_s23, 1 }
   0xc   : > { %s7800_s27 = scalar_select %p353_p1, %s7678_s20, %s355_s25  }
   0xd   : > { %p7802_p5 = por %p366_p2, %p365_p0  ;;  %p7806_p6 = por %p372_p4, %p371_p3 }
   0xe   : > { %12077 = sst [smem:[#allocation9_spill]] %s7800_s27  ;;  %p5660_p7 = scmp.ge.s32.totalorder %s7682_s21, 1 }
   0xf   : > { %s12078_s28 = scalar_select %p7802_p5, 1, 0 }
  0x10   : > { %s12080_s29 = scalar_select %p7806_p6, 1, 0 }
  0x11   : > { %12079 = sst [smem:[#allocation10_spill]] %s12078_s28  ;;  %p440_p8 = scmp.lt.s32.totalorder %s7682_s21, 3 }
  0x12   : > { %12081 = sst [smem:[#allocation11_spill]] %s12080_s29 }
  0x13   : > { %p441_p9 = pnand %p5660_p7, %p440_p8 }
  0x15   : > { %444 = sbr.rel (%p441_p9) target bundleno = 2002 (0x7d2), region = 80 }
  0x1a   : > { %v5717_v0 = vld [vmem:[%s12045_s1 + $0xa8] sm:$0xf]  ;;  %v7298_v1 = vld [vmem:[%s12045_s1 + $0xc0] sm:$0x30]  ;;  %vm628_vm0 = vcmask 1045504   ;;  %p487_p10 = scmp.lt.s32.totalorder %s7785_s22, 1  ;;  %s5598_s26 = scalar_lea.hbm %s12059_s15, %s7785_s22 }
  0x1b   : > { %v5718_v2 = vor.u32 %v7298_v1, %v5717_v0  ;;  %v7295_v3 = vld [vmem:[%s12045_s1 + $0xac] sm:$0xf]  ;;  %v5719_v4 = vld [vmem:[%s12045_s1 + $0xc4] sm:$0x30]  ;;  %v5725_v5 = vld [vmem:[%s12045_s1 + $0xb0] sm:$0xf] }
  0x1c   : > { %v5722_v6 = vor.u32 %v7295_v3, %v5719_v4  ;;  %v7299_v7 = vld [vmem:[%s12045_s1 + $0xc8] sm:$0x30]  ;;  %v7296_v8 = vld [vmem:[%s12045_s1 + $0xb4] sm:$0xf]  ;;  %v5727_v9 = vld [vmem:[%s12045_s1 + $0xcc] sm:$0x30] }
  0x1d   : > { %v630_v10 = vsel %vm628_vm0, %v5718_v2, 0  ;;  %v5726_v11 = vor.u32 %v7299_v7, %v5725_v5  ;;  %v5730_v12 = vor.u32 %v7296_v8, %v5727_v9  ;;  %v5689_v13 = vld [vmem:[%s12045_s1 + $0x70] sm:$0xf]  ;;  %v7291_v14 = vld [vmem:[%s12045_s1 + $0x88] sm:$0xf0]  ;;  %s488_s16 = scalar_select %p487_p10, %s7785_s22, 1 }
  0x1e   : > { %656 = vmatpush.bf16.msra.mxu0 %v630_v10  ;;  %v633_v15 = vsel %vm628_vm0, %v5722_v6, 0  ;;  %v5690_v16 = vor.u32 %v7291_v14, %v5689_v13  ;;  %v7288_v17 = vld [vmem:[%s12045_s1 + $0x74] sm:$0xf]  ;;  %v5691_v18 = vld [vmem:[%s12045_s1 + $0x8c] sm:$0xf0]  ;;  %s12082_s0 = sld [smem:[#allocation15_spill]] }
  0x1f   : > { %675 = vmatpush.bf16.msra.mxu1 %v633_v15  ;;  %v636_v19 = vsel %vm628_vm0, %v5726_v11, 0  ;;  %v639_v20 = vsel %vm628_vm0, %v5730_v12, 0  ;;  %v5694_v21 = vor.u32 %v7288_v17, %v5691_v18  ;;  %v5697_v22 = vld [vmem:[%s12045_s1 + $0x78] sm:$0xf]  ;;  %v7292_v23 = vld [vmem:[%s12045_s1 + $0x90] sm:$0xf0] }
  0x20   : > { %694 = vmatpush.bf16.msra.mxu2 %v636_v19  ;;  %713 = vmatpush.bf16.msra.mxu3 %v639_v20  ;;  %v5698_v24 = vor.u32 %v7292_v23, %v5697_v22  ;;  %v7289_v25 = vld [vmem:[%s12045_s1 + $0x7c] sm:$0xf]  ;;  %v5699_v26 = vld [vmem:[%s12045_s1 + $0x94] sm:$0xf0]  ;;  %s7271_s29 = sshll.u32 %s488_s16, 4  ;;  %vm621_vm2 = vcmask 228352  }
  0x21   : > { %v5702_v27 = vor.u32 %v7289_v25, %v5699_v26  ;;  %vm540_vm1 = vsmask.f32 7424  ;;  %v5733_v28 = vld [vmem:[%s12045_s1 + $0xb8] sm:$0xf]  ;;  %v7300_v29 = vld [vmem:[%s12045_s1 + $0xd0] sm:$0x30] }
  0x22   : > { %657 = vmatpush.bf16.msra.mxu0 %v5690_v16  ;;  %v5734_v33 = vor.u32 %v7300_v29, %v5733_v28  ;;  %v7297_v35 = vld [vmem:[%s12045_s1 + $0xbc] sm:$0xf]  ;;  %v5735_v36 = vld [vmem:[%s12045_s1 + $0xd4] sm:$0x30]  ;;  %v5741_v37 = vld [vmem:[%s12045_s1 + $0xc0] sm:$0xf] }
  0x23   : > { %676 = vmatpush.bf16.msra.mxu1 %v5694_v21  ;;  %v5738_v41 = vor.u32 %v7297_v35, %v5735_v36  ;;  %v7301_v42 = vld [vmem:[%s12045_s1 + $0xd8] sm:$0x30]  ;;  %v5787_v45 = vld [vmem:[%s12045_s1 + $0x38] sm:$0xf]  ;;  %v7284_v46 = vld [vmem:[%s12045_s1 + $0x50] sm:$0x30] }
  0x24   : > { %s491_s25 = scalar_lea.vmem %s12082_s0, %s7271_s29  ;;  %695 = vmatpush.bf16.msra.mxu2 %v5698_v24  ;;  %714 = vmatpush.bf16.msra.mxu3 %v5702_v27  ;;  %v642_v40 = vsel %vm628_vm0, %v5734_v33, 0  ;;  %v5742_v44 = vor.u32 %v7301_v42, %v5741_v37  ;;  %v5788_v49 = vor.u32 %v7284_v46, %v5787_v45  ;;  %v5705_v50 = vld [vmem:[%s12045_s1 + $0x80] sm:$0xf]  ;;  %v7293_v51 = vld [vmem:[%s12045_s1 + $0x98] sm:$0xf0]  ;;  %vm1023_vm3 = vcmask 1046528  }
  0x25   : > { %v7877_v30 = vld [vmem:[%s491_s25] sm:$0xff]  ;;  %v5685_v31 = vld [vmem:[%s491_s25 + $0x8] sm:$0xf]  ;;  %v7273_v32 = vld [vmem:[%s491_s25 + $0x8] sm:$0x30]  ;;  %v645_v48 = vsel %vm628_vm0, %v5738_v41, 0  ;;  %v5706_v54 = vor.u32 %v7293_v51, %v5705_v50 }
  0x26   : > { %v7879_v34 = vor.u32 %v7273_v32, %v5685_v31  ;;  %v542_v38 = vshrl.u32 %v7877_v30, 16  ;;  %v544_v39 = vshll.u32 %v7877_v30, 16  ;;  %732 = vmatpush.bf16.msrb.mxu0 %v642_v40  ;;  %v648_v53 = vsel %vm628_vm0, %v5742_v44, 0  ;;  %v7290_v55 = vld [vmem:[%s12045_s1 + $0x84] sm:$0xf]  ;;  %s485_s20 = sand.u32 1, %s7674_s19  }
  0x27   : > { %751 = vmatpush.bf16.msrb.mxu1 %v645_v48  ;;  %v5707_v56 = vld [vmem:[%s12045_s1 + $0x9c] sm:$0xf0]  ;;  %v853_v58 = vsel %vm628_vm0, %v5788_v49, 0  ;;  %v5713_v59 = vld [vmem:[%s12045_s1 + $0x88] sm:$0xf]  ;;  %vm1770_vm4 = vcmask 523264  }
  0x28   : > { %v549_v43 = vshll.u32 %v7879_v34, 16  ;;  %v546_v47 = vrot.slane %v544_v39, 1  ;;  %770 = vmatpush.bf16.msrb.mxu2 %v648_v53  ;;  %v7294_v60 = vld [vmem:[%s12045_s1 + $0xa0] sm:$0xf0]  ;;  %879 = vmatpush.bf16.msrb.mxu3 %v853_v58  ;;  %v5710_v61 = vor.u32 %v7290_v55, %v5707_v56  ;;  %v5759_v63 = vld [vmem:[%s12045_s1] sm:$0xf] }
  0x29   : > { %v5714_v62 = vor.u32 %v7294_v60, %v5713_v59  ;;  %v7277_v0 = vld [vmem:[%s12045_s1 + $0x18] sm:$0xf0]  ;;  %v553_v3 = vshrl.u32 %v7879_v34, 16  ;;  %v5789_v6 = vld [vmem:[%s12045_s1 + $0x54] sm:$0x30]  ;;  %vm2602_vm5 = vcmask 1041408  }
  0x2a   : > { %v551_v52 = vrot.slane %v549_v43, 1  ;;  %v547_v57 = vor.u32 %v546_v47, %v542_v38  ;;  %733 = vmatpush.bf16.msrb.mxu0 %v5706_v54  ;;  %v5760_v2 = vor.u32 %v7277_v0, %v5759_v63  ;;  %v7281_v5 = vld [vmem:[%s12045_s1 + $0x3c] sm:$0xf]  ;;  %v5795_v7 = vld [vmem:[%s12045_s1 + $0x40] sm:$0xf]  ;;  %vm2595_vm6 = vcmask 211968  }
  0x2b   : > { %752 = vmatpush.bf16.msrb.mxu1 %v5710_v61  ;;  %v5792_v8 = vor.u32 %v7281_v5, %v5789_v6  ;;  %v7285_v9 = vld [vmem:[%s12045_s1 + $0x58] sm:$0x30]  ;;  %v7282_v10 = vld [vmem:[%s12045_s1 + $0x44] sm:$0xf]  ;;  %v5797_v11 = vld [vmem:[%s12045_s1 + $0x5c] sm:$0x30] }
  0x2c   : > { %v552_v1 = vsel %vm540_vm1, %v547_v57, %v551_v52  ;;  %771 = vmatpush.bf16.msrb.mxu2 %v5714_v62  ;;  %880 = vmatpush.bf16.msrb.mxu3 %v5760_v2  ;;  %v555_v4 = vor.u32 %v553_v3, %v551_v52  ;;  %v5796_v12 = vor.u32 %v7285_v9, %v5795_v7  ;;  %v5803_v14 = vld [vmem:[%s12045_s1 + $0x48] sm:$0xf]  ;;  %v7286_v15 = vld [vmem:[%s12045_s1 + $0x60] sm:$0x30]  ;;  %v5761_v19 = vld [vmem:[%s12045_s1 + $0x1c] sm:$0xf0] }
  0x2d   : > { %5743 = vmatmul.msk.bf16.vlgmr.msra.gmra.mxu0 %vm621_vm2, %v552_v1  ;;  %5745 = vmatmul.msk.bf16.vlgmr.msra.gmra.mxu1 %vm621_vm2, %v552_v1  ;;  %v5800_v13 = vor.u32 %v7282_v10, %v5797_v11  ;;  %v7274_v16 = vld [vmem:[%s12045_s1 + $0x4] sm:$0xf]  ;;  %v856_v17 = vsel %vm628_vm0, %v5792_v8, 0  ;;  %v5804_v18 = vor.u32 %v7286_v15, %v5803_v14  ;;  %v5767_v20 = vld [vmem:[%s12045_s1 + $0x8] sm:$0xf]  ;;  %v1024_v15 = vrot.slane %v7877_v30, 1 }
  0x2e   : > { %5747 = vmatmul.msk.bf16.vlgmr.msra.gmra.mxu2 %vm621_vm2, %v552_v1  ;;  %5749 = vmatmul.msk.bf16.vlgmr.msra.gmra.mxu3 %vm621_vm2, %v552_v1  ;;  %v859_v21 = vsel %vm628_vm0, %v5796_v12, 0  ;;  %v5764_v23 = vor.u32 %v7274_v16, %v5761_v19  ;;  %v7278_v24 = vld [vmem:[%s12045_s1 + $0x20] sm:$0xf0]  ;;  %v7275_v25 = vld [vmem:[%s12045_s1 + $0xc] sm:$0xf]  ;;  %v8100_v16 = vrot.slane %v7879_v34, 1 }
  0x2f   : > { %898 = vmatpush.bf16.msra.mxu0 %v856_v17  ;;  %v862_v22 = vsel %vm628_vm0, %v5800_v13, 0  ;;  %917 = vmatpush.bf16.msra.mxu1 %v859_v21  ;;  %v865_v26 = vsel %vm628_vm0, %v5804_v18, 0  ;;  %v5768_v27 = vor.u32 %v7278_v24, %v5767_v20  ;;  %v5769_v28 = vld [vmem:[%s12045_s1 + $0x24] sm:$0xf0]  ;;  %v5775_v29 = vld [vmem:[%s12045_s1 + $0x10] sm:$0xf] }
  0x30   : > { %936 = vmatpush.bf16.msra.mxu2 %v862_v22  ;;  %955 = vmatpush.bf16.msra.mxu3 %v865_v26  ;;  %v5772_v31 = vor.u32 %v7275_v25, %v5769_v28  ;;  %v7279_v32 = vld [vmem:[%s12045_s1 + $0x28] sm:$0xf0]  ;;  %v5805_v36 = vld [vmem:[%s12045_s1 + $0x64] sm:$0x30]  ;;  %v5811_v37 = vld [vmem:[%s12045_s1 + $0x50] sm:$0xf]  ;;  %v1026_v28 = vsel %vm1023_vm3, %v1024_v15, %v8100_v16 }
  0x31   : > { %v5776_v33 = vor.u32 %v7279_v32, %v5775_v29  ;;  %v7283_v35 = vld [vmem:[%s12045_s1 + $0x4c] sm:$0xf]  ;;  %v5873_v40 = vld [vmem:[%s12045_s1 + $0x118] sm:$0xf]  ;;  %v7312_v41 = vld [vmem:[%s12045_s1 + $0x130] sm:$0x30] }
  0x32   : > { %v5808_v38 = vor.u32 %v7283_v35, %v5805_v36  ;;  %v7287_v39 = vld [vmem:[%s12045_s1 + $0x68] sm:$0x30]  ;;  %v5874_v43 = vor.u32 %v7312_v41, %v5873_v40  ;;  %v7309_v44 = vld [vmem:[%s12045_s1 + $0x11c] sm:$0xf]  ;;  %v5875_v45 = vld [vmem:[%s12045_s1 + $0x134] sm:$0x30] }
  0x33   : > { %899 = vmatpush.bf16.msra.mxu0 %v5764_v23  ;;  %918 = vmatpush.bf16.msra.mxu1 %v5768_v27  ;;  %v5812_v42 = vor.u32 %v7287_v39, %v5811_v37  ;;  %v7276_v46 = vld [vmem:[%s12045_s1 + $0x14] sm:$0xf]  ;;  %v5878_v48 = vor.u32 %v7309_v44, %v5875_v45  ;;  %v5777_v49 = vld [vmem:[%s12045_s1 + $0x2c] sm:$0xf0]  ;;  %v5783_v50 = vld [vmem:[%s12045_s1 + $0x18] sm:$0xf] }
  0x34   : > { %937 = vmatpush.bf16.msra.mxu2 %v5772_v31  ;;  %956 = vmatpush.bf16.msra.mxu3 %v5776_v33  ;;  %v868_v47 = vsel %vm628_vm0, %v5808_v38, 0  ;;  %v1099_v52 = vsel %vm628_vm0, %v5874_v43, 0  ;;  %v5780_v53 = vor.u32 %v7276_v46, %v5777_v49  ;;  %v7280_v54 = vld [vmem:[%s12045_s1 + $0x30] sm:$0xf0]  ;;  %v5845_v55 = vld [vmem:[%s12045_s1 + $0xe0] sm:$0xf] }
  0x35   : > { %v871_v51 = vsel %vm628_vm0, %v5812_v42, 0  ;;  %v1102_v56 = vsel %vm628_vm0, %v5878_v48, 0  ;;  %v5784_v57 = vor.u32 %v7280_v54, %v5783_v50  ;;  %v7305_v58 = vld [vmem:[%s12045_s1 + $0xf8] sm:$0xf0]  ;;  %v7302_v59 = vld [vmem:[%s12045_s1 + $0xe4] sm:$0xf] }
  0x36   : > { %v5846_v60 = vor.u32 %v7305_v58, %v5845_v55  ;;  %v5847_v61 = vld [vmem:[%s12045_s1 + $0xfc] sm:$0xf0]  ;;  %v7313_v0 = vld [vmem:[%s12045_s1 + $0x138] sm:$0x30]  ;;  %v7314_v5 = vld [vmem:[%s12045_s1 + $0x140] sm:$0x30] }
  0x37   : > { %v5850_v62 = vor.u32 %v7302_v59, %v5847_v61  ;;  %v5881_v63 = vld [vmem:[%s12045_s1 + $0x120] sm:$0xf]  ;;  %v7311_v8 = vld [vmem:[%s12045_s1 + $0x12c] sm:$0xf]  ;;  %v5891_v9 = vld [vmem:[%s12045_s1 + $0x144] sm:$0x30] }
  0x38   : > { %v5882_v2 = vor.u32 %v7313_v0, %v5881_v63  ;;  %v5883_v3 = vld [vmem:[%s12045_s1 + $0x13c] sm:$0x30]  ;;  %v5894_v11 = vor.u32 %v7311_v8, %v5891_v9  ;;  %v5853_v17 = vld [vmem:[%s12045_s1 + $0xe8] sm:$0xf]  ;;  %v7306_v18 = vld [vmem:[%s12045_s1 + $0x100] sm:$0xf0] }
  0x39   : > { %v7303_v19 = vld [vmem:[%s12045_s1 + $0xec] sm:$0xf]  ;;  %v5854_v20 = vor.u32 %v7306_v18, %v5853_v17  ;;  %v5855_v21 = vld [vmem:[%s12045_s1 + $0x104] sm:$0xf0]  ;;  %v5861_v22 = vld [vmem:[%s12045_s1 + $0xf0] sm:$0xf] }
  0x3a   : > { %v1105_v10 = vsel %vm628_vm0, %v5882_v2, 0  ;;  %v1114_v14 = vsel %vm628_vm0, %v5894_v11, 0  ;;  %v7307_v23 = vld [vmem:[%s12045_s1 + $0x108] sm:$0xf0]  ;;  %v5858_v24 = vor.u32 %v7303_v19, %v5855_v21  ;;  %v7304_v26 = vld [vmem:[%s12045_s1 + $0xf4] sm:$0xf] }
  0x3b   : > { %v5862_v25 = vor.u32 %v7307_v23, %v5861_v22  ;;  %v5863_v27 = vld [vmem:[%s12045_s1 + $0x10c] sm:$0xf0]  ;;  %v7315_v31 = vld [vmem:[%s12045_s1 + $0x148] sm:$0x30]  ;;  %v7308_v35 = vld [vmem:[%s12045_s1 + $0x110] sm:$0xf0] }
  0x3c   : > { %v5866_v29 = vor.u32 %v7304_v26, %v5863_v27  ;;  %v1414_v59 = vld [vmem:[%s12048_s4 + $0x1e0] sm:$0xff]  ;;  %vm3367_vm7 = vcmask 261120   ;;  %vm4943_vm8 = vcmask 785408   ;;  %vm5092_vm9 = vcmask 1042432   ;;  %s486_s21 = scalar_lea.vmem [#allocation2], %s485_s20  ;;  %s5602_s29 = sshll.u32 %s5598_s26, 4  ;;  %s5603_s29 = int_to_ptr.hbm [resolvable:$true] %s5602_s29 }
  0x3d   : > { %5744 = vmatmul.msk.bf16.gmra.mxu0 %vm621_vm2, %v555_v4  ;;  %5746 = vmatmul.msk.bf16.gmra.mxu1 %vm621_vm2, %v555_v4  ;;  %v1474_v2 = vld [vmem:[%s12048_s4 + $0x3c0] sm:$0xff]  ;;  %vm5088_vm10 = vcmask 89088   ;;  %vm5532_vm11 = vcmask 23552   ;;  %s5600_s28 = sshll.u32 %s486_s21, 4  ;;  %vm5587_vm12 = vcmask 73728   ;;  %s5590_s17 = scalar_lea.sflag [#allocation3], %s485_s20  ;;  %s5601_s28 = int_to_ptr.vmem [resolvable:$true] %s5600_s28 }
  0x3e   : > { %5748 = vmatmul.msk.bf16.gmra.mxu2 %vm621_vm2, %v555_v4  ;;  %5750 = vmatmul.msk.bf16.gmra.mxu3 %vm621_vm2, %v555_v4  ;;  %v1462_v8 = vld [vmem:[%s12048_s4 + $0x360] sm:$0xff]  ;;  %s7634_s23 = sshra.s32 %s5603_s29, 4  ;;  %s7640_s16 = scalar_lea.hbm %s12059_s15, 2  ;;  %s7635_s23 = int_to_ptr.hbm [resolvable:$true] %s7634_s23 }
  0x3f   : > { %v1390_v15 = vld [vmem:[%s12048_s4 + $0x120] sm:$0xff]  ;;  %s7636_s25 = scalar_lea.hbm %s7635_s23, 1  ;;  %p7641_p0 = scmp.lt.s32.totalorder %s7635_s23, %s12059_s15 }
  0x40   : > { %v1386_v17 = vld [vmem:[%s12048_s4 + $0x100] sm:$0xff]  ;;  %p7637_p11 = scmp.ne.s32.totalorder %s7635_s23, %s7636_s25  ;;  %p7642_p1 = scmp.lt.s32.totalorder %s7640_s16, %s7636_s25 }
  0x41   : > { %v1450_v18 = vld [vmem:[%s12048_s4 + $0x300] sm:$0xff] }
  0x42   : > { %v1382_v19 = vld [vmem:[%s12048_s4 + $0xe0] sm:$0xff]  ;;  %p7638_p12 = pnand %p7637_p11, %p7802_p5  ;;  %p7643_p2 = por %p7642_p1, %p7641_p0 }
  0x43   : > { %v1442_v26 = vld [vmem:[%s12048_s4 + $0x2c0] sm:$0xff] }
  0x44   : > { %v1374_v27 = vld [vmem:[%s12048_s4 + $0xa0] sm:$0xff]  ;;  %p7639_p13 = pneg %p7638_p12 }
  0x46   : > { %p7644_p3 = pnand %p7643_p2, %p7639_p13 }
  0x4d   : > { %5751 = vmatmul.msk.bf16.vlgmr.msrb.gmra.mxu0 %vm621_vm2, %v552_v1  ;;  %5753 = vmatmul.msk.bf16.vlgmr.msrb.gmra.mxu1 %vm621_vm2, %v552_v1 }
  0x4e   : > { %5755 = vmatmul.msk.bf16.vlgmr.msrb.gmra.mxu2 %vm621_vm2, %v552_v1  ;;  %5813 = vmatmul.msk.bf16.vlgmr.msrb.gmra.mxu3 %vm621_vm2, %v7877_v30  ;;  %v7310_v1 = vld [vmem:[%s12045_s1 + $0x124] sm:$0xf] }
  0x4f   : > { %974 = vmatpush.bf16.msrb.mxu0 %v868_v47  ;;  %993 = vmatpush.bf16.msrb.mxu1 %v871_v51  ;;  %v5886_v6 = vor.u32 %v7310_v1, %v5883_v3  ;;  %v1410_v1 = vld [vmem:[%s12048_s4 + $0x1c0] sm:$0xff] }
  0x50   : > { %1125 = vmatpush.bf16.msrb.mxu2 %v1099_v52  ;;  %1144 = vmatpush.bf16.msrb.mxu3 %v1102_v56  ;;  %v1406_v3 = vld [vmem:[%s12048_s4 + $0x1a0] sm:$0xff] }
  0x51   : > { %v1108_v12 = vsel %vm628_vm0, %v5886_v6, 0  ;;  %v1466_v6 = vld [vmem:[%s12048_s4 + $0x380] sm:$0xff] }
  0x53   : > { %975 = vmatpush.bf16.msrb.mxu0 %v5780_v53  ;;  %994 = vmatpush.bf16.msrb.mxu1 %v5784_v57 }
  0x54   : > { %1126 = vmatpush.bf16.msrb.mxu2 %v5846_v60  ;;  %1145 = vmatpush.bf16.msrb.mxu3 %v5850_v62  ;;  %v1478_v60 = vld [vmem:[%s12048_s4 + $0x3e0] sm:$0xff] }
  0x5d   : > { %5752 = vmatmul.msk.bf16.gmra.mxu0 %vm621_vm2, %v555_v4  ;;  %5754 = vmatmul.msk.bf16.gmra.mxu1 %vm621_vm2, %v555_v4 }
  0x5e   : > { %5756 = vmatmul.msk.bf16.gmra.mxu2 %vm621_vm2, %v555_v4  ;;  %5814 = vmatmul.msk.bf16.gmra.mxu3 %vm621_vm2, %v7879_v34  ;;  %v5889_v4 = vld [vmem:[%s12045_s1 + $0x128] sm:$0xf] }
  0x5f   : > { %v5890_v7 = vor.u32 %v7314_v5, %v5889_v4  ;;  %v1470_v4 = vld [vmem:[%s12048_s4 + $0x3a0] sm:$0xff] }
  0x60   : > { %v1402_v5 = vld [vmem:[%s12048_s4 + $0x180] sm:$0xff] }
  0x61   : > { %v1111_v13 = vsel %vm628_vm0, %v5890_v7, 0  ;;  %v1398_v7 = vld [vmem:[%s12048_s4 + $0x160] sm:$0xff] }
  0x6d   : > { %5815 = vmatmul.msk.bf16.vlgmr.msra.gmra.mxu0 %vm621_vm2, %v7877_v30  ;;  %5817 = vmatmul.msk.bf16.vlgmr.msra.gmra.mxu1 %vm621_vm2, %v7877_v30 }
  0x6e   : > { %5819 = vmatmul.msk.bf16.vlgmr.msra.gmra.mxu2 %vm621_vm2, %v7877_v30  ;;  %5821 = vmatmul.msk.bf16.vlgmr.msra.gmra.mxu3 %vm621_vm2, %v7877_v30 }
  0x6f   : > { %1163 = vmatpush.bf16.msra.mxu0 %v1105_v10  ;;  %1182 = vmatpush.bf16.msra.mxu1 %v1108_v12 }
  0x70   : > { %1201 = vmatpush.bf16.msra.mxu2 %v1111_v13  ;;  %1220 = vmatpush.bf16.msra.mxu3 %v1114_v14  ;;  %v1394_v13 = vld [vmem:[%s12048_s4 + $0x140] sm:$0xff] }
  0x71   : > { %v1458_v14 = vld [vmem:[%s12048_s4 + $0x340] sm:$0xff] }
  0x73   : > { %1164 = vmatpush.bf16.msra.mxu0 %v5854_v20  ;;  %1183 = vmatpush.bf16.msra.mxu1 %v5858_v24  ;;  %v1446_v20 = vld [vmem:[%s12048_s4 + $0x2e0] sm:$0xff] }
  0x74   : > { %1202 = vmatpush.bf16.msra.mxu2 %v5862_v25  ;;  %1221 = vmatpush.bf16.msra.mxu3 %v5866_v29  ;;  %v1378_v25 = vld [vmem:[%s12048_s4 + $0xc0] sm:$0xff] }
  0x75   : > { %v1370_v29 = vld [vmem:[%s12048_s4 + $0x80] sm:$0xff] }
  0x7d   : > { %5816 = vmatmul.msk.bf16.gmra.mxu0 %vm621_vm2, %v7879_v34  ;;  %5818 = vmatmul.msk.bf16.gmra.mxu1 %vm621_vm2, %v7879_v34 }
  0x7e   : > { %5820 = vmatmul.msk.bf16.gmra.mxu2 %vm621_vm2, %v7879_v34  ;;  %5822 = vmatmul.msk.bf16.gmra.mxu3 %vm621_vm2, %v7879_v34 }
  0x8d   : > { %5823 = vmatmul.msk.bf16.vlgmr.msrb.gmra.mxu0 %vm621_vm2, %v7877_v30  ;;  %5825 = vmatmul.msk.bf16.vlgmr.msrb.gmra.mxu1 %vm621_vm2, %v7877_v30  ;;  %v5897_v30 = vld [vmem:[%s12045_s1 + $0x130] sm:$0xf] }
  0x8e   : > { %5899 = vmatmul.msk.bf16.vlgmr.msrb.gmra.mxu2 %vm621_vm2, %v1026_v28  ;;  %5901 = vmatmul.msk.bf16.vlgmr.msrb.gmra.mxu3 %vm621_vm2, %v1026_v28  ;;  %v5898_v32 = vor.u32 %v7315_v31, %v5897_v30  ;;  %v1434_v30 = vld [vmem:[%s12048_s4 + $0x280] sm:$0xff] }
  0x8f   : > { %1783 = vmatpush.msrb.mxu1 %v1414_v59  ;;  %1812 = vmatpush.msrb.mxu2 %v1478_v60  ;;  %v1366_v31 = vld [vmem:[%s12048_s4 + $0x60] sm:$0xff] }
  0x90   : > { %v1117_v33 = vsel %vm628_vm0, %v5898_v32, 0  ;;  %v1430_v32 = vld [vmem:[%s12048_s4 + $0x260] sm:$0xff] }
  0x91   : > { %1239 = vmatpush.bf16.msrb.mxu0 %v1117_v33  ;;  %1784 = vmatpush.msrb.mxu1 %v1410_v1  ;;  %v1362_v59 = vld [vmem:[%s12048_s4 + $0x40] sm:$0xff] }
  0x92   : > { %1813 = vmatpush.msrb.mxu2 %v1474_v2  ;;  %v1426_v60 = vld [vmem:[%s12048_s4 + $0x240] sm:$0xff] }
  0x93   : > { %1785 = vmatpush.msrb.mxu1 %v1406_v3  ;;  %v1542_v1 = vld [vmem:[%s12048_s4 + $0x5e0] sm:$0xff] }
  0x94   : > { %1814 = vmatpush.msrb.mxu2 %v1470_v4  ;;  %1841 = vmatpush.msrb.mxu3 %v1542_v1  ;;  %v1606_v2 = vld [vmem:[%s12048_s4 + $0x7e0] sm:$0xff] }
  0x95   : > { %1786 = vmatpush.msrb.mxu1 %v1402_v5  ;;  %v1358_v3 = vld [vmem:[%s12048_s4 + $0x20] sm:$0xff] }
  0x96   : > { %1815 = vmatpush.msrb.mxu2 %v1466_v6  ;;  %v1422_v4 = vld [vmem:[%s12048_s4 + $0x220] sm:$0xff] }
  0x97   : > { %1787 = vmatpush.msrb.mxu1 %v1398_v7  ;;  %v1538_v5 = vld [vmem:[%s12048_s4 + $0x5c0] sm:$0xff] }
  0x98   : > { %1816 = vmatpush.msrb.mxu2 %v1462_v8  ;;  %1842 = vmatpush.msrb.mxu3 %v1538_v5  ;;  %v1602_v6 = vld [vmem:[%s12048_s4 + $0x7c0] sm:$0xff] }
  0x99   : > { %1788 = vmatpush.msrb.mxu1 %v1394_v13  ;;  %v1354_v7 = vld [vmem:[%s12048_s4] sm:$0xff] }
  0x9a   : > { %1817 = vmatpush.msrb.mxu2 %v1458_v14  ;;  %v1418_v8 = vld [vmem:[%s12048_s4 + $0x200] sm:$0xff] }
  0x9b   : > { %1789 = vmatpush.msrb.mxu1 %v1390_v15  ;;  %v1534_v13 = vld [vmem:[%s12048_s4 + $0x5a0] sm:$0xff] }
  0x9c   : > { %1843 = vmatpush.msrb.mxu3 %v1534_v13  ;;  %v1598_v14 = vld [vmem:[%s12048_s4 + $0x7a0] sm:$0xff] }
  0x9d   : > { %5824 = vmatmul.msk.bf16.gmra.mxu0 %vm621_vm2, %v7879_v34  ;;  %5826 = vmatmul.msk.bf16.gmra.mxu1 %vm621_vm2, %v7879_v34  ;;  %v5869_v34 = vld [vmem:[%s12045_s1 + $0xf8] sm:$0xf]  ;;  %v1530_v15 = vld [vmem:[%s12048_s4 + $0x580] sm:$0xff] }
  0x9e   : > { %5900 = vmatmul.msk.bf16.gmra.mxu2 %vm621_vm2, %v8100_v16  ;;  %5902 = vmatmul.msk.bf16.gmra.mxu3 %vm621_vm2, %v8100_v16  ;;  %v5870_v36 = vor.u32 %v7308_v35, %v5869_v34  ;;  %v1518_v1 = vld [vmem:[%s12048_s4 + $0x520] sm:$0xff] }
  0x9f   : > { %1790 = vmatpush.msrb.mxu1 %v1386_v17  ;;  %v1670_v17 = vld [vmem:[%s12048_s4 + $0x9e0] sm:$0xff]  ;;  %1844 = vmatpush.msrb.mxu3 %v1530_v15 }
  0xa0   : > { %1240 = vmatpush.bf16.msrb.mxu0 %v5870_v36  ;;  %v1514_v5 = vld [vmem:[%s12048_s4 + $0x500] sm:$0xff] }
  0xa1   : > { %1791 = vmatpush.msrb.mxu1 %v1382_v19 }
  0xa3   : > { %1792 = vmatpush.msrb.mxu1 %v1378_v25 }
  0xa5   : > { %1793 = vmatpush.msrb.mxu1 %v1374_v27  ;;  %v1526_v27 = vld [vmem:[%s12048_s4 + $0x560] sm:$0xff] }
  0xa6   : > { %1845 = vmatpush.msrb.mxu3 %v1526_v27  ;;  %v1650_v27 = vld [vmem:[%s12048_s4 + $0x940] sm:$0xff] }
  0xa7   : > { %1794 = vmatpush.msrb.mxu1 %v1370_v29  ;;  %v1666_v29 = vld [vmem:[%s12048_s4 + $0x9c0] sm:$0xff] }
  0xa9   : > { %1795 = vmatpush.msrb.mxu1 %v1366_v31  ;;  %v1522_v31 = vld [vmem:[%s12048_s4 + $0x540] sm:$0xff] }
  0xaa   : > { %v8154_v37 = vpop.f32.mrf.mxu0  ;;  %v8156_v38 = vpop.f32.mrf.mxu1  ;;  %1846 = vmatpush.msrb.mxu3 %v1522_v31  ;;  %v1646_v31 = vld [vmem:[%s12048_s4 + $0x920] sm:$0xff] }
  0xab   : > { %1796 = vmatpush.msrb.mxu1 %v1362_v59  ;;  %v1662_v59 = vld [vmem:[%s12048_s4 + $0x9a0] sm:$0xff] }
  0xac   : > { %1847 = vmatpush.msrb.mxu3 %v1518_v1  ;;  %v1642_v1 = vld [vmem:[%s12048_s4 + $0x900] sm:$0xff] }
  0xad   : > { %5903 = vmatmul.msk.bf16.vlgmr.msra.gmra.mxu0 %vm621_vm2, %v1026_v28  ;;  %5905 = vmatmul.msk.bf16.vlgmr.msra.gmra.mxu1 %vm621_vm2, %v1026_v28 }
  0xae   : > { %5907 = vmatmul.msk.bf16.vlgmr.msra.gmra.mxu2 %vm621_vm2, %v1026_v28  ;;  %5909 = vmatmul.msk.bf16.vlgmr.msra.gmra.mxu3 %vm621_vm2, %v1026_v28 }
  0xaf   : > { %1870 = vmatpush.msra.mxu0 %v1606_v2  ;;  %1797 = vmatpush.msrb.mxu1 %v1358_v3  ;;  %v1582_v2 = vld [vmem:[%s12048_s4 + $0x720] sm:$0xff] }
  0xb0   : > { %v1658_v3 = vld [vmem:[%s12048_s4 + $0x980] sm:$0xff]  ;;  %1848 = vmatpush.msrb.mxu3 %v1514_v5 }
  0xb1   : > { %v8162_v39 = vpop.f32.mrf.mxu2  ;;  %v8164_v40 = vpop.f32.mrf.mxu3  ;;  %1871 = vmatpush.msra.mxu0 %v1602_v6  ;;  %1798 = vmatpush.msrb.mxu1 %v1354_v7  ;;  %v1578_v6 = vld [vmem:[%s12048_s4 + $0x700] sm:$0xff] }
  0xb2   : > { %v8166_v41 = vpop.f32.mrf.mxu0  ;;  %v8168_v42 = vpop.f32.mrf.mxu1  ;;  %v1654_v7 = vld [vmem:[%s12048_s4 + $0x960] sm:$0xff] }
  0xb3   : > { %1872 = vmatpush.msra.mxu0 %v1598_v14  ;;  %1899 = vmatpush.msra.mxu1 %v1670_v17  ;;  %v1718_v14 = vld [vmem:[%s12048_s4 + $0xb60] sm:$0xff] }
  0xb4   : > { %v1510_v17 = vld [vmem:[%s12048_s4 + $0x4e0] sm:$0xff] }
  0xb5   : > { %1900 = vmatpush.msra.mxu1 %v1666_v29  ;;  %1849 = vmatpush.msrb.mxu3 %v1510_v17  ;;  %v1506_v29 = vld [vmem:[%s12048_s4 + $0x4c0] sm:$0xff] }
  0xb6   : > { %v1638_v5 = vld [vmem:[%s12048_s4 + $0x8e0] sm:$0xff] }
  0xb7   : > { %1901 = vmatpush.msra.mxu1 %v1662_v59  ;;  %1850 = vmatpush.msrb.mxu3 %v1506_v29  ;;  %v1502_v59 = vld [vmem:[%s12048_s4 + $0x4a0] sm:$0xff] }
  0xb8   : > { %v1634_v29 = vld [vmem:[%s12048_s4 + $0x8c0] sm:$0xff] }
  0xb9   : > { %v8170_v43 = vpop.f32.mrf.mxu2  ;;  %v8172_v44 = vpop.f32.mrf.mxu3  ;;  %1902 = vmatpush.msra.mxu1 %v1658_v3  ;;  %1851 = vmatpush.msrb.mxu3 %v1502_v59  ;;  %v1498_v3 = vld [vmem:[%s12048_s4 + $0x480] sm:$0xff] }
  0xba   : > { %v8174_v45 = vpop.f32.mrf.mxu0  ;;  %v8176_v46 = vpop.f32.mrf.mxu1  ;;  %v1630_v59 = vld [vmem:[%s12048_s4 + $0x8a0] sm:$0xff] }
  0xbb   : > { %1903 = vmatpush.msra.mxu1 %v1654_v7  ;;  %1852 = vmatpush.msrb.mxu3 %v1498_v3  ;;  %v1550_v3 = vld [vmem:[%s12048_s4 + $0x620] sm:$0xff] }
  0xbd   : > { %5904 = vmatmul.msk.bf16.gmra.mxu0 %vm621_vm2, %v8100_v16  ;;  %5906 = vmatmul.msk.bf16.gmra.mxu1 %vm621_vm2, %v8100_v16 }
  0xbe   : > { %5908 = vmatmul.msk.bf16.gmra.mxu2 %vm621_vm2, %v8100_v16  ;;  %5910 = vmatmul.msk.bf16.gmra.mxu3 %vm621_vm2, %v8100_v16 }
  0xbf   : > { %1904 = vmatpush.msra.mxu1 %v1650_v27  ;;  %v1494_v27 = vld [vmem:[%s12048_s4 + $0x460] sm:$0xff] }
  0xc0   : > { %1853 = vmatpush.msrb.mxu3 %v1494_v27 }
  0xc1   : > { %v8186_v47 = vpop.f32.mrf.mxu2  ;;  %v8188_v48 = vpop.f32.mrf.mxu3  ;;  %1905 = vmatpush.msra.mxu1 %v1646_v31  ;;  %v1490_v31 = vld [vmem:[%s12048_s4 + $0x440] sm:$0xff] }
  0xc2   : > { %v8190_v49 = vpop.f32.mrf.mxu0  ;;  %v8192_v50 = vpop.f32.mrf.mxu1  ;;  %1854 = vmatpush.msrb.mxu3 %v1490_v31  ;;  %v1546_v31 = vld [vmem:[%s12048_s4 + $0x600] sm:$0xff] }
  0xc3   : > { %1906 = vmatpush.msra.mxu1 %v1642_v1  ;;  %v1694_v1 = vld [vmem:[%s12048_s4 + $0xaa0] sm:$0xff] }
  0xc5   : > { %1907 = vmatpush.msra.mxu1 %v1638_v5  ;;  %v1690_v5 = vld [vmem:[%s12048_s4 + $0xa80] sm:$0xff] }
  0xc7   : > { %1908 = vmatpush.msra.mxu1 %v1634_v29 }
  0xc9   : > { %v8194_v51 = vpop.f32.mrf.mxu2  ;;  %v8196_v52 = vpop.f32.mrf.mxu3  ;;  %1909 = vmatpush.msra.mxu1 %v1630_v59 }
  0xca   : > { %v8198_v53 = vpop.f32.mrf.mxu0  ;;  %v8200_v54 = vpop.f32.mrf.mxu1 }
  0xcd   : > { %5911 = vmatmul.msk.bf16.vlgmr.msrb.gmra.mxu0 %vm621_vm2, %v1026_v28  ;;  %v1438_v28 = vld [vmem:[%s12048_s4 + $0x2a0] sm:$0xff] }
  0xd1   : > { %v8203_v55 = vpop.f32.mrf.mxu2  ;;  %v8205_v56 = vpop.f32.mrf.mxu3 }
  0xd2   : > { %v8207_v57 = vpop.f32.mrf.mxu0  ;;  %v8209_v58 = vpop.f32.mrf.mxu1 }
  0xd9   : > { %v8217_v61 = vpop.f32.mrf.mxu2  ;;  %v8219_v62 = vpop.f32.mrf.mxu3 }
  0xda   : > { %v8221_v63 = vpop.f32.mrf.mxu0  ;;  %v8223_v0 = vpop.f32.mrf.mxu1 }
  0xdd   : > { %5912 = vmatmul.msk.bf16.gmra.mxu0 %vm621_vm2, %v8100_v16  ;;  %v1454_v16 = vld [vmem:[%s12048_s4 + $0x320] sm:$0xff] }
  0xde   : > { %1818 = vmatpush.msrb.mxu2 %v1454_v16  ;;  %v1594_v16 = vld [vmem:[%s12048_s4 + $0x780] sm:$0xff] }
  0xdf   : > { %1873 = vmatpush.msra.mxu0 %v1594_v16 }
  0xe0   : > { %1819 = vmatpush.msrb.mxu2 %v1450_v18 }
  0xe1   : > { %v8251_v9 = vpop.f32.mrf.mxu2  ;;  %v8253_v10 = vpop.f32.mrf.mxu3 }
  0xe2   : > { %v8255_v11 = vpop.f32.mrf.mxu0  ;;  %v8257_v12 = vpop.f32.mrf.mxu1  ;;  %1820 = vmatpush.msrb.mxu2 %v1446_v20  ;;  %v1734_v20 = vld [vmem:[%s12048_s4 + $0xbe0] sm:$0xff] }
  0xe4   : > { %1821 = vmatpush.msrb.mxu2 %v1442_v26 }
  0xe6   : > { %1822 = vmatpush.msrb.mxu2 %v1438_v28  ;;  %v1590_v28 = vld [vmem:[%s12048_s4 + $0x760] sm:$0xff] }
  0xe7   : > { %1874 = vmatpush.msra.mxu0 %v1590_v28  ;;  %v1714_v28 = vld [vmem:[%s12048_s4 + $0xb40] sm:$0xff] }
  0xe8   : > { %1823 = vmatpush.msrb.mxu2 %v1434_v30  ;;  %v1730_v30 = vld [vmem:[%s12048_s4 + $0xbc0] sm:$0xff] }
  0xe9   : > { %v8283_v21 = vpop.f32.mrf.mxu2  ;;  %v8285_v22 = vpop.f32.mrf.mxu3 }
  0xea   : > { %v8287_v23 = vpop.f32.mrf.mxu0  ;;  %v8289_v24 = vpop.f32.mrf.mxu1  ;;  %1824 = vmatpush.msrb.mxu2 %v1430_v32  ;;  %v1586_v32 = vld [vmem:[%s12048_s4 + $0x740] sm:$0xff] }
  0xeb   : > { %1875 = vmatpush.msra.mxu0 %v1586_v32  ;;  %v1710_v32 = vld [vmem:[%s12048_s4 + $0xb20] sm:$0xff]  ;;  %v902_v27 = vadd.f32 %v8287_v23, %v8156_v38 }
  0xec   : > { %1825 = vmatpush.msrb.mxu2 %v1426_v60  ;;  %v1726_v60 = vld [vmem:[%s12048_s4 + $0xba0] sm:$0xff] }
  0xed   : > { %1876 = vmatpush.msra.mxu0 %v1582_v2  ;;  %v1706_v2 = vld [vmem:[%s12048_s4 + $0xb00] sm:$0xff] }
  0xee   : > { %1826 = vmatpush.msrb.mxu2 %v1422_v4  ;;  %v1722_v4 = vld [vmem:[%s12048_s4 + $0xb80] sm:$0xff] }
  0xef   : > { %1877 = vmatpush.msra.mxu0 %v1578_v6  ;;  %v1686_v23 = vld [vmem:[%s12048_s4 + $0xa60] sm:$0xff] }
  0xf0   : > { %1827 = vmatpush.msrb.mxu2 %v1418_v8 }
  0xf1   : > { %v8315_v33 = vpop.f32.mrf.mxu2  ;;  %v8317_v34 = vpop.f32.mrf.mxu3 }
  0xf2   : > { %v8319_v35 = vpop.f32.mrf.mxu0  ;;  %v8321_v36 = vpop.f32.mrf.mxu1  ;;  %1928 = vmatpush.msra.mxu2 %v1734_v20  ;;  %v1574_v20 = vld [vmem:[%s12048_s4 + $0x6e0] sm:$0xff] }
  0xf3   : > { %1878 = vmatpush.msra.mxu0 %v1574_v20 }
  0xf4   : > { %1929 = vmatpush.msra.mxu2 %v1730_v30  ;;  %v1570_v30 = vld [vmem:[%s12048_s4 + $0x6c0] sm:$0xff] }
  0xf5   : > { %1879 = vmatpush.msra.mxu0 %v1570_v30  ;;  %v1698_v30 = vld [vmem:[%s12048_s4 + $0xac0] sm:$0xff] }
  0xf6   : > { %1930 = vmatpush.msra.mxu2 %v1726_v60  ;;  %v1566_v60 = vld [vmem:[%s12048_s4 + $0x6a0] sm:$0xff] }
  0xf7   : > { %1880 = vmatpush.msra.mxu0 %v1566_v60  ;;  %v8515_v60 = vld [vmem:[%s12046_s2] sm:$0x7f] }
  0xf8   : > { %1931 = vmatpush.msra.mxu2 %v1722_v4  ;;  %v1562_v4 = vld [vmem:[%s12048_s4 + $0x680] sm:$0xff]  ;;  %v8540_v29 = vperm.slane %v8515_v60, 1 }
  0xf9   : > { %v8368_v18 = vpop.f32.mrf.mxu2  ;;  %v8370_v19 = vpop.f32.mrf.mxu3  ;;  %1881 = vmatpush.msra.mxu0 %v1562_v4  ;;  %v1626_v4 = vld [vmem:[%s12048_s4 + $0x880] sm:$0xff] }
  0xfa   : > { %v8375_v25 = vpop.f32.mrf.mxu0  ;;  %v8377_v26 = vpop.f32.mrf.mxu1  ;;  %1932 = vmatpush.msra.mxu2 %v1718_v14  ;;  %v1702_v14 = vld [vmem:[%s12048_s4 + $0xae0] sm:$0xff]  ;;  %1910 = vmatpush.msra.mxu1 %v1626_v4 }
  0xfb   : > { %v1682_v4 = vld [vmem:[%s12048_s4 + $0xa40] sm:$0xff] }
  0xfc   : > { %1933 = vmatpush.msra.mxu2 %v1714_v28  ;;  %v1558_v28 = vld [vmem:[%s12048_s4 + $0x660] sm:$0xff] }
  0xfd   : > { %1882 = vmatpush.msra.mxu0 %v1558_v28  ;;  %v8537_v28 = vperm.slane %v8515_v60, 0 }
  0xfe   : > { %1934 = vmatpush.msra.mxu2 %v1710_v32  ;;  %v1554_v32 = vld [vmem:[%s12048_s4 + $0x640] sm:$0xff] }
  0xff   : > { %1883 = vmatpush.msra.mxu0 %v1554_v32 }
 0x100   : > { %1935 = vmatpush.msra.mxu2 %v1706_v2  ;;  %v1486_v2 = vld [vmem:[%s12048_s4 + $0x420] sm:$0xff] }
 0x101   : > { %v8424_v8 = vpop.f32.mrf.mxu2  ;;  %v8426_v13 = vpop.f32.mrf.mxu3  ;;  %1855 = vmatpush.msrb.mxu3 %v1486_v2  ;;  %1884 = vmatpush.msra.mxu0 %v1550_v3  ;;  %v1618_v3 = vld [vmem:[%s12048_s4 + $0x840] sm:$0xff] }
 0x102   : > { %v8431_v15 = vpop.f32.mrf.mxu0  ;;  %v8433_v16 = vpop.f32.mrf.mxu1  ;;  %1936 = vmatpush.msra.mxu2 %v1702_v14  ;;  %v883_v14 = vadd.f32 %v8205_v56, %v8154_v37  ;;  %v1622_v37 = vld [vmem:[%s12048_s4 + $0x860] sm:$0xff] }
 0x103   : > { %1911 = vmatpush.msra.mxu1 %v1622_v37  ;;  %1885 = vmatpush.msra.mxu0 %v1546_v31  ;;  %v1678_v31 = vld [vmem:[%s12048_s4 + $0xa20] sm:$0xff]  ;;  %v1411_v37 = vld [vmem:[%s12048_s4 + $0x1c8] sm:$0xff] }
 0x104   : > { %1937 = vmatpush.msra.mxu2 %v1698_v30  ;;  %v1482_v30 = vld [vmem:[%s12048_s4 + $0x400] sm:$0xff] }
 0x105   : > { %1856 = vmatpush.msrb.mxu3 %v1482_v30  ;;  %1912 = vmatpush.msra.mxu1 %v1618_v3  ;;  %v1614_v30 = vld [vmem:[%s12048_s4 + $0x820] sm:$0xff]  ;;  %v885_v3 = vadd.f32 %v8219_v62, %v8166_v41 }
 0x106   : > { %1938 = vmatpush.msra.mxu2 %v1694_v1 }
 0x107   : > { %1913 = vmatpush.msra.mxu1 %v1614_v30 }
 0x108   : > { %1939 = vmatpush.msra.mxu2 %v1690_v5  ;;  %v1415_v5 = vld [vmem:[%s12048_s4 + $0x1e8] sm:$0xff] }
 0x109   : > { %v8480_v6 = vpop.f32.mrf.mxu2  ;;  %v8482_v7 = vpop.f32.mrf.mxu3  ;;  %1986 = vmatpush.msrb.mxu0 %v1415_v5  ;;  %v1403_v5 = vld [vmem:[%s12048_s4 + $0x188] sm:$0xff] }
 0x10a   : > { %v8487_v17 = vpop.f32.mrf.mxu0  ;;  %v8489_v20 = vpop.f32.mrf.mxu1  ;;  %1940 = vmatpush.msra.mxu2 %v1686_v23  ;;  %v1610_v23 = vld [vmem:[%s12048_s4 + $0x800] sm:$0xff] }
 0x10b   : > { %1987 = vmatpush.msrb.mxu0 %v1411_v37  ;;  %1914 = vmatpush.msra.mxu1 %v1610_v23  ;;  %v1399_v37 = vld [vmem:[%s12048_s4 + $0x168] sm:$0xff] }
 0x10c   : > { %1941 = vmatpush.msra.mxu2 %v1682_v4  ;;  %v904_v4 = vadd.f32 %v8319_v35, %v8168_v42  ;;  %v1475_v23 = vld [vmem:[%s12048_s4 + $0x3c8] sm:$0xff] }
 0x10e   : > { %1942 = vmatpush.msra.mxu2 %v1678_v31 }
 0x111   : > { %v1128_v38 = vpop.f32.mrf.mxu2  ;;  %v1147_v56 = vpop.f32.mrf.mxu3 }
 0x112   : > { %v1252_v32 = vadd.f32 %v1128_v38, %v883_v14  ;;  %v1253_v59 = vadd.f32 %v1147_v56, %v902_v27  ;;  %v8554_v1 = vpop.f32.mrf.mxu0  ;;  %v8556_v2 = vpop.f32.mrf.mxu1 }
 0x114   : > { %v1296_v14 = vadd.f32 %v8537_v28, %v1252_v32  ;;  %v1297_v27 = vadd.f32 %v8540_v29, %v1253_v59  ;;  %v1674_v32 = vld [vmem:[%s12048_s4 + $0xa00] sm:$0xff]  ;;  %v1407_v59 = vld [vmem:[%s12048_s4 + $0x1a8] sm:$0xff] }
 0x115   : > { %1988 = vmatpush.msrb.mxu0 %v1407_v59  ;;  %1943 = vmatpush.msra.mxu2 %v1674_v32  ;;  %v1539_v32 = vld [vmem:[%s12048_s4 + $0x5c8] sm:$0xff] }
 0x116   : > { %v8578_v38 = vmax.f32 %v1296_v14, 0.0  ;;  %v8580_v56 = vmax.f32 %v1297_v27, 0.0  ;;  %v1479_v14 = vld [vmem:[%s12048_s4 + $0x3e8] sm:$0xff] }
 0x117   : > { %v1543_v27 = vld [vmem:[%s12048_s4 + $0x5e8] sm:$0xff]  ;;  %1989 = vmatpush.msrb.mxu0 %v1403_v5 }
 0x118   : > { %1799 = vmatmul.f32.vlgmr.msrb.gmra.mxu1 %v8578_v38  ;;  %1828 = vmatmul.f32.vlgmr.msrb.gmra.mxu2 %v8580_v56  ;;  %v1471_v5 = vld [vmem:[%s12048_s4 + $0x3a8] sm:$0xff] }
 0x119   : > { %v1130_v41 = vpop.f32.mrf.mxu2  ;;  %v1149_v62 = vpop.f32.mrf.mxu3  ;;  %2015 = vmatpush.msrb.mxu1 %v1479_v14  ;;  %2044 = vmatpush.msrb.mxu2 %v1543_v27  ;;  %v1535_v14 = vld [vmem:[%s12048_s4 + $0x5a8] sm:$0xff] }
 0x11a   : > { %v1259_v42 = vadd.f32 %v1130_v41, %v885_v3  ;;  %v1260_v35 = vadd.f32 %v1149_v62, %v904_v4  ;;  %v8606_v30 = vpop.f32.mrf.mxu0  ;;  %v8608_v31 = vpop.f32.mrf.mxu1  ;;  %1990 = vmatpush.msrb.mxu0 %v1399_v37  ;;  %v1395_v4 = vld [vmem:[%s12048_s4 + $0x148] sm:$0xff]  ;;  %v888_v37 = vadd.f32 %v8253_v10, %v8174_v45 }
 0x11b   : > { %2016 = vmatpush.msrb.mxu1 %v1475_v23  ;;  %2045 = vmatpush.msrb.mxu2 %v1539_v32  ;;  %v1391_v62 = vld [vmem:[%s12048_s4 + $0x128] sm:$0xff]  ;;  %v907_v23 = vadd.f32 %v8375_v25, %v8176_v46 }
 0x11c   : > { %v1303_v59 = vadd.f32 %v8537_v28, %v1259_v42  ;;  %v1304_v3 = vadd.f32 %v8540_v29, %v1260_v35  ;;  %1991 = vmatpush.msrb.mxu0 %v1395_v4  ;;  %v1467_v42 = vld [vmem:[%s12048_s4 + $0x388] sm:$0xff] }
 0x11d   : > { %2017 = vmatpush.msrb.mxu1 %v1471_v5  ;;  %2046 = vmatpush.msrb.mxu2 %v1535_v14  ;;  %v1531_v35 = vld [vmem:[%s12048_s4 + $0x588] sm:$0xff]  ;;  %v1766_v14 = vld [vmem:[%s12048_s4 + $0xce0] sm:$0xff] }
 0x11e   : > { %v8630_v27 = vmax.f32 %v1303_v59, 0.0  ;;  %v8632_v41 = vmax.f32 %v1304_v3, 0.0  ;;  %1992 = vmatpush.msrb.mxu0 %v1391_v62  ;;  %v1387_v32 = vld [vmem:[%s12048_s4 + $0x108] sm:$0xff]  ;;  %1965 = vmatpush.msra.mxu3 %v1766_v14 }
 0x11f   : > { %v1463_v59 = vld [vmem:[%s12048_s4 + $0x368] sm:$0xff]  ;;  %2018 = vmatpush.msrb.mxu1 %v1467_v42  ;;  %2047 = vmatpush.msrb.mxu2 %v1531_v35 }
 0x120   : > { %1802 = vmatmul.f32.gmra.mxu1 %v8630_v27  ;;  %1831 = vmatmul.f32.gmra.mxu2 %v8632_v41  ;;  %v1527_v3 = vld [vmem:[%s12048_s4 + $0x568] sm:$0xff] }
 0x121   : > { %v1133_v45 = vpop.f32.mrf.mxu2  ;;  %v1152_v10 = vpop.f32.mrf.mxu3  ;;  %1993 = vmatpush.msrb.mxu0 %v1387_v32  ;;  %v1383_v62 = vld [vmem:[%s12048_s4 + $0xe8] sm:$0xff]  ;;  %2019 = vmatpush.msrb.mxu1 %v1463_v59  ;;  %v1762_v32 = vld [vmem:[%s12048_s4 + $0xcc0] sm:$0xff] }
 0x122   : > { %v1266_v46 = vadd.f32 %v1133_v45, %v888_v37  ;;  %v1267_v25 = vadd.f32 %v1152_v10, %v907_v23  ;;  %v8658_v4 = vpop.f32.mrf.mxu0  ;;  %v8660_v5 = vpop.f32.mrf.mxu1  ;;  %v1459_v42 = vld [vmem:[%s12048_s4 + $0x348] sm:$0xff]  ;;  %2048 = vmatpush.msrb.mxu2 %v1527_v3  ;;  %1966 = vmatpush.msra.mxu3 %v1762_v32 }
 0x123   : > { %12083 = vst [vmem:[#allocation12_spill] sm:$0xff] %v8660_v5  ;;  %v1523_v35 = vld [vmem:[%s12048_s4 + $0x548] sm:$0xff]  ;;  %1994 = vmatpush.msrb.mxu0 %v1383_v62  ;;  %2020 = vmatpush.msrb.mxu1 %v1459_v42 }
 0x124   : > { %v1310_v37 = vadd.f32 %v8537_v28, %v1266_v46  ;;  %v1311_v23 = vadd.f32 %v8540_v29, %v1267_v25  ;;  %v1379_v45 = vld [vmem:[%s12048_s4 + $0xc8] sm:$0xff]  ;;  %2049 = vmatpush.msrb.mxu2 %v1523_v35  ;;  %v1758_v25 = vld [vmem:[%s12048_s4 + $0xca0] sm:$0xff]  ;;  %v890_v35 = vadd.f32 %v8285_v22, %v8190_v49  ;;  %v940_v49 = vadd.f32 %v8315_v33, %v8164_v40 }
 0x125   : > { %v1455_v59 = vld [vmem:[%s12048_s4 + $0x328] sm:$0xff]  ;;  %1995 = vmatpush.msrb.mxu0 %v1379_v45  ;;  %v921_v45 = vadd.f32 %v8289_v24, %v8162_v39  ;;  %1967 = vmatpush.msra.mxu3 %v1758_v25 }
 0x126   : > { %v1519_v3 = vld [vmem:[%s12048_s4 + $0x528] sm:$0xff]  ;;  %v8688_v10 = vmax.f32 %v1310_v37, 0.0  ;;  %v8690_v46 = vmax.f32 %v1311_v23, 0.0  ;;  %2021 = vmatpush.msrb.mxu1 %v1455_v59  ;;  %v909_v37 = vadd.f32 %v8431_v15, %v8192_v50  ;;  %v1754_v23 = vld [vmem:[%s12048_s4 + $0xc80] sm:$0xff]  ;;  %v8721_v15 = vperm.slane %v8515_v60, 2 }
 0x127   : > { %v1375_v14 = vld [vmem:[%s12048_s4 + $0xa8] sm:$0xff]  ;;  %2050 = vmatpush.msrb.mxu2 %v1519_v3  ;;  %v8724_v59 = vperm.slane %v8515_v60, 3  ;;  %1968 = vmatpush.msra.mxu3 %v1754_v23 }
 0x128   : > { %12084 = vst [vmem:[#allocation13_spill] sm:$0xff] %v8688_v10  ;;  %v1451_v62 = vld [vmem:[%s12048_s4 + $0x308] sm:$0xff]  ;;  %1805 = vmatmul.f32.gmra.mxu1 %v8688_v10  ;;  %1834 = vmatmul.f32.gmra.mxu2 %v8690_v46  ;;  %v1750_v10 = vld [vmem:[%s12048_s4 + $0xc60] sm:$0xff] }
 0x129   : > { %12085 = vst [vmem:[#allocation14_spill] sm:$0xff] %v8690_v46  ;;  %v1515_v42 = vld [vmem:[%s12048_s4 + $0x508] sm:$0xff]  ;;  %v1135_v22 = vpop.f32.mrf.mxu2  ;;  %v1154_v50 = vpop.f32.mrf.mxu3  ;;  %1996 = vmatpush.msrb.mxu0 %v1375_v14  ;;  %2022 = vmatpush.msrb.mxu1 %v1451_v62 }
 0x12a   : > { %v1371_v32 = vld [vmem:[%s12048_s4 + $0x88] sm:$0xff]  ;;  %v1273_v24 = vadd.f32 %v1135_v22, %v890_v35  ;;  %v1274_v40 = vadd.f32 %v1154_v50, %v909_v37  ;;  %v1166_v33 = vpop.f32.mrf.mxu0  ;;  %v1185_v46 = vpop.f32.mrf.mxu1  ;;  %2051 = vmatpush.msrb.mxu2 %v1515_v42  ;;  %1969 = vmatpush.msra.mxu3 %v1750_v10  ;;  %v959_v10 = vadd.f32 %v8317_v34, %v8198_v53 }
 0x12b   : > { %v1447_v3 = vld [vmem:[%s12048_s4 + $0x2e8] sm:$0xff]  ;;  %v1254_v14 = vadd.f32 %v1166_v33, %v921_v45  ;;  %v1255_v5 = vadd.f32 %v1185_v46, %v940_v49  ;;  %1997 = vmatpush.msrb.mxu0 %v1371_v32  ;;  %v1746_v46 = vld [vmem:[%s12048_s4 + $0xc40] sm:$0xff]  ;;  %v942_v34 = vadd.f32 %v8368_v18, %v8172_v44 }
 0x12c   : > { %v1511_v39 = vld [vmem:[%s12048_s4 + $0x4e8] sm:$0xff]  ;;  %v1317_v42 = vadd.f32 %v8537_v28, %v1273_v24  ;;  %v1318_v37 = vadd.f32 %v8540_v29, %v1274_v40  ;;  %2023 = vmatpush.msrb.mxu1 %v1447_v3  ;;  %1970 = vmatpush.msra.mxu3 %v1746_v46  ;;  %v978_v3 = vadd.f32 %v8487_v17, %v8200_v54  ;;  %v8778_v24 = vperm.slane %v8515_v60, 5  ;;  %v1742_v40 = vld [vmem:[%s12048_s4 + $0xc20] sm:$0xff] }
 0x12d   : > { %v1367_v25 = vld [vmem:[%s12048_s4 + $0x68] sm:$0xff]  ;;  %2052 = vmatpush.msrb.mxu2 %v1511_v39  ;;  %v1298_v32 = vadd.f32 %v8721_v15, %v1254_v14  ;;  %v1299_v45 = vadd.f32 %v8724_v59, %v1255_v5  ;;  %v8775_v39 = vperm.slane %v8515_v60, 4  ;;  %v923_v54 = vadd.f32 %v8321_v36, %v8170_v43  ;;  %v1738_v44 = vld [vmem:[%s12048_s4 + $0xc00] sm:$0xff] }
 0x12e   : > { %v1443_v35 = vld [vmem:[%s12048_s4 + $0x2c8] sm:$0xff]  ;;  %1998 = vmatpush.msrb.mxu0 %v1367_v25  ;;  %v8754_v49 = vmax.f32 %v1317_v42, 0.0  ;;  %v8756_v28 = vmax.f32 %v1318_v37, 0.0  ;;  %1971 = vmatpush.msra.mxu3 %v1742_v40 }
 0x12f   : > { %v1507_v62 = vld [vmem:[%s12048_s4 + $0x4c8] sm:$0xff]  ;;  %2024 = vmatpush.msrb.mxu1 %v1443_v35  ;;  %v8758_v29 = vmax.f32 %v1298_v32, 0.0  ;;  %v8760_v22 = vmax.f32 %v1299_v45, 0.0 }
 0x130   : > { %v1363_v23 = vld [vmem:[%s12048_s4 + $0x48] sm:$0xff]  ;;  %2053 = vmatpush.msrb.mxu2 %v1507_v62  ;;  %1808 = vmatmul.f32.gmra.mxu1 %v8754_v49 }
 0x131   : > { %1999 = vmatpush.msrb.mxu0 %v1363_v23  ;;  %v1439_v50 = vld [vmem:[%s12048_s4 + $0x2a8] sm:$0xff]  ;;  %1837 = vmatmul.f32.gmra.mxu2 %v8756_v28  ;;  %v1204_v17 = vpop.f32.mrf.mxu2  ;;  %v1223_v33 = vpop.f32.mrf.mxu3 }
 0x132   : > { %v1503_v5 = vld [vmem:[%s12048_s4 + $0x4a8] sm:$0xff]  ;;  %1857 = vmatmul.f32.vlgmr.msrb.gmra.mxu3 %v8758_v29  ;;  %1886 = vmatmul.f32.vlgmr.msra.gmra.mxu0 %v8760_v22  ;;  %v1256_v35 = vadd.f32 %v1204_v17, %v959_v10  ;;  %v1257_v62 = vadd.f32 %v1223_v33, %v978_v3  ;;  %v1168_v43 = vpop.f32.mrf.mxu0  ;;  %v1187_v36 = vpop.f32.mrf.mxu1 }
 0x133   : > { %v1359_v53 = vld [vmem:[%s12048_s4 + $0x28] sm:$0xff]  ;;  %2025 = vmatpush.msrb.mxu1 %v1439_v50  ;;  %2054 = vmatpush.msrb.mxu2 %v1503_v5  ;;  %v1261_v42 = vadd.f32 %v1168_v43, %v923_v54  ;;  %v1262_v37 = vadd.f32 %v1187_v36, %v942_v34  ;;  %v926_v43 = vadd.f32 %v8377_v26, %v8186_v47 }
 0x134   : > { %v1435_v25 = vld [vmem:[%s12048_s4 + $0x288] sm:$0xff]  ;;  %2000 = vmatpush.msrb.mxu0 %v1359_v53  ;;  %v1300_v32 = vadd.f32 %v8775_v39, %v1256_v35  ;;  %v1301_v45 = vadd.f32 %v8778_v24, %v1257_v62  ;;  %1972 = vmatpush.msra.mxu3 %v1738_v44 }
 0x135   : > { %v1499_v14 = vld [vmem:[%s12048_s4 + $0x488] sm:$0xff]  ;;  %2026 = vmatpush.msrb.mxu1 %v1435_v25  ;;  %v1305_v10 = vadd.f32 %v8721_v15, %v1261_v42  ;;  %v1306_v3 = vadd.f32 %v8724_v59, %v1262_v37  ;;  %v961_v25 = vadd.f32 %v8370_v19, %v8207_v57  ;;  %v945_v57 = vadd.f32 %v8424_v8, %v8188_v48 }
 0x136   : > { %v1355_v18 = vld [vmem:[%s12048_s4 + $0x8] sm:$0xff]  ;;  %2055 = vmatpush.msrb.mxu2 %v1499_v14  ;;  %v8820_v40 = vmax.f32 %v1300_v32, 0.0  ;;  %v8822_v53 = vmax.f32 %v1301_v45, 0.0  ;;  %v980_v14 = vadd.f32 %v8554_v1, %v8209_v58 }
 0x137   : > { %v1431_v46 = vld [vmem:[%s12048_s4 + $0x268] sm:$0xff]  ;;  %2001 = vmatpush.msrb.mxu0 %v1355_v18  ;;  %v8824_v54 = vmax.f32 %v1305_v10, 0.0  ;;  %v8826_v34 = vmax.f32 %v1306_v3, 0.0 }
 0x138   : > { %v1495_v23 = vld [vmem:[%s12048_s4 + $0x468] sm:$0xff]  ;;  %2027 = vmatpush.msrb.mxu1 %v1431_v46 }
 0x139   : > { %v1607_v50 = vld [vmem:[%s12048_s4 + $0x7e8] sm:$0xff]  ;;  %2056 = vmatpush.msrb.mxu2 %v1495_v23  ;;  %1915 = vmatmul.f32.vlgmr.msra.gmra.mxu1 %v8820_v40  ;;  %v1206_v19 = vpop.f32.mrf.mxu2  ;;  %v1225_v58 = vpop.f32.mrf.mxu3 }
 0x13a   : > { %v1671_v5 = vld [vmem:[%s12048_s4 + $0x9e8] sm:$0xff]  ;;  %2073 = vmatpush.msrb.mxu3 %v1607_v50  ;;  %1944 = vmatmul.f32.vlgmr.msra.gmra.mxu2 %v8822_v53  ;;  %v1263_v44 = vadd.f32 %v1206_v19, %v961_v25  ;;  %v1264_v18 = vadd.f32 %v1225_v58, %v980_v14  ;;  %v1171_v47 = vpop.f32.mrf.mxu0  ;;  %v1190_v26 = vpop.f32.mrf.mxu1  ;;  %v928_v58 = vadd.f32 %v8433_v16, %v8194_v51 }
 0x13b   : > { %v1427_v17 = vld [vmem:[%s12048_s4 + $0x248] sm:$0xff]  ;;  %2102 = vmatpush.msra.mxu0 %v1671_v5  ;;  %1860 = vmatmul.f32.gmra.mxu3 %v8824_v54  ;;  %v1268_v42 = vadd.f32 %v1171_v47, %v926_v43  ;;  %v1269_v37 = vadd.f32 %v1190_v26, %v945_v57  ;;  %v964_v43 = vadd.f32 %v8426_v13, %v8221_v63 }
 0x13c   : > { %v1491_v33 = vld [vmem:[%s12048_s4 + $0x448] sm:$0xff]  ;;  %1889 = vmatmul.f32.gmra.mxu0 %v8826_v34  ;;  %2028 = vmatpush.msrb.mxu1 %v1427_v17  ;;  %v1307_v32 = vadd.f32 %v8775_v39, %v1263_v44  ;;  %v1308_v45 = vadd.f32 %v8778_v24, %v1264_v18  ;;  %v983_v57 = vadd.f32 %v8606_v30, %v8223_v0 }
 0x13d   : > { %v1603_v35 = vld [vmem:[%s12048_s4 + $0x7c8] sm:$0xff]  ;;  %2057 = vmatpush.msrb.mxu2 %v1491_v33  ;;  %v1312_v10 = vadd.f32 %v8721_v15, %v1268_v42  ;;  %v1313_v3 = vadd.f32 %v8724_v59, %v1269_v37 }
 0x13e   : > { %v1667_v62 = vld [vmem:[%s12048_s4 + $0x9c8] sm:$0xff]  ;;  %2074 = vmatpush.msrb.mxu3 %v1603_v35  ;;  %v8880_v17 = vmax.f32 %v1307_v32, 0.0  ;;  %v8882_v33 = vmax.f32 %v1308_v45, 0.0 }
 0x13f   : > { %v1423_v1 = vld [vmem:[%s12048_s4 + $0x228] sm:$0xff]  ;;  %2103 = vmatpush.msra.mxu0 %v1667_v62  ;;  %v8884_v25 = vmax.f32 %v1312_v10, 0.0  ;;  %v8886_v14 = vmax.f32 %v1313_v3, 0.0  ;;  %v985_v10 = vadd.f32 %v8658_v4, %v8257_v12 }
 0x140   : > { %v1487_v36 = vld [vmem:[%s12048_s4 + $0x428] sm:$0xff]  ;;  %2029 = vmatpush.msrb.mxu1 %v1423_v1  ;;  %v947_v1 = vadd.f32 %v8480_v6, %v8196_v52 }
 0x141   : > { %v1599_v48 = vld [vmem:[%s12048_s4 + $0x7a8] sm:$0xff]  ;;  %2058 = vmatpush.msrb.mxu2 %v1487_v36  ;;  %1918 = vmatmul.f32.gmra.mxu1 %v8880_v17  ;;  %v1209_v36 = vpop.f32.mrf.mxu2  ;;  %v1228_v44 = vpop.f32.mrf.mxu3 }
 0x142   : > { %v1663_v8 = vld [vmem:[%s12048_s4 + $0x9a8] sm:$0xff]  ;;  %2075 = vmatpush.msrb.mxu3 %v1599_v48  ;;  %1947 = vmatmul.f32.gmra.mxu2 %v8882_v33  ;;  %v1270_v13 = vadd.f32 %v1209_v36, %v964_v43  ;;  %v1271_v30 = vadd.f32 %v1228_v44, %v983_v57  ;;  %v1173_v51 = vpop.f32.mrf.mxu0  ;;  %v1192_v16 = vpop.f32.mrf.mxu1 }
 0x143   : > { %v1419_v46 = vld [vmem:[%s12048_s4 + $0x208] sm:$0xff]  ;;  %2104 = vmatpush.msra.mxu0 %v1663_v8  ;;  %1863 = vmatmul.f32.gmra.mxu3 %v8884_v25  ;;  %v1275_v6 = vadd.f32 %v1173_v51, %v928_v58  ;;  %v1276_v18 = vadd.f32 %v1192_v16, %v947_v1 }
 0x144   : > { %v1483_v23 = vld [vmem:[%s12048_s4 + $0x408] sm:$0xff]  ;;  %2030 = vmatpush.msrb.mxu1 %v1419_v46  ;;  %1892 = vmatmul.f32.gmra.mxu0 %v8886_v14  ;;  %v1314_v48 = vadd.f32 %v8775_v39, %v1270_v13  ;;  %v1315_v8 = vadd.f32 %v8778_v24, %v1271_v30 }
 0x145   : > { %v1595_v50 = vld [vmem:[%s12048_s4 + $0x788] sm:$0xff]  ;;  %2059 = vmatpush.msrb.mxu2 %v1483_v23  ;;  %v1319_v37 = vadd.f32 %v8721_v15, %v1275_v6  ;;  %v1320_v46 = vadd.f32 %v8724_v59, %v1276_v18  ;;  %v966_v59 = vadd.f32 %v8482_v7, %v8255_v11  ;;  %v8959_v11 = vperm.slane %v8515_v60, 6 }
 0x146   : > { %v1659_v5 = vld [vmem:[%s12048_s4 + $0x988] sm:$0xff]  ;;  %2076 = vmatpush.msrb.mxu3 %v1595_v50  ;;  %v8931_v23 = vmax.f32 %v1314_v48, 0.0  ;;  %v8933_v32 = vmax.f32 %v1315_v8, 0.0 }
 0x147   : > { %2105 = vmatpush.msra.mxu0 %v1659_v5  ;;  %v1735_v35 = vld [vmem:[%s12048_s4 + $0xbe8] sm:$0xff]  ;;  %v8935_v45 = vmax.f32 %v1319_v37, 0.0  ;;  %v8937_v50 = vmax.f32 %v1320_v46, 0.0 }
 0x148   : > { %v1591_v62 = vld [vmem:[%s12048_s4 + $0x768] sm:$0xff]  ;;  %2131 = vmatpush.msra.mxu1 %v1735_v35  ;;  %v997_v35 = vadd.f32 %v8489_v20, %v8203_v55 }
 0x149   : > { %v1655_v19 = vld [vmem:[%s12048_s4 + $0x968] sm:$0xff]  ;;  %2077 = vmatpush.msrb.mxu3 %v1591_v62  ;;  %1921 = vmatmul.f32.gmra.mxu1 %v8931_v23  ;;  %v1211_v62 = vpop.f32.mrf.mxu2  ;;  %v1230_v43 = vpop.f32.mrf.mxu3 }
 0x14a   : > { %v1731_v63 = vld [vmem:[%s12048_s4 + $0xbc8] sm:$0xff]  ;;  %2106 = vmatpush.msra.mxu0 %v1655_v19  ;;  %1950 = vmatmul.f32.gmra.mxu2 %v8933_v32  ;;  %v1277_v20 = vadd.f32 %v1211_v62, %v966_v59  ;;  %v1278_v4 = vadd.f32 %v1230_v43, %v985_v10  ;;  %v1242_v57 = vpop.f32.mrf.mxu0 }
 0x14b   : > { %v1587_v0 = vld [vmem:[%s12048_s4 + $0x748] sm:$0xff]  ;;  %2132 = vmatpush.msra.mxu1 %v1731_v63  ;;  %1866 = vmatmul.f32.gmra.mxu3 %v8935_v45  ;;  %v1258_v58 = vadd.f32 %v1242_v57, %v997_v35 }
 0x14c   : > { %v1651_v52 = vld [vmem:[%s12048_s4 + $0x948] sm:$0xff]  ;;  %2078 = vmatpush.msrb.mxu3 %v1587_v0  ;;  %1895 = vmatmul.f32.gmra.mxu0 %v8937_v50  ;;  %v1321_v44 = vadd.f32 %v8775_v39, %v1277_v20  ;;  %v1322_v63 = vadd.f32 %v8778_v24, %v1278_v4 }
 0x14d   : > { %v1727_v47 = vld [vmem:[%s12048_s4 + $0xba8] sm:$0xff]  ;;  %2107 = vmatpush.msra.mxu0 %v1651_v52  ;;  %v1302_v30 = vadd.f32 %v8959_v11, %v1258_v58  ;;  %v1416_v58 = vld [vmem:[%s12048_s4 + $0x1f0] sm:$0xff] }
 0x14e   : > { %v1583_v26 = vld [vmem:[%s12048_s4 + $0x728] sm:$0xff]  ;;  %2133 = vmatpush.msra.mxu1 %v1727_v47  ;;  %v8991_v51 = vmax.f32 %v1321_v44, 0.0  ;;  %v8993_v16 = vmax.f32 %v1322_v63, 0.0  ;;  %v999_v47 = vadd.f32 %v8556_v2, %v8217_v61  ;;  %v1480_v63 = vld [vmem:[%s12048_s4 + $0x3f0] sm:$0xff] }
 0x14f   : > { %v1647_v42 = vld [vmem:[%s12048_s4 + $0x928] sm:$0xff]  ;;  %2079 = vmatpush.msrb.mxu3 %v1583_v26  ;;  %v8995_v39 = vmax.f32 %v1302_v30, 0.0 }
 0x150   : > { %2108 = vmatpush.msra.mxu0 %v1647_v42  ;;  %v1723_v5 = vld [vmem:[%s12048_s4 + $0xb88] sm:$0xff] }
 0x151   : > { %v1579_v15 = vld [vmem:[%s12048_s4 + $0x708] sm:$0xff]  ;;  %2134 = vmatpush.msra.mxu1 %v1723_v5 }
 0x152   : > { %v1643_v3 = vld [vmem:[%s12048_s4 + $0x908] sm:$0xff]  ;;  %2080 = vmatpush.msrb.mxu3 %v1579_v15  ;;  %1924 = vmatmul.f32.gmra.mxu1 %v8991_v51  ;;  %v1244_v8 = vpop.f32.mrf.mxu0 }
 0x153   : > { %v1719_v12 = vld [vmem:[%s12048_s4 + $0xb68] sm:$0xff]  ;;  %2109 = vmatpush.msra.mxu0 %v1643_v3  ;;  %1953 = vmatmul.f32.gmra.mxu2 %v8993_v16  ;;  %v1265_v42 = vadd.f32 %v1244_v8, %v999_v47 }
 0x154   : > { %v1575_v7 = vld [vmem:[%s12048_s4 + $0x6e8] sm:$0xff]  ;;  %2135 = vmatpush.msra.mxu1 %v1719_v12  ;;  %5913 = vmatmul.msk.f32.vlgmr.msra.gmra.mxu3 %vm1770_vm4, %v8995_v39  ;;  %v1002_v12 = vadd.f32 %v8608_v31, %v8251_v9 }
 0x155   : > { %v1767_v55 = vld [vmem:[%s12048_s4 + $0xce8] sm:$0xff]  ;;  %2081 = vmatpush.msrb.mxu3 %v1575_v7  ;;  %2002 = vmatmul.f32.vlgmr.msrb.gmra.mxu0 %v8578_v38  ;;  %v1309_v59 = vadd.f32 %v8959_v11, %v1265_v42  ;;  %v1600_v42 = vld [vmem:[%s12048_s4 + $0x7b0] sm:$0xff] }
 0x156   : > { %v1639_v60 = vld [vmem:[%s12048_s4 + $0x8e8] sm:$0xff]  ;;  %2168 = vmatpush.msra.mxu2 %v1767_v55 }
 0x157   : > { %v1763_v19 = vld [vmem:[%s12048_s4 + $0xcc8] sm:$0xff]  ;;  %2110 = vmatpush.msra.mxu0 %v1639_v60  ;;  %v9041_v10 = vmax.f32 %v1309_v59, 0.0  ;;  %v12088_v59 = vld [vmem:[#allocation14_spill] sm:$0xff] }
 0x158   : > { %v1715_v1 = vld [vmem:[%s12048_s4 + $0xb48] sm:$0xff]  ;;  %2169 = vmatpush.msra.mxu2 %v1763_v19 }
 0x159   : > { %v1571_v36 = vld [vmem:[%s12048_s4 + $0x6c8] sm:$0xff]  ;;  %2136 = vmatpush.msra.mxu1 %v1715_v1 }
 0x15a   : > { %v1635_v0 = vld [vmem:[%s12048_s4 + $0x8c8] sm:$0xff]  ;;  %2082 = vmatpush.msrb.mxu3 %v1571_v36  ;;  %2031 = vmatmul.f32.vlgmr.msrb.gmra.mxu1 %v8580_v56  ;;  %v1247_v20 = vpop.f32.mrf.mxu0 }
 0x15b   : > { %v1759_v13 = vld [vmem:[%s12048_s4 + $0xca8] sm:$0xff]  ;;  %2111 = vmatpush.msra.mxu0 %v1635_v0  ;;  %2060 = vmatmul.f32.vlgmr.msrb.gmra.mxu2 %v8758_v29  ;;  %v1272_v4 = vadd.f32 %v1247_v20, %v1002_v12  ;;  %v1412_v0 = vld [vmem:[%s12048_s4 + $0x1d0] sm:$0xff] }
 0x15c   : > { %v1711_v24 = vld [vmem:[%s12048_s4 + $0xb28] sm:$0xff]  ;;  %2170 = vmatpush.msra.mxu2 %v1759_v13  ;;  %5914 = vmatmul.msk.f32.gmra.mxu3 %vm1770_vm4, %v9041_v10  ;;  %v1608_v13 = vld [vmem:[%s12048_s4 + $0x7f0] sm:$0xff] }
 0x15d   : > { %v1567_v52 = vld [vmem:[%s12048_s4 + $0x6a8] sm:$0xff]  ;;  %2137 = vmatpush.msra.mxu1 %v1711_v24  ;;  %2005 = vmatmul.f32.gmra.mxu0 %v8630_v27  ;;  %v1316_v1 = vadd.f32 %v8959_v11, %v1272_v4  ;;  %v1396_v12 = vld [vmem:[%s12048_s4 + $0x150] sm:$0xff] }
 0x15e   : > { %v1631_v6 = vld [vmem:[%s12048_s4 + $0x8a8] sm:$0xff]  ;;  %2083 = vmatpush.msrb.mxu3 %v1567_v52  ;;  %v1536_v20 = vld [vmem:[%s12048_s4 + $0x5b0] sm:$0xff] }
 0x15f   : > { %v1755_v18 = vld [vmem:[%s12048_s4 + $0xc88] sm:$0xff]  ;;  %2112 = vmatpush.msra.mxu0 %v1631_v6  ;;  %v9087_v36 = vmax.f32 %v1316_v1, 0.0  ;;  %v1532_v4 = vld [vmem:[%s12048_s4 + $0x590] sm:$0xff] }
 0x160   : > { %v1707_v26 = vld [vmem:[%s12048_s4 + $0xb08] sm:$0xff]  ;;  %2171 = vmatpush.msra.mxu2 %v1755_v18  ;;  %v1476_v18 = vld [vmem:[%s12048_s4 + $0x3d0] sm:$0xff] }
 0x161   : > { %v1563_v48 = vld [vmem:[%s12048_s4 + $0x688] sm:$0xff]  ;;  %2138 = vmatpush.msra.mxu1 %v1707_v26  ;;  %v1604_v26 = vld [vmem:[%s12048_s4 + $0x7d0] sm:$0xff] }
 0x162   : > { %v1627_v61 = vld [vmem:[%s12048_s4 + $0x888] sm:$0xff]  ;;  %2084 = vmatpush.msrb.mxu3 %v1563_v48  ;;  %2034 = vmatmul.f32.gmra.mxu1 %v8632_v41  ;;  %v1249_v47 = vpop.f32.mrf.mxu0  ;;  %v1384_v1 = vld [vmem:[%s12048_s4 + $0xf0] sm:$0xff] }
 0x163   : > { %v1751_v2 = vld [vmem:[%s12048_s4 + $0xc68] sm:$0xff]  ;;  %2113 = vmatpush.msra.mxu0 %v1627_v61  ;;  %2063 = vmatmul.f32.gmra.mxu2 %v8824_v54  ;;  %v1472_v61 = vld [vmem:[%s12048_s4 + $0x3b0] sm:$0xff] }
 0x164   : > { %v1703_v37 = vld [vmem:[%s12048_s4 + $0xae8] sm:$0xff]  ;;  %2172 = vmatpush.msra.mxu2 %v1751_v2  ;;  %5915 = vmatmul.msk.f32.gmra.mxu3 %vm1770_vm4, %v9087_v36  ;;  %v1404_v2 = vld [vmem:[%s12048_s4 + $0x190] sm:$0xff] }
 0x165   : > { %v1559_v46 = vld [vmem:[%s12048_s4 + $0x668] sm:$0xff]  ;;  %2139 = vmatpush.msra.mxu1 %v1703_v37 }
 0x166   : > { %v1623_v5 = vld [vmem:[%s12048_s4 + $0x868] sm:$0xff]  ;;  %2085 = vmatpush.msrb.mxu3 %v1559_v46 }
 0x167   : > { %v1747_v15 = vld [vmem:[%s12048_s4 + $0xc48] sm:$0xff]  ;;  %2114 = vmatpush.msra.mxu0 %v1623_v5 }
 0x168   : > { %v1699_v3 = vld [vmem:[%s12048_s4 + $0xac8] sm:$0xff]  ;;  %2173 = vmatpush.msra.mxu2 %v1747_v15  ;;  %v1468_v15 = vld [vmem:[%s12048_s4 + $0x390] sm:$0xff] }
 0x169   : > { %v1555_v35 = vld [vmem:[%s12048_s4 + $0x648] sm:$0xff]  ;;  %2140 = vmatpush.msra.mxu1 %v1699_v3  ;;  %v1400_v3 = vld [vmem:[%s12048_s4 + $0x170] sm:$0xff] }
 0x16a   : > { %v1619_v62 = vld [vmem:[%s12048_s4 + $0x848] sm:$0xff]  ;;  %2086 = vmatpush.msrb.mxu3 %v1555_v35  ;;  %2037 = vmatmul.f32.gmra.mxu1 %v12088_v59  ;;  %v1464_v35 = vld [vmem:[%s12048_s4 + $0x370] sm:$0xff] }
 0x16b   : > { %v1743_v43 = vld [vmem:[%s12048_s4 + $0xc28] sm:$0xff]  ;;  %2115 = vmatpush.msra.mxu0 %v1619_v62  ;;  %2066 = vmatmul.f32.gmra.mxu2 %v8884_v25  ;;  %v1596_v62 = vld [vmem:[%s12048_s4 + $0x790] sm:$0xff] }
 0x16c   : > { %v1695_v7 = vld [vmem:[%s12048_s4 + $0xaa8] sm:$0xff]  ;;  %2174 = vmatpush.msra.mxu2 %v1743_v43  ;;  %v1540_v43 = vld [vmem:[%s12048_s4 + $0x5d0] sm:$0xff] }
 0x16d   : > { %v1551_v55 = vld [vmem:[%s12048_s4 + $0x628] sm:$0xff]  ;;  %2141 = vmatpush.msra.mxu1 %v1695_v7  ;;  %v1460_v7 = vld [vmem:[%s12048_s4 + $0x350] sm:$0xff] }
 0x16e   : > { %v1615_v9 = vld [vmem:[%s12048_s4 + $0x828] sm:$0xff]  ;;  %2087 = vmatpush.msrb.mxu3 %v1551_v55  ;;  %v1592_v55 = vld [vmem:[%s12048_s4 + $0x770] sm:$0xff] }
 0x16f   : > { %v1739_v31 = vld [vmem:[%s12048_s4 + $0xc08] sm:$0xff]  ;;  %2116 = vmatpush.msra.mxu0 %v1615_v9  ;;  %v1392_v9 = vld [vmem:[%s12048_s4 + $0x130] sm:$0xff] }
 0x170   : > { %v1691_v57 = vld [vmem:[%s12048_s4 + $0xa88] sm:$0xff]  ;;  %2175 = vmatpush.msra.mxu2 %v1739_v31  ;;  %v1456_v31 = vld [vmem:[%s12048_s4 + $0x330] sm:$0xff] }
 0x171   : > { %v1547_v60 = vld [vmem:[%s12048_s4 + $0x608] sm:$0xff]  ;;  %2142 = vmatpush.msra.mxu1 %v1691_v57  ;;  %v1388_v57 = vld [vmem:[%s12048_s4 + $0x110] sm:$0xff] }
 0x172   : > { %v1611_v19 = vld [vmem:[%s12048_s4 + $0x808] sm:$0xff]  ;;  %2088 = vmatpush.msrb.mxu3 %v1547_v60  ;;  %2276 = vmatpush.msrb.mxu2 %v1608_v13  ;;  %v1588_v60 = vld [vmem:[%s12048_s4 + $0x750] sm:$0xff] }
 0x173   : > { %2117 = vmatpush.msra.mxu0 %v1611_v19  ;;  %v1687_v44 = vld [vmem:[%s12048_s4 + $0xa68] sm:$0xff]  ;;  %2040 = vmatmul.f32.gmra.mxu1 %v8756_v28  ;;  %v1452_v19 = vld [vmem:[%s12048_s4 + $0x310] sm:$0xff] }
 0x174   : > { %2189 = vmatpush.msra.mxu3 %v1416_v58  ;;  %v12086_v30 = vld [vmem:[#allocation12_spill] sm:$0xff]  ;;  %v12087_v52 = vld [vmem:[#allocation13_spill] sm:$0xff]  ;;  %2143 = vmatpush.msra.mxu1 %v1687_v44 }
 0x175   : > { %v1004_v24 = vadd.f32 %v12086_v30, %v8283_v21  ;;  %2008 = vmatmul.f32.gmra.mxu0 %v12087_v52  ;;  %v1683_v6 = vld [vmem:[%s12048_s4 + $0xa48] sm:$0xff]  ;;  %v1408_v21 = vld [vmem:[%s12048_s4 + $0x1b0] sm:$0xff]  ;;  %2277 = vmatpush.msrb.mxu2 %v1604_v26 }
 0x176   : > { %2218 = vmatpush.msrb.mxu0 %v1480_v63  ;;  %v1679_v8 = vld [vmem:[%s12048_s4 + $0xa28] sm:$0xff]  ;;  %2190 = vmatpush.msra.mxu3 %v1412_v0  ;;  %v1528_v58 = vld [vmem:[%s12048_s4 + $0x570] sm:$0xff] }
 0x177   : > { %v1279_v48 = vadd.f32 %v1249_v47, %v1004_v24  ;;  %2144 = vmatpush.msra.mxu1 %v1683_v6  ;;  %v1675_v5 = vld [vmem:[%s12048_s4 + $0xa08] sm:$0xff]  ;;  %2278 = vmatpush.msrb.mxu2 %v1600_v42  ;;  %v1584_v44 = vld [vmem:[%s12048_s4 + $0x730] sm:$0xff] }
 0x178   : > { %2219 = vmatpush.msrb.mxu0 %v1476_v18  ;;  %2191 = vmatpush.msra.mxu3 %v1408_v21  ;;  %v1448_v63 = vld [vmem:[%s12048_s4 + $0x2f0] sm:$0xff] }
 0x179   : > { %v1323_v37 = vadd.f32 %v8959_v11, %v1279_v48  ;;  %2145 = vmatpush.msra.mxu1 %v1679_v8  ;;  %v1544_v11 = vld [vmem:[%s12048_s4 + $0x5f0] sm:$0xff]  ;;  %2279 = vmatpush.msrb.mxu2 %v1596_v62 }
 0x17a   : > { %2220 = vmatpush.msrb.mxu0 %v1472_v61  ;;  %2192 = vmatpush.msra.mxu3 %v1404_v2  ;;  %v1524_v0 = vld [vmem:[%s12048_s4 + $0x550] sm:$0xff] }
 0x17b   : > { %v9133_v46 = vmax.f32 %v1323_v37, 0.0  ;;  %2146 = vmatpush.msra.mxu1 %v1675_v5  ;;  %2280 = vmatpush.msrb.mxu2 %v1592_v55  ;;  %v1380_v13 = vld [vmem:[%s12048_s4 + $0xd0] sm:$0xff] }
 0x17c   : > { %2221 = vmatpush.msrb.mxu0 %v1468_v15  ;;  %2193 = vmatpush.msra.mxu3 %v1400_v3  ;;  %v1580_v30 = vld [vmem:[%s12048_s4 + $0x710] sm:$0xff] }
 0x17d   : > { %5916 = vmatmul.msk.f32.gmra.mxu3 %vm1770_vm4, %v9133_v46  ;;  %2011 = vmatmul.f32.gmra.mxu0 %v8754_v49  ;;  %v1444_v24 = vld [vmem:[%s12048_s4 + $0x2d0] sm:$0xff] }
 0x17e   : > { %2247 = vmatpush.msrb.mxu1 %v1544_v11  ;;  %2222 = vmatpush.msrb.mxu0 %v1464_v35  ;;  %v1520_v6 = vld [vmem:[%s12048_s4 + $0x530] sm:$0xff] }
 0x17f   : > { %2194 = vmatpush.msra.mxu3 %v1396_v12  ;;  %2069 = vmatmul.f32.gmra.mxu2 %v8935_v45  ;;  %v1376_v18 = vld [vmem:[%s12048_s4 + $0xb0] sm:$0xff] }
 0x180   : > { %2248 = vmatpush.msrb.mxu1 %v1540_v43  ;;  %2223 = vmatpush.msrb.mxu0 %v1460_v7  ;;  %v1576_v47 = vld [vmem:[%s12048_s4 + $0x6f0] sm:$0xff] }
 0x181   : > { %2195 = vmatpush.msra.mxu3 %v1392_v9  ;;  %2281 = vmatpush.msrb.mxu2 %v1588_v60  ;;  %v1440_v21 = vld [vmem:[%s12048_s4 + $0x2b0] sm:$0xff] }
 0x182   : > { %2249 = vmatpush.msrb.mxu1 %v1536_v20  ;;  %2224 = vmatpush.msrb.mxu0 %v1456_v31  ;;  %v1516_v26 = vld [vmem:[%s12048_s4 + $0x510] sm:$0xff] }
 0x183   : > { %2196 = vmatpush.msra.mxu3 %v1388_v57  ;;  %2282 = vmatpush.msrb.mxu2 %v1584_v44  ;;  %v1372_v48 = vld [vmem:[%s12048_s4 + $0x90] sm:$0xff] }
 0x184   : > { %2250 = vmatpush.msrb.mxu1 %v1532_v4  ;;  %2225 = vmatpush.msrb.mxu0 %v1452_v19  ;;  %v1572_v8 = vld [vmem:[%s12048_s4 + $0x6d0] sm:$0xff] }
 0x185   : > { %2089 = vmatmul.f32.vlgmr.msrb.gmra.mxu3 %v8760_v22  ;;  %2118 = vmatmul.f32.vlgmr.msra.gmra.mxu0 %v8820_v40  ;;  %v1436_v61 = vld [vmem:[%s12048_s4 + $0x290] sm:$0xff] }
 0x186   : > { %2251 = vmatpush.msrb.mxu1 %v1528_v58  ;;  %2197 = vmatpush.msra.mxu3 %v1384_v1  ;;  %v1512_v2 = vld [vmem:[%s12048_s4 + $0x4f0] sm:$0xff] }
 0x187   : > { %2226 = vmatpush.msrb.mxu0 %v1448_v63  ;;  %2283 = vmatpush.msrb.mxu2 %v1580_v30  ;;  %v1368_v42 = vld [vmem:[%s12048_s4 + $0x70] sm:$0xff] }
 0x188   : > { %2252 = vmatpush.msrb.mxu1 %v1524_v0  ;;  %2198 = vmatpush.msra.mxu3 %v1380_v13  ;;  %v1568_v37 = vld [vmem:[%s12048_s4 + $0x6b0] sm:$0xff] }
 0x189   : > { %2147 = vmatmul.f32.vlgmr.msra.gmra.mxu1 %v8822_v53  ;;  %5917 = vmatmul.msk.f32.vlgmr.msra.gmra.mxu2 %vm1770_vm4, %v8995_v39  ;;  %v1432_v5 = vld [vmem:[%s12048_s4 + $0x270] sm:$0xff] }
 0x18a   : > { %2227 = vmatpush.msrb.mxu0 %v1444_v24  ;;  %2253 = vmatpush.msrb.mxu1 %v1520_v6  ;;  %v1508_v15 = vld [vmem:[%s12048_s4 + $0x4d0] sm:$0xff] }
 0x18b   : > { %2199 = vmatpush.msra.mxu3 %v1376_v18  ;;  %2284 = vmatpush.msrb.mxu2 %v1576_v47  ;;  %v1364_v11 = vld [vmem:[%s12048_s4 + $0x50] sm:$0xff]  ;;  %v1417_v47 = vld [vmem:[%s12048_s4 + $0x1f8] sm:$0xff] }
 0x18c   : > { %2228 = vmatpush.msrb.mxu0 %v1440_v21  ;;  %2254 = vmatpush.msrb.mxu1 %v1516_v26  ;;  %v1564_v3 = vld [vmem:[%s12048_s4 + $0x690] sm:$0xff] }
 0x18d   : > { %2092 = vmatmul.f32.gmra.mxu3 %v8826_v34  ;;  %2121 = vmatmul.f32.gmra.mxu0 %v8880_v17  ;;  %v1428_v35 = vld [vmem:[%s12048_s4 + $0x250] sm:$0xff] }
 0x18e   : > { %2200 = vmatpush.msra.mxu3 %v1372_v48  ;;  %2285 = vmatpush.msrb.mxu2 %v1572_v8  ;;  %v1504_v62 = vld [vmem:[%s12048_s4 + $0x4b0] sm:$0xff]  ;;  %v1413_v8 = vld [vmem:[%s12048_s4 + $0x1d8] sm:$0xff] }
 0x18f   : > { %2229 = vmatpush.msrb.mxu0 %v1436_v61  ;;  %2255 = vmatpush.msrb.mxu1 %v1512_v2  ;;  %v1360_v43 = vld [vmem:[%s12048_s4 + $0x30] sm:$0xff] }
 0x190   : > { %2201 = vmatpush.msra.mxu3 %v1368_v42  ;;  %2286 = vmatpush.msrb.mxu2 %v1568_v37  ;;  %v1560_v12 = vld [vmem:[%s12048_s4 + $0x670] sm:$0xff]  ;;  %v1409_v37 = vld [vmem:[%s12048_s4 + $0x1b8] sm:$0xff] }
 0x191   : > { %2150 = vmatmul.f32.gmra.mxu1 %v8882_v33  ;;  %5918 = vmatmul.msk.f32.gmra.mxu2 %vm1770_vm4, %v9041_v10  ;;  %v1424_v7 = vld [vmem:[%s12048_s4 + $0x230] sm:$0xff] }
 0x192   : > { %2230 = vmatpush.msrb.mxu0 %v1432_v5  ;;  %2256 = vmatpush.msrb.mxu1 %v1508_v15  ;;  %v1500_v55 = vld [vmem:[%s12048_s4 + $0x490] sm:$0xff] }
 0x193   : > { %2202 = vmatpush.msra.mxu3 %v1364_v11  ;;  %2287 = vmatpush.msrb.mxu2 %v1564_v3  ;;  %v1356_v20 = vld [vmem:[%s12048_s4 + $0x10] sm:$0xff]  ;;  %v1405_v3 = vld [vmem:[%s12048_s4 + $0x198] sm:$0xff] }
 0x194   : > { %2231 = vmatpush.msrb.mxu0 %v1428_v35  ;;  %2257 = vmatpush.msrb.mxu1 %v1504_v62  ;;  %v1556_v9 = vld [vmem:[%s12048_s4 + $0x650] sm:$0xff] }
 0x195   : > { %2095 = vmatmul.f32.gmra.mxu3 %v8886_v14  ;;  %2124 = vmatmul.f32.gmra.mxu0 %v8931_v23  ;;  %v1420_v31 = vld [vmem:[%s12048_s4 + $0x210] sm:$0xff]  ;;  %v9380_v5 = vpop.f32.mrf.mxu1 }
 0x196   : > { %2203 = vmatpush.msra.mxu3 %v1360_v43  ;;  %2288 = vmatpush.msrb.mxu2 %v1560_v12  ;;  %v1496_v4 = vld [vmem:[%s12048_s4 + $0x470] sm:$0xff]  ;;  %v1401_v12 = vld [vmem:[%s12048_s4 + $0x178] sm:$0xff] }
 0x197   : > { %2232 = vmatpush.msrb.mxu0 %v1424_v7  ;;  %2258 = vmatpush.msrb.mxu1 %v1500_v55  ;;  %v1672_v57 = vld [vmem:[%s12048_s4 + $0x9f0] sm:$0xff] }
 0x198   : > { %2204 = vmatpush.msra.mxu3 %v1356_v20  ;;  %2289 = vmatpush.msrb.mxu2 %v1556_v9  ;;  %v1736_v60 = vld [vmem:[%s12048_s4 + $0xbf0] sm:$0xff] }
 0x199   : > { %2153 = vmatmul.f32.gmra.mxu1 %v8933_v32  ;;  %5919 = vmatmul.msk.f32.gmra.mxu2 %vm1770_vm4, %v9087_v36  ;;  %v1492_v19 = vld [vmem:[%s12048_s4 + $0x450] sm:$0xff] }
 0x19a   : > { %v1552_v58 = vld [vmem:[%s12048_s4 + $0x630] sm:$0xff]  ;;  %2233 = vmatpush.msrb.mxu0 %v1420_v31  ;;  %2259 = vmatpush.msrb.mxu1 %v1496_v4  ;;  %v1397_v31 = vld [vmem:[%s12048_s4 + $0x158] sm:$0xff] }
 0x19b   : > { %v1668_v1 = vld [vmem:[%s12048_s4 + $0x9d0] sm:$0xff]  ;;  %2305 = vmatpush.msrb.mxu3 %v1672_v57  ;;  %2290 = vmatpush.msrb.mxu2 %v1552_v58  ;;  %v9410_v55 = vpop.f32.mrf.mxu2  ;;  %v1393_v58 = vld [vmem:[%s12048_s4 + $0x138] sm:$0xff] }
 0x19c   : > { %v1732_v44 = vld [vmem:[%s12048_s4 + $0xbd0] sm:$0xff]  ;;  %2334 = vmatpush.msra.mxu0 %v1736_v60  ;;  %2260 = vmatpush.msrb.mxu1 %v1492_v19 }
 0x19d   : > { %2098 = vmatmul.f32.gmra.mxu3 %v8937_v50  ;;  %2127 = vmatmul.f32.gmra.mxu0 %v8991_v51  ;;  %v1488_v63 = vld [vmem:[%s12048_s4 + $0x430] sm:$0xff]  ;;  %v1803_v57 = vpop.f32.mrf.mxu1 }
 0x19e   : > { %v1548_v0 = vld [vmem:[%s12048_s4 + $0x610] sm:$0xff]  ;;  %2306 = vmatpush.msrb.mxu3 %v1668_v1  ;;  %2335 = vmatpush.msra.mxu0 %v1732_v44 }
 0x19f   : > { %v1664_v13 = vld [vmem:[%s12048_s4 + $0x9b0] sm:$0xff]  ;;  %2261 = vmatpush.msrb.mxu1 %v1488_v63  ;;  %2291 = vmatpush.msrb.mxu2 %v1548_v0  ;;  %v1389_v0 = vld [vmem:[%s12048_s4 + $0x118] sm:$0xff] }
 0x1a0   : > { %v1728_v30 = vld [vmem:[%s12048_s4 + $0xbb0] sm:$0xff]  ;;  %2307 = vmatpush.msrb.mxu3 %v1664_v13 }
 0x1a1   : > { %v1484_v24 = vld [vmem:[%s12048_s4 + $0x410] sm:$0xff]  ;;  %2336 = vmatpush.msra.mxu0 %v1728_v30  ;;  %2156 = vmatmul.f32.gmra.mxu1 %v8993_v16 }
 0x1a2   : > { %v1660_v6 = vld [vmem:[%s12048_s4 + $0x990] sm:$0xff]  ;;  %5920 = vmatmul.msk.f32.gmra.mxu2 %vm1770_vm4, %v9133_v46  ;;  %2262 = vmatpush.msrb.mxu1 %v1484_v24 }
 0x1a3   : > { %v1724_v18 = vld [vmem:[%s12048_s4 + $0xb90] sm:$0xff]  ;;  %2308 = vmatpush.msrb.mxu3 %v1660_v6  ;;  %2392 = vmatpush.msra.mxu2 %v1417_v47  ;;  %v1832_v30 = vpop.f32.mrf.mxu2  ;;  %v1385_v47 = vld [vmem:[%s12048_s4 + $0xf8] sm:$0xff] }
 0x1a4   : > { %v1656_v21 = vld [vmem:[%s12048_s4 + $0x970] sm:$0xff]  ;;  %2337 = vmatpush.msra.mxu0 %v1724_v18  ;;  %v9458_v18 = vadd.f32 %v1832_v30, %v1803_v57  ;;  %v1481_v57 = vld [vmem:[%s12048_s4 + $0x3f8] sm:$0xff] }
 0x1a5   : > { %2205 = vmatmul.f32.vlgmr.msra.gmra.mxu3 %v8578_v38  ;;  %2234 = vmatmul.f32.vlgmr.msrb.gmra.mxu0 %v8580_v56  ;;  %v1768_v26 = vld [vmem:[%s12048_s4 + $0xcf0] sm:$0xff]  ;;  %v1473_v30 = vld [vmem:[%s12048_s4 + $0x3b8] sm:$0xff] }
 0x1a6   : > { %v1720_v48 = vld [vmem:[%s12048_s4 + $0xb70] sm:$0xff]  ;;  %2309 = vmatpush.msrb.mxu3 %v1656_v21  ;;  %2371 = vmatpush.msra.mxu1 %v1768_v26  ;;  %v9466_v26 = vpop.f32.mrf.mxu1 }
 0x1a7   : > { %v1652_v61 = vld [vmem:[%s12048_s4 + $0x950] sm:$0xff]  ;;  %2338 = vmatpush.msra.mxu0 %v1720_v48  ;;  %2393 = vmatpush.msra.mxu2 %v1413_v8 }
 0x1a8   : > { %v1764_v2 = vld [vmem:[%s12048_s4 + $0xcd0] sm:$0xff]  ;;  %2310 = vmatpush.msrb.mxu3 %v1652_v61  ;;  %v1381_v61 = vld [vmem:[%s12048_s4 + $0xd8] sm:$0xff] }
 0x1a9   : > { %v1716_v42 = vld [vmem:[%s12048_s4 + $0xb50] sm:$0xff]  ;;  %2372 = vmatpush.msra.mxu1 %v1764_v2  ;;  %2394 = vmatpush.msra.mxu2 %v1409_v37  ;;  %v1609_v2 = vld [vmem:[%s12048_s4 + $0x7f8] sm:$0xff] }
 0x1aa   : > { %2339 = vmatpush.msra.mxu0 %v1716_v42  ;;  %v1648_v15 = vld [vmem:[%s12048_s4 + $0x930] sm:$0xff]  ;;  %2263 = vmatmul.f32.vlgmr.msrb.gmra.mxu1 %v8758_v29 }
 0x1ab   : > { %v1712_v11 = vld [vmem:[%s12048_s4 + $0xb30] sm:$0xff]  ;;  %2292 = vmatmul.f32.vlgmr.msrb.gmra.mxu2 %v8760_v22  ;;  %2311 = vmatpush.msrb.mxu3 %v1648_v15  ;;  %v1377_v15 = vld [vmem:[%s12048_s4 + $0xb8] sm:$0xff] }
 0x1ac   : > { %v1760_v35 = vld [vmem:[%s12048_s4 + $0xcb0] sm:$0xff]  ;;  %2340 = vmatpush.msra.mxu0 %v1712_v11  ;;  %2395 = vmatpush.msra.mxu2 %v1405_v3  ;;  %v1605_v11 = vld [vmem:[%s12048_s4 + $0x7d8] sm:$0xff]  ;;  %v9496_v3 = vpop.f32.mrf.mxu2 }
 0x1ad   : > { %2208 = vmatmul.f32.gmra.mxu3 %v8630_v27  ;;  %2237 = vmatmul.f32.gmra.mxu0 %v8632_v41  ;;  %v1644_v62 = vld [vmem:[%s12048_s4 + $0x910] sm:$0xff] }
 0x1ae   : > { %v1708_v43 = vld [vmem:[%s12048_s4 + $0xb10] sm:$0xff]  ;;  %2373 = vmatpush.msra.mxu1 %v1760_v35  ;;  %2312 = vmatpush.msrb.mxu3 %v1644_v62 }
 0x1af   : > { %v1756_v7 = vld [vmem:[%s12048_s4 + $0xc90] sm:$0xff]  ;;  %2341 = vmatpush.msra.mxu0 %v1708_v43  ;;  %2396 = vmatpush.msra.mxu2 %v1401_v12  ;;  %v1373_v43 = vld [vmem:[%s12048_s4 + $0x98] sm:$0xff] }
 0x1b0   : > { %v1640_v20 = vld [vmem:[%s12048_s4 + $0x8f0] sm:$0xff]  ;;  %2374 = vmatpush.msra.mxu1 %v1756_v7  ;;  %v1601_v12 = vld [vmem:[%s12048_s4 + $0x7b8] sm:$0xff]  ;;  %v9510_v7 = vpop.f32.mrf.mxu1 }
 0x1b1   : > { %v1704_v9 = vld [vmem:[%s12048_s4 + $0xaf0] sm:$0xff]  ;;  %2313 = vmatpush.msrb.mxu3 %v1640_v20  ;;  %2397 = vmatpush.msra.mxu2 %v1397_v31  ;;  %v9512_v20 = vpop.f32.mrf.mxu0 }
 0x1b2   : > { %v1752_v4 = vld [vmem:[%s12048_s4 + $0xc70] sm:$0xff]  ;;  %2342 = vmatpush.msra.mxu0 %v1704_v9  ;;  %2266 = vmatmul.f32.gmra.mxu1 %v8824_v54 }
 0x1b3   : > { %v1636_v60 = vld [vmem:[%s12048_s4 + $0x8d0] sm:$0xff]  ;;  %2375 = vmatpush.msra.mxu1 %v1752_v4  ;;  %2295 = vmatmul.f32.gmra.mxu2 %v8826_v34  ;;  %v1369_v4 = vld [vmem:[%s12048_s4 + $0x78] sm:$0xff] }
 0x1b4   : > { %v1700_v19 = vld [vmem:[%s12048_s4 + $0xad0] sm:$0xff]  ;;  %2314 = vmatpush.msrb.mxu3 %v1636_v60  ;;  %2398 = vmatpush.msra.mxu2 %v1393_v58  ;;  %v1365_v60 = vld [vmem:[%s12048_s4 + $0x58] sm:$0xff] }
 0x1b5   : > { %v1748_v1 = vld [vmem:[%s12048_s4 + $0xc50] sm:$0xff]  ;;  %2211 = vmatmul.f32.gmra.mxu3 %v12087_v52  ;;  %2240 = vmatmul.f32.gmra.mxu0 %v12088_v59  ;;  %v1477_v58 = vld [vmem:[%s12048_s4 + $0x3d8] sm:$0xff] }
 0x1b6   : > { %v1632_v44 = vld [vmem:[%s12048_s4 + $0x8b0] sm:$0xff]  ;;  %2343 = vmatpush.msra.mxu0 %v1700_v19  ;;  %2376 = vmatpush.msra.mxu1 %v1748_v1  ;;  %v1545_v19 = vld [vmem:[%s12048_s4 + $0x5f8] sm:$0xff] }
 0x1b7   : > { %v1696_v63 = vld [vmem:[%s12048_s4 + $0xab0] sm:$0xff]  ;;  %2315 = vmatpush.msrb.mxu3 %v1632_v44  ;;  %2399 = vmatpush.msra.mxu2 %v1389_v0  ;;  %v1597_v1 = vld [vmem:[%s12048_s4 + $0x798] sm:$0xff]  ;;  %v9542_v44 = vpop.f32.mrf.mxu2 }
 0x1b8   : > { %v1744_v13 = vld [vmem:[%s12048_s4 + $0xc30] sm:$0xff]  ;;  %2344 = vmatpush.msra.mxu0 %v1696_v63  ;;  %v1361_v63 = vld [vmem:[%s12048_s4 + $0x38] sm:$0xff] }
 0x1b9   : > { %v1628_v24 = vld [vmem:[%s12048_s4 + $0x890] sm:$0xff]  ;;  %2377 = vmatpush.msra.mxu1 %v1744_v13  ;;  %2400 = vmatpush.msra.mxu2 %v1385_v47  ;;  %v1541_v0 = vld [vmem:[%s12048_s4 + $0x5d8] sm:$0xff]  ;;  %v9550_v13 = vpop.f32.mrf.mxu3 }
 0x1ba   : > { %v1692_v6 = vld [vmem:[%s12048_s4 + $0xa90] sm:$0xff]  ;;  %2316 = vmatpush.msrb.mxu3 %v1628_v24  ;;  %2269 = vmatmul.f32.gmra.mxu1 %v8884_v25  ;;  %v1593_v24 = vld [vmem:[%s12048_s4 + $0x778] sm:$0xff] }
 0x1bb   : > { %v1740_v21 = vld [vmem:[%s12048_s4 + $0xc10] sm:$0xff]  ;;  %2345 = vmatpush.msra.mxu0 %v1692_v6  ;;  %2298 = vmatmul.f32.gmra.mxu2 %v8886_v14  ;;  %v9558_v6 = vpop.f32.mrf.mxu1  ;;  %v1357_v47 = vld [vmem:[%s12048_s4 + $0x18] sm:$0xff] }
 0x1bc   : > { %v1624_v48 = vld [vmem:[%s12048_s4 + $0x870] sm:$0xff]  ;;  %2378 = vmatpush.msra.mxu1 %v1740_v21  ;;  %2401 = vmatpush.msra.mxu2 %v1381_v61  ;;  %v1537_v21 = vld [vmem:[%s12048_s4 + $0x5b8] sm:$0xff] }
 0x1bd   : > { %v1688_v8 = vld [vmem:[%s12048_s4 + $0xa70] sm:$0xff]  ;;  %2214 = vmatmul.f32.gmra.mxu3 %v8754_v49  ;;  %2243 = vmatmul.f32.gmra.mxu0 %v8756_v28  ;;  %v1533_v61 = vld [vmem:[%s12048_s4 + $0x598] sm:$0xff] }
 0x1be   : > { %v1620_v42 = vld [vmem:[%s12048_s4 + $0x850] sm:$0xff]  ;;  %2317 = vmatpush.msrb.mxu3 %v1624_v48  ;;  %2346 = vmatpush.msra.mxu0 %v1688_v8  ;;  %v9566_v48 = vpop.f32.mrf.mxu0  ;;  %v1469_v8 = vld [vmem:[%s12048_s4 + $0x398] sm:$0xff] }
 0x1bf   : > { %v1684_v37 = vld [vmem:[%s12048_s4 + $0xa50] sm:$0xff]  ;;  %2479 = vmatpush.msrb.mxu1 %v1609_v2  ;;  %2402 = vmatpush.msra.mxu2 %v1377_v15  ;;  %v1673_v2 = vld [vmem:[%s12048_s4 + $0x9f8] sm:$0xff] }
 0x1c0   : > { %v1616_v35 = vld [vmem:[%s12048_s4 + $0x830] sm:$0xff]  ;;  %2318 = vmatpush.msrb.mxu3 %v1620_v42  ;;  %2347 = vmatpush.msra.mxu0 %v1684_v37  ;;  %v1465_v42 = vld [vmem:[%s12048_s4 + $0x378] sm:$0xff] }
 0x1c1   : > { %v1680_v62 = vld [vmem:[%s12048_s4 + $0xa30] sm:$0xff]  ;;  %2480 = vmatpush.msrb.mxu1 %v1605_v11  ;;  %2403 = vmatpush.msra.mxu2 %v1373_v43  ;;  %v1529_v37 = vld [vmem:[%s12048_s4 + $0x578] sm:$0xff]  ;;  %v9590_v11 = vpop.f32.mrf.mxu2 }
 0x1c2   : > { %2319 = vmatpush.msrb.mxu3 %v1616_v35  ;;  %2348 = vmatpush.msra.mxu0 %v1680_v62  ;;  %v1612_v9 = vld [vmem:[%s12048_s4 + $0x810] sm:$0xff]  ;;  %v1669_v15 = vld [vmem:[%s12048_s4 + $0x9d8] sm:$0xff]  ;;  %v9599_v62 = vpop.f32.mrf.mxu3 }
 0x1c3   : > { %v1676_v31 = vld [vmem:[%s12048_s4 + $0xa10] sm:$0xff]  ;;  %2481 = vmatpush.msrb.mxu1 %v1601_v12  ;;  %2301 = vmatmul.f32.gmra.mxu2 %v8937_v50  ;;  %v1589_v35 = vld [vmem:[%s12048_s4 + $0x758] sm:$0xff] }
 0x1c4   : > { %2272 = vmatmul.f32.gmra.mxu1 %v8935_v45  ;;  %2320 = vmatpush.msrb.mxu3 %v1612_v9  ;;  %v1525_v43 = vld [vmem:[%s12048_s4 + $0x558] sm:$0xff]  ;;  %v9607_v9 = vpop.f32.mrf.mxu1 }
 0x1c5   : > { %2349 = vmatpush.msra.mxu0 %v1676_v31  ;;  %2404 = vmatpush.msra.mxu2 %v1369_v4  ;;  %v1665_v12 = vld [vmem:[%s12048_s4 + $0x9b8] sm:$0xff] }
 0x1c6   : > { %2321 = vmatmul.f32.vlgmr.msrb.gmra.mxu3 %v8820_v40  ;;  %2350 = vmatmul.f32.vlgmr.msra.gmra.mxu0 %v8822_v53  ;;  %v1457_v31 = vld [vmem:[%s12048_s4 + $0x338] sm:$0xff] }
 0x1c7   : > { %2421 = vmatpush.msra.mxu3 %v1481_v57  ;;  %2405 = vmatpush.msra.mxu2 %v1365_v60  ;;  %v1585_v4 = vld [vmem:[%s12048_s4 + $0x738] sm:$0xff]  ;;  %v9615_v57 = vpop.f32.mrf.mxu0 }
 0x1c8   : > { %2450 = vmatpush.msrb.mxu0 %v1545_v19  ;;  %2482 = vmatpush.msrb.mxu1 %v1597_v1  ;;  %v1521_v60 = vld [vmem:[%s12048_s4 + $0x538] sm:$0xff] }
 0x1c9   : > { %2422 = vmatpush.msra.mxu3 %v1477_v58  ;;  %2406 = vmatpush.msra.mxu2 %v1361_v63  ;;  %v1661_v19 = vld [vmem:[%s12048_s4 + $0x998] sm:$0xff] }
 0x1ca   : > { %2451 = vmatpush.msrb.mxu0 %v1541_v0  ;;  %2483 = vmatpush.msrb.mxu1 %v1593_v24  ;;  %v1453_v58 = vld [vmem:[%s12048_s4 + $0x318] sm:$0xff] }
 0x1cb   : > { %2423 = vmatpush.msra.mxu3 %v1473_v30  ;;  %2407 = vmatpush.msra.mxu2 %v1357_v47  ;;  %v1517_v1 = vld [vmem:[%s12048_s4 + $0x518] sm:$0xff]  ;;  %v9638_v30 = vpop.f32.mrf.mxu2 }
 0x1cc   : > { %2452 = vmatpush.msrb.mxu0 %v1537_v21  ;;  %5921 = vmatmul.msk.f32.vlgmr.msra.gmra.mxu1 %vm1770_vm4, %v8995_v39  ;;  %v1657_v63 = vld [vmem:[%s12048_s4 + $0x978] sm:$0xff] }
 0x1cd   : > { %2408 = vmatmul.f32.vlgmr.msra.gmra.mxu2 %v8578_v38  ;;  %2424 = vmatpush.msra.mxu3 %v1469_v8  ;;  %v1461_v38 = vld [vmem:[%s12048_s4 + $0x358] sm:$0xff] }
 0x1ce   : > { %2453 = vmatpush.msrb.mxu0 %v1533_v61  ;;  %2508 = vmatpush.msrb.mxu2 %v1673_v2  ;;  %v1449_v0 = vld [vmem:[%s12048_s4 + $0x2f8] sm:$0xff]  ;;  %v9656_v61 = vpop.f32.mrf.mxu1 }
 0x1cf   : > { %2324 = vmatmul.f32.gmra.mxu3 %v8880_v17  ;;  %2353 = vmatmul.f32.gmra.mxu0 %v8882_v33  ;;  %v1513_v24 = vld [vmem:[%s12048_s4 + $0x4f8] sm:$0xff] }
 0x1d0   : > { %2425 = vmatpush.msra.mxu3 %v1465_v42  ;;  %2454 = vmatpush.msrb.mxu0 %v1529_v37  ;;  %v1653_v47 = vld [vmem:[%s12048_s4 + $0x958] sm:$0xff]  ;;  %v9664_v37 = vpop.f32.mrf.mxu0 }
 0x1d1   : > { %2509 = vmatpush.msrb.mxu2 %v1669_v15  ;;  %2484 = vmatpush.msrb.mxu1 %v1589_v35  ;;  %v1445_v21 = vld [vmem:[%s12048_s4 + $0x2d8] sm:$0xff] }
 0x1d2   : > { %2426 = vmatpush.msra.mxu3 %v1461_v38  ;;  %2455 = vmatpush.msrb.mxu0 %v1525_v43  ;;  %v1581_v8 = vld [vmem:[%s12048_s4 + $0x718] sm:$0xff] }
 0x1d3   : > { %2510 = vmatpush.msrb.mxu2 %v1665_v12  ;;  %2485 = vmatpush.msrb.mxu1 %v1585_v4  ;;  %v1509_v2 = vld [vmem:[%s12048_s4 + $0x4d8] sm:$0xff] }
 0x1d4   : > { %2427 = vmatpush.msra.mxu3 %v1457_v31  ;;  %2456 = vmatpush.msrb.mxu0 %v1521_v60  ;;  %v1649_v42 = vld [vmem:[%s12048_s4 + $0x938] sm:$0xff]  ;;  %v9690_v60 = vpop.f32.mrf.mxu2 }
 0x1d5   : > { %2511 = vmatpush.msrb.mxu2 %v1661_v19  ;;  %5922 = vmatmul.msk.f32.gmra.mxu1 %vm1770_vm4, %v9041_v10  ;;  %v1441_v15 = vld [vmem:[%s12048_s4 + $0x2b8] sm:$0xff] }
 0x1d6   : > { %2411 = vmatmul.f32.gmra.mxu2 %v8630_v27  ;;  %2428 = vmatpush.msra.mxu3 %v1453_v58  ;;  %v9647_v27 = vpop.f32.mrf.mxu3  ;;  %v1577_v38 = vld [vmem:[%s12048_s4 + $0x6f8] sm:$0xff] }
 0x1d7   : > { %2457 = vmatpush.msrb.mxu0 %v1517_v1  ;;  %2512 = vmatpush.msrb.mxu2 %v1657_v63  ;;  %v1505_v35 = vld [vmem:[%s12048_s4 + $0x4b8] sm:$0xff] }
 0x1d8   : > { %2327 = vmatmul.f32.gmra.mxu3 %v8931_v23  ;;  %2356 = vmatmul.f32.gmra.mxu0 %v8933_v32  ;;  %v1645_v43 = vld [vmem:[%s12048_s4 + $0x918] sm:$0xff] }
 0x1d9   : > { %2429 = vmatpush.msra.mxu3 %v1449_v0  ;;  %2458 = vmatpush.msrb.mxu0 %v1513_v24  ;;  %v1437_v12 = vld [vmem:[%s12048_s4 + $0x298] sm:$0xff]  ;;  %v9707_v0 = vpop.f32.mrf.mxu1 }
 0x1da   : > { %2513 = vmatpush.msrb.mxu2 %v1653_v47  ;;  %2486 = vmatpush.msrb.mxu1 %v1581_v8  ;;  %v1501_v31 = vld [vmem:[%s12048_s4 + $0x498] sm:$0xff]  ;;  %v9719_v8 = vpop.f32.mrf.mxu0 }
 0x1db   : > { %2430 = vmatpush.msra.mxu3 %v1445_v21  ;;  %2459 = vmatpush.msrb.mxu0 %v1509_v2  ;;  %v1641_v4 = vld [vmem:[%s12048_s4 + $0x8f8] sm:$0xff] }
 0x1dc   : > { %2514 = vmatpush.msrb.mxu2 %v1649_v42  ;;  %2487 = vmatpush.msrb.mxu1 %v1577_v38  ;;  %v1433_v19 = vld [vmem:[%s12048_s4 + $0x278] sm:$0xff] }
 0x1dd   : > { %2431 = vmatpush.msra.mxu3 %v1441_v15  ;;  %2460 = vmatpush.msrb.mxu0 %v1505_v35  ;;  %v1497_v58 = vld [vmem:[%s12048_s4 + $0x478] sm:$0xff] }
 0x1de   : > { %2515 = vmatpush.msrb.mxu2 %v1645_v43  ;;  %5923 = vmatmul.msk.f32.gmra.mxu1 %vm1770_vm4, %v9087_v36  ;;  %v1573_v1 = vld [vmem:[%s12048_s4 + $0x6d8] sm:$0xff]  ;;  %v9701_v63 = vpop.f32.mrf.mxu3 }
 0x1df   : > { %2414 = vmatmul.f32.gmra.mxu2 %v12087_v52  ;;  %2432 = vmatpush.msra.mxu3 %v1437_v12  ;;  %v1637_v52 = vld [vmem:[%s12048_s4 + $0x8d8] sm:$0xff] }
 0x1e0   : > { %2461 = vmatpush.msrb.mxu0 %v1501_v31  ;;  %2516 = vmatpush.msrb.mxu2 %v1641_v4  ;;  %v1429_v24 = vld [vmem:[%s12048_s4 + $0x258] sm:$0xff]  ;;  %v9745_v4 = vpop.f32.mrf.mxu2 }
 0x1e1   : > { %2330 = vmatmul.f32.gmra.mxu3 %v8991_v51  ;;  %2359 = vmatmul.f32.gmra.mxu0 %v8993_v16  ;;  %v1493_v47 = vld [vmem:[%s12048_s4 + $0x458] sm:$0xff] }
 0x1e2   : > { %2433 = vmatpush.msra.mxu3 %v1433_v19  ;;  %v1569_v21 = vld [vmem:[%s12048_s4 + $0x6b8] sm:$0xff]  ;;  %2462 = vmatpush.msrb.mxu0 %v1497_v58 }
 0x1e3   : > { %2488 = vmatpush.msrb.mxu1 %v1573_v1  ;;  %v1633_v2 = vld [vmem:[%s12048_s4 + $0x8b8] sm:$0xff]  ;;  %2517 = vmatpush.msrb.mxu2 %v1637_v52  ;;  %v9758_v52 = vpop.f32.mrf.mxu1 }
 0x1e4   : > { %v1425_v42 = vld [vmem:[%s12048_s4 + $0x238] sm:$0xff]  ;;  %2434 = vmatpush.msra.mxu3 %v1429_v24  ;;  %2463 = vmatpush.msrb.mxu0 %v1493_v47 }
 0x1e5   : > { %v1489_v15 = vld [vmem:[%s12048_s4 + $0x438] sm:$0xff]  ;;  %2489 = vmatpush.msrb.mxu1 %v1569_v21  ;;  %2518 = vmatpush.msrb.mxu2 %v1633_v2  ;;  %v9766_v21 = vpop.f32.mrf.mxu0 }
 0x1e6   : > { %v1565_v38 = vld [vmem:[%s12048_s4 + $0x698] sm:$0xff]  ;;  %2435 = vmatpush.msra.mxu3 %v1425_v42  ;;  %2464 = vmatpush.msrb.mxu0 %v1489_v15  ;;  %v9752_v58 = vpop.f32.mrf.mxu3 }
 0x1e7   : > { %v1629_v35 = vld [vmem:[%s12048_s4 + $0x898] sm:$0xff]  ;;  %2490 = vmatpush.msrb.mxu1 %v1565_v38  ;;  %2417 = vmatmul.f32.gmra.mxu2 %v8754_v49 }
 0x1e8   : > { %v1421_v43 = vld [vmem:[%s12048_s4 + $0x218] sm:$0xff]  ;;  %2519 = vmatpush.msrb.mxu2 %v1629_v35  ;;  %5924 = vmatmul.msk.f32.gmra.mxu1 %vm1770_vm4, %v9133_v46 }
 0x1e9   : > { %v1485_v12 = vld [vmem:[%s12048_s4 + $0x418] sm:$0xff]  ;;  %2436 = vmatpush.msra.mxu3 %v1421_v43  ;;  %v9794_v43 = vpop.f32.mrf.mxu2 }
 0x1ea   : > { %v1561_v31 = vld [vmem:[%s12048_s4 + $0x678] sm:$0xff]  ;;  %2465 = vmatpush.msrb.mxu0 %v1485_v12  ;;  %2437 = vmatmul.f32.vlgmr.msra.gmra.mxu3 %v8580_v56 }
 0x1eb   : > { %v1625_v19 = vld [vmem:[%s12048_s4 + $0x878] sm:$0xff]  ;;  %2491 = vmatpush.msrb.mxu1 %v1561_v31  ;;  %2466 = vmatmul.f32.vlgmr.msrb.gmra.mxu0 %v8758_v29 }
 0x1ec   : > { %v1557_v1 = vld [vmem:[%s12048_s4 + $0x658] sm:$0xff]  ;;  %2520 = vmatpush.msrb.mxu2 %v1625_v19 }
 0x1ed   : > { %v1621_v24 = vld [vmem:[%s12048_s4 + $0x858] sm:$0xff]  ;;  %2492 = vmatpush.msrb.mxu1 %v1557_v1  ;;  %v1839_v1 = vadd.f32 %v9542_v44, %v9510_v7  ;;  %v1836_v7 = vadd.f32 %v9496_v3, %v9466_v26  ;;  %v1862_v3 = vadd.f32 %v9599_v62, %v9458_v18 }
 0x1ee   : > { %v1737_v47 = vld [vmem:[%s12048_s4 + $0xbf8] sm:$0xff]  ;;  %2521 = vmatpush.msrb.mxu2 %v1621_v24  ;;  %v9799_v31 = vpop.f32.mrf.mxu3  ;;  %v9806_v24 = vpop.f32.mrf.mxu1 }
 0x1ef   : > { %v1553_v49 = vld [vmem:[%s12048_s4 + $0x638] sm:$0xff]  ;;  %2537 = vmatpush.msrb.mxu3 %v1737_v47  ;;  %v1868_v44 = vadd.f32 %v9701_v63, %v1839_v1 }
 0x1f0   : > { %v1769_v2 = vld [vmem:[%s12048_s4 + $0xcf8] sm:$0xff]  ;;  %2493 = vmatpush.msrb.mxu1 %v1553_v49 }
 0x1f1   : > { %v1617_v42 = vld [vmem:[%s12048_s4 + $0x838] sm:$0xff]  ;;  %2574 = vmatpush.msra.mxu0 %v1769_v2  ;;  %v1897_v63 = vadd.f32 %v9664_v37, %v1868_v44 }
 0x1f2   : > { %v1733_v15 = vld [vmem:[%s12048_s4 + $0xbd8] sm:$0xff]  ;;  %2522 = vmatpush.msrb.mxu2 %v1617_v42  ;;  %v9813_v49 = vpop.f32.mrf.mxu0  ;;  %2440 = vmatmul.f32.gmra.mxu3 %v8632_v41  ;;  %v1865_v42 = vadd.f32 %v9647_v27, %v1836_v7  ;;  %v9841_v27 = vpop.f32.mrf.mxu2 }
 0x1f3   : > { %v1549_v56 = vld [vmem:[%s12048_s4 + $0x618] sm:$0xff]  ;;  %2538 = vmatpush.msrb.mxu3 %v1733_v15  ;;  %2469 = vmatmul.f32.gmra.mxu0 %v8824_v54  ;;  %v1830_v54 = vadd.f32 %v9410_v55, %v9380_v5 }
 0x1f4   : > { %v1765_v38 = vld [vmem:[%s12048_s4 + $0xcd8] sm:$0xff]  ;;  %2494 = vmatpush.msrb.mxu1 %v1549_v56  ;;  %v1894_v55 = vadd.f32 %v9615_v57, %v1865_v42  ;;  %v1891_v57 = vadd.f32 %v9566_v48, %v1862_v3 }
 0x1f5   : > { %v1613_v29 = vld [vmem:[%s12048_s4 + $0x818] sm:$0xff]  ;;  %2575 = vmatpush.msra.mxu0 %v1765_v38  ;;  %2495 = vmatmul.f32.vlgmr.msrb.gmra.mxu1 %v8760_v22  ;;  %v1859_v5 = vadd.f32 %v9550_v13, %v1830_v54 }
 0x1f6   : > { %v1729_v35 = vld [vmem:[%s12048_s4 + $0xbb8] sm:$0xff]  ;;  %2523 = vmatpush.msrb.mxu2 %v1613_v29  ;;  %v1980_v56 = vpop.f32.mrf.mxu3  ;;  %v9851_v18 = vpop.f32.mrf.mxu1  ;;  %v1926_v29 = vadd.f32 %v9707_v0, %v1897_v63  ;;  %v1920_v0 = vadd.f32 %v9607_v9, %v1891_v57 }
 0x1f7   : > { %v1725_v12 = vld [vmem:[%s12048_s4 + $0xb98] sm:$0xff]  ;;  %2539 = vmatpush.msrb.mxu3 %v1729_v35  ;;  %2524 = vmatmul.f32.vlgmr.msrb.gmra.mxu2 %v8820_v40  ;;  %v1923_v35 = vadd.f32 %v9656_v61, %v1894_v55 }
 0x1f8   : > { %v1761_v19 = vld [vmem:[%s12048_s4 + $0xcb8] sm:$0xff] }
 0x1f9   : > { %v1721_v47 = vld [vmem:[%s12048_s4 + $0xb78] sm:$0xff]  ;;  %2540 = vmatpush.msrb.mxu3 %v1725_v12  ;;  %2576 = vmatpush.msra.mxu0 %v1761_v19  ;;  %v1952_v61 = vadd.f32 %v9690_v60, %v1923_v35 }
 0x1fa   : > { %v1757_v2 = vld [vmem:[%s12048_s4 + $0xc98] sm:$0xff]  ;;  %v9858_v37 = vpop.f32.mrf.mxu0  ;;  %2443 = vmatmul.f32.gmra.mxu3 %v12088_v59  ;;  %v1955_v59 = vadd.f32 %v9745_v4, %v1926_v29 }
 0x1fb   : > { %v1717_v22 = vld [vmem:[%s12048_s4 + $0xb58] sm:$0xff]  ;;  %2541 = vmatpush.msrb.mxu3 %v1721_v47  ;;  %2577 = vmatpush.msra.mxu0 %v1757_v2  ;;  %v1949_v2 = vadd.f32 %v9638_v30, %v1920_v0  ;;  %v1981_v7 = vadd.f32 %v1980_v56, %v1952_v61 }
 0x1fc   : > { %v1753_v40 = vld [vmem:[%s12048_s4 + $0xc78] sm:$0xff]  ;;  %2472 = vmatmul.f32.gmra.mxu0 %v8884_v25  ;;  %v2067_v25 = vpop.f32.mrf.mxu2 }
 0x1fd   : > { %v1713_v26 = vld [vmem:[%s12048_s4 + $0xb38] sm:$0xff]  ;;  %2542 = vmatpush.msrb.mxu3 %v1717_v22  ;;  %2578 = vmatpush.msra.mxu0 %v1753_v40 }
 0x1fe   : > { %v1749_v41 = vld [vmem:[%s12048_s4 + $0xc58] sm:$0xff]  ;;  %2498 = vmatmul.f32.gmra.mxu1 %v8826_v34  ;;  %v2041_v47 = vpop.f32.mrf.mxu1 }
 0x1ff   : > { %v1709_v15 = vld [vmem:[%s12048_s4 + $0xb18] sm:$0xff]  ;;  %2543 = vmatpush.msrb.mxu3 %v1713_v26  ;;  %2579 = vmatpush.msra.mxu0 %v1749_v41 }
 0x200   : > { %v1745_v38 = vld [vmem:[%s12048_s4 + $0xc38] sm:$0xff]  ;;  %2527 = vmatmul.f32.gmra.mxu2 %v8880_v17  ;;  %v1888_v17 = vadd.f32 %v9512_v20, %v1859_v5  ;;  %v1983_v19 = vpop.f32.mrf.mxu3 }
 0x201   : > { %v1705_v62 = vld [vmem:[%s12048_s4 + $0xaf8] sm:$0xff]  ;;  %2544 = vmatpush.msrb.mxu3 %v1709_v15  ;;  %2580 = vmatpush.msra.mxu0 %v1745_v38  ;;  %v1984_v1 = vadd.f32 %v1983_v19, %v1955_v59 }
 0x202   : > { %v1741_v13 = vld [vmem:[%s12048_s4 + $0xc18] sm:$0xff]  ;;  %v1917_v20 = vadd.f32 %v9558_v6, %v1888_v17  ;;  %v9887_v4 = vpop.f32.mrf.mxu0  ;;  %2446 = vmatmul.f32.gmra.mxu3 %v8756_v28  ;;  %v1978_v6 = vadd.f32 %v9799_v31, %v1949_v2 }
 0x203   : > { %v1701_v34 = vld [vmem:[%s12048_s4 + $0xad8] sm:$0xff]  ;;  %2545 = vmatpush.msrb.mxu3 %v1705_v62  ;;  %2581 = vmatpush.msra.mxu0 %v1741_v13 }
 0x204   : > { %v1697_v48 = vld [vmem:[%s12048_s4 + $0xab8] sm:$0xff]  ;;  %5929 = vmatpush.msk.msra.mxu1 %vm2602_vm5, %v1984_v1  ;;  %2475 = vmatmul.f32.gmra.mxu0 %v8935_v45  ;;  %v2070_v28 = vpop.f32.mrf.mxu2 }
 0x205   : > { %2546 = vmatpush.msrb.mxu3 %v1701_v34  ;;  %v1693_v12 = vld [vmem:[%s12048_s4 + $0xa98] sm:$0xff]  ;;  %v9939_v34 = vld [vmem:[%s12047_s3 + $0x8] sm:$0x1f] }
 0x206   : > { %2501 = vmatmul.f32.gmra.mxu1 %v8886_v14  ;;  %v1689_v9 = vld [vmem:[%s12048_s4 + $0xa78] sm:$0xff] }
 0x207   : > { %2547 = vmatpush.msrb.mxu3 %v1697_v48  ;;  %v1685_v14 = vld [vmem:[%s12048_s4 + $0xa58] sm:$0xff]  ;;  %2628 = vmatpush.msra.mxu1 %v1981_v7 }
 0x208   : > { %2530 = vmatmul.f32.gmra.mxu2 %v8931_v23  ;;  %v1946_v23 = vadd.f32 %v9590_v11, %v1917_v20  ;;  %v1681_v30 = vld [vmem:[%s12048_s4 + $0xa38] sm:$0xff]  ;;  %v2090_v44 = vpop.f32.mrf.mxu3  ;;  %v2148_v11 = vpop.f32.mrf.mxu1 }
 0x209   : > { %2548 = vmatpush.msrb.mxu3 %v1693_v12  ;;  %2629 = vmatpush.msra.mxu1 %v1978_v6  ;;  %v1677_v45 = vld [vmem:[%s12048_s4 + $0xa18] sm:$0xff] }
 0x20a   : > { %v1975_v60 = vadd.f32 %v9752_v58, %v1946_v23  ;;  %v2122_v31 = vpop.f32.mrf.mxu0 }
 0x20b   : > { %2549 = vmatpush.msrb.mxu3 %v1689_v9 }
 0x20c   : > { %2630 = vmatpush.msra.mxu1 %v1975_v60  ;;  %5925 = vmatmul.msk.f32.vlgmr.msra.gmra.mxu0 %vm1770_vm4, %v8995_v39  ;;  %v2177_v58 = vpop.f32.mrf.mxu2 }
 0x20d   : > { %2550 = vmatpush.msrb.mxu3 %v1685_v14 }
 0x20e   : > { %2504 = vmatmul.f32.gmra.mxu1 %v8937_v50 }
 0x20f   : > { %2551 = vmatpush.msrb.mxu3 %v1681_v30 }
 0x210   : > { %2533 = vmatmul.f32.gmra.mxu2 %v8991_v51  ;;  %v2093_v22 = vpop.f32.mrf.mxu3  ;;  %v2151_v40 = vpop.f32.mrf.mxu1  ;;  %v2039_v51 = vadd.f32 %v9851_v18, %v9813_v49 }
 0x211   : > { %2552 = vmatpush.msrb.mxu3 %v1677_v45 }
 0x212   : > { %2553 = vmatmul.f32.vlgmr.msrb.gmra.mxu3 %v8822_v53  ;;  %v2125_v42 = vpop.f32.mrf.mxu0  ;;  %v2036_v53 = vadd.f32 %v9806_v24, %v9766_v21  ;;  %v2068_v39 = vadd.f32 %v2067_v25, %v2039_v51 }
 0x214   : > { %5926 = vmatmul.msk.f32.gmra.mxu0 %vm1770_vm4, %v9041_v10  ;;  %v2180_v26 = vpop.f32.mrf.mxu2  ;;  %v2033_v10 = vadd.f32 %v9758_v52, %v9719_v8  ;;  %v2065_v3 = vadd.f32 %v9841_v27, %v2036_v53 }
 0x216   : > { %v2062_v56 = vadd.f32 %v9794_v43, %v2033_v10  ;;  %v2094_v38 = vadd.f32 %v2093_v22, %v2065_v3 }
 0x218   : > { %v2096_v50 = vpop.f32.mrf.mxu3  ;;  %v2154_v41 = vpop.f32.mrf.mxu1  ;;  %v2091_v8 = vadd.f32 %v2090_v44, %v2062_v56  ;;  %v2123_v55 = vadd.f32 %v2122_v31, %v2094_v38 }
 0x219   : > { %v2097_v63 = vadd.f32 %v2096_v50, %v2068_v39 }
 0x21a   : > { %2556 = vmatmul.f32.gmra.mxu3 %v8882_v33  ;;  %v2128_v54 = vpop.f32.mrf.mxu0  ;;  %v2042_v33 = vadd.f32 %v2041_v47, %v9858_v37  ;;  %v2120_v18 = vadd.f32 %v9887_v4, %v2091_v8  ;;  %v2152_v13 = vadd.f32 %v2151_v40, %v2123_v55 }
 0x21b   : > { %v2126_v52 = vadd.f32 %v2125_v42, %v2097_v63 }
 0x21c   : > { %5927 = vmatmul.msk.f32.gmra.mxu0 %vm1770_vm4, %v9087_v36  ;;  %v2071_v15 = vadd.f32 %v2070_v28, %v2042_v33  ;;  %v2183_v49 = vpop.f32.mrf.mxu2  ;;  %v2181_v48 = vadd.f32 %v2180_v26, %v2152_v13 }
 0x21d   : > { %v2155_v62 = vadd.f32 %v2154_v41, %v2126_v52 }
 0x21f   : > { %v2184_v35 = vadd.f32 %v2183_v49, %v2155_v62 }
 0x220   : > { %v2099_v21 = vpop.f32.mrf.mxu3  ;;  %v2157_v24 = vpop.f32.mrf.mxu1 }
 0x221   : > { %v2100_v36 = vadd.f32 %v2099_v21, %v2071_v15 }
 0x222   : > { %2559 = vmatmul.f32.gmra.mxu3 %v8933_v32  ;;  %v9928_v32 = vld [vmem:[%s12047_s3] sm:$0xff]  ;;  %v2235_v27 = vpop.f32.mrf.mxu0 }
 0x223   : > { %5930 = vmatmul.msk.f32.vlgmr.msra.gmra.mxu1 %vm2595_vm6, %v9928_v32  ;;  %v2129_v5 = vadd.f32 %v2128_v54, %v2100_v36 }
 0x224   : > { %5928 = vmatmul.msk.f32.gmra.mxu0 %vm1770_vm4, %v9133_v46 }
 0x225   : > { %v2158_v43 = vadd.f32 %v2157_v24, %v2129_v5  ;;  %v2186_v37 = vpop.f32.mrf.mxu2 }
 0x227   : > { %v2187_v57 = vadd.f32 %v2186_v37, %v2158_v43 }
 0x228   : > { %v2206_v29 = vpop.f32.mrf.mxu3  ;;  %v2264_v17 = vpop.f32.mrf.mxu1 }
 0x229   : > { %5932 = vmatpush.msk.msra.mxu2 %vm2602_vm5, %v2187_v57  ;;  %v2236_v42 = vadd.f32 %v2235_v27, %v2206_v29  ;;  %v6131_v57 = vld [vmem:[%s12049_s5 + $0x318] sm:$0xf]  ;;  %v7416_v29 = vld [vmem:[%s12049_s5 + $0x320] sm:$0xf0] }
 0x22a   : > { %2562 = vmatmul.f32.gmra.mxu3 %v8993_v16  ;;  %v2149_v16 = vadd.f32 %v2148_v11, %v2120_v18  ;;  %v2238_v46 = vpop.f32.mrf.mxu0 }
 0x22b   : > { %5931 = vmatmul.msk.f32.gmra.mxu1 %vm2595_vm6, %v9939_v34  ;;  %2651 = vmatpush.msra.mxu2 %v2184_v35  ;;  %v2265_v53 = vadd.f32 %v2264_v17, %v2236_v42 }
 0x22c   : > { %v2178_v0 = vadd.f32 %v2177_v58, %v2149_v16  ;;  %v6132_v16 = vor.u32 %v7416_v29, %v6131_v57 }
 0x22d   : > { %2652 = vmatpush.msra.mxu2 %v2181_v48  ;;  %v6119_v48 = vld [vmem:[%s12049_s5 + $0x300] sm:$0xf] }
 0x22e   : > { %v2293_v19 = vpop.f32.mrf.mxu2  ;;  %3371 = vmatpush.bf16.msrb.mxu0 %v6132_v16 }
 0x22f   : > { %2653 = vmatpush.msra.mxu2 %v2178_v0  ;;  %v2294_v63 = vadd.f32 %v2293_v19, %v2265_v53  ;;  %v7413_v0 = vld [vmem:[%s12049_s5 + $0x308] sm:$0xf0]  ;;  %v7410_v19 = vld [vmem:[%s12049_s5 + $0x2f0] sm:$0xf0]  ;;  %v6133_v53 = vld [vmem:[%s12049_s5 + $0x324] sm:$0xf0] }
 0x230   : > { %v2209_v59 = vpop.f32.mrf.mxu3  ;;  %v2267_v25 = vpop.f32.mrf.mxu1  ;;  %5933 = vmatmul.msk.f32.vlgmr.msra.gmra.mxu2 %vm2595_vm6, %v9928_v32 }
 0x231   : > { %v2239_v31 = vadd.f32 %v2238_v46, %v2209_v59 }
 0x232   : > { %v2241_v12 = vpop.f32.mrf.mxu0 }
 0x233   : > { %v2268_v41 = vadd.f32 %v2267_v25, %v2239_v31  ;;  %v6120_v25 = vor.u32 %v7413_v0, %v6119_v48  ;;  %v6059_v31 = vld [vmem:[%s12049_s5 + $0x288] sm:$0xf] }
 0x235   : > { %3372 = vmatpush.bf16.msrb.mxu0 %v6120_v25  ;;  %v6215_v25 = vld [vmem:[%s12049_s5 + $0x3c0] sm:$0xf] }
 0x236   : > { %v2296_v47 = vpop.f32.mrf.mxu2 }
 0x237   : > { %v2297_v39 = vadd.f32 %v2296_v47, %v2268_v41  ;;  %v7395_v41 = vld [vmem:[%s12049_s5 + $0x278] sm:$0xf0] }
 0x238   : > { %v2212_v20 = vpop.f32.mrf.mxu3  ;;  %v2270_v61 = vpop.f32.mrf.mxu1  ;;  %5934 = vmatmul.msk.f32.gmra.mxu2 %vm2595_vm6, %v9939_v34 }
 0x239   : > { %v2242_v44 = vadd.f32 %v2241_v12, %v2212_v20  ;;  %v6107_v12 = vld [vmem:[%s12049_s5 + $0x2e8] sm:$0xf] }
 0x23a   : > { %v2244_v1 = vpop.f32.mrf.mxu0 }
 0x23b   : > { %v2271_v26 = vadd.f32 %v2270_v61, %v2242_v44  ;;  %v6108_v61 = vor.u32 %v7410_v19, %v6107_v12  ;;  %v7437_v12 = vld [vmem:[%s12049_s5 + $0x3c8] sm:$0xf0] }
 0x23d   : > { %3373 = vmatpush.bf16.msrb.mxu0 %v6108_v61 }
 0x23e   : > { %v2299_v7 = vpop.f32.mrf.mxu2 }
 0x23f   : > { %v2300_v51 = vadd.f32 %v2299_v7, %v2271_v26 }
 0x240   : > { %v2215_v9 = vpop.f32.mrf.mxu3 }
 0x241   : > { %v2273_v4 = vpop.f32.mrf.mxu1  ;;  %v2245_v58 = vadd.f32 %v2244_v1, %v2215_v9  ;;  %v6095_v9 = vld [vmem:[%s12049_s5 + $0x2d0] sm:$0xf] }
 0x243   : > { %v2351_v2 = vpop.f32.mrf.mxu0  ;;  %v2274_v54 = vadd.f32 %v2273_v4, %v2245_v58  ;;  %v7407_v4 = vld [vmem:[%s12049_s5 + $0x2d8] sm:$0xf0]  ;;  %v7398_v58 = vld [vmem:[%s12049_s5 + $0x290] sm:$0xf0] }
 0x244   : > { %v6060_v26 = vor.u32 %v7398_v58, %v6059_v31  ;;  %v6061_v58 = vld [vmem:[%s12049_s5 + $0x294] sm:$0xf0] }
 0x246   : > { %v2302_v60 = vpop.f32.mrf.mxu2 }
 0x247   : > { %v2303_v33 = vadd.f32 %v2302_v60, %v2274_v54  ;;  %v6071_v60 = vld [vmem:[%s12049_s5 + $0x2a0] sm:$0xf]  ;;  %v7415_v54 = vld [vmem:[%s12049_s5 + $0x31c] sm:$0xf] }
 0x249   : > { %v2322_v14 = vpop.f32.mrf.mxu3  ;;  %v2380_v23 = vpop.f32.mrf.mxu1 }
 0x24a   : > { %v2323_v56 = vadd.f32 %v2322_v14, %v2294_v63  ;;  %v6083_v14 = vld [vmem:[%s12049_s5 + $0x2b8] sm:$0xf] }
 0x24c   : > { %v2354_v6 = vpop.f32.mrf.mxu0  ;;  %v2352_v5 = vadd.f32 %v2351_v2, %v2323_v56  ;;  %v6096_v2 = vor.u32 %v7407_v4, %v6095_v9  ;;  %v7400_v9 = vld [vmem:[%s12049_s5 + $0x2a4] sm:$0xf]  ;;  %v6073_v4 = vld [vmem:[%s12049_s5 + $0x2ac] sm:$0xf0] }
 0x24e   : > { %v2381_v62 = vadd.f32 %v2380_v23, %v2352_v5  ;;  %3374 = vmatpush.bf16.msrb.mxu0 %v6096_v2  ;;  %v7404_v23 = vld [vmem:[%s12049_s5 + $0x2c0] sm:$0xf0]  ;;  %v6216_v2 = vor.u32 %v7437_v12, %v6215_v25  ;;  %v6311_v12 = vld [vmem:[%s12049_s5 + $0x480] sm:$0xf] }
 0x250   : > { %v9948_v22 = vpop.f32.mrf.mxu2 }
 0x252   : > { %v2325_v30 = vpop.f32.mrf.mxu3  ;;  %v2383_v28 = vpop.f32.mrf.mxu1 }
 0x253   : > { %v2326_v15 = vadd.f32 %v2325_v30, %v2297_v39  ;;  %v6084_v30 = vor.u32 %v7404_v23, %v6083_v14  ;;  %v7412_v39 = vld [vmem:[%s12049_s5 + $0x304] sm:$0xf]  ;;  %v7434_v23 = vld [vmem:[%s12049_s5 + $0x3b0] sm:$0xf0] }
 0x255   : > { %v2357_v45 = vpop.f32.mrf.mxu0  ;;  %v2355_v8 = vadd.f32 %v2354_v6, %v2326_v15  ;;  %3375 = vmatpush.bf16.msrb.mxu0 %v6084_v30 }
 0x257   : > { %v2384_v43 = vadd.f32 %v2383_v28, %v2355_v8  ;;  %v7401_v28 = vld [vmem:[%s12049_s5 + $0x2a8] sm:$0xf0]  ;;  %v6109_v8 = vld [vmem:[%s12049_s5 + $0x2f4] sm:$0xf0] }
 0x258   : > { %v6072_v44 = vor.u32 %v7401_v28, %v6071_v60 }
 0x259   : > { %v9950_v38 = vpop.f32.mrf.mxu2 }
 0x25a   : > { %3376 = vmatpush.bf16.msrb.mxu0 %v6072_v44  ;;  %v6076_v44 = vor.u32 %v7400_v9, %v6073_v4  ;;  %v7432_v9 = vld [vmem:[%s12049_s5 + $0x3a0] sm:$0xf0] }
 0x25b   : > { %v2328_v11 = vpop.f32.mrf.mxu3  ;;  %v2386_v40 = vpop.f32.mrf.mxu1 }
 0x25c   : > { %v2329_v10 = vadd.f32 %v2328_v11, %v2300_v51 }
 0x25e   : > { %v2360_v50 = vpop.f32.mrf.mxu0  ;;  %v2358_v21 = vadd.f32 %v2357_v45, %v2329_v10  ;;  %3377 = vmatpush.bf16.msrb.mxu0 %v6060_v26  ;;  %v6121_v10 = vld [vmem:[%s12049_s5 + $0x30c] sm:$0xf0] }
 0x25f   : > { %v6124_v15 = vor.u32 %v7412_v39, %v6121_v10 }
 0x260   : > { %v2387_v55 = vadd.f32 %v2386_v40, %v2358_v21 }
 0x262   : > { %v2415_v37 = vpop.f32.mrf.mxu2 }
 0x264   : > { %v2331_v3 = vpop.f32.mrf.mxu3 }
 0x265   : > { %v2332_v49 = vadd.f32 %v2331_v3, %v2303_v33  ;;  %v2389_v24 = vpop.f32.mrf.mxu1  ;;  %v6136_v33 = vor.u32 %v7415_v54, %v6133_v53  ;;  %v7431_v54 = vld [vmem:[%s12049_s5 + $0x398] sm:$0xf0] }
 0x267   : > { %v2361_v36 = vadd.f32 %v2360_v50, %v2332_v49  ;;  %v6047_v50 = vld [vmem:[%s12049_s5 + $0x270] sm:$0xf] }
 0x268   : > { %v9952_v27 = vpop.f32.mrf.mxu0  ;;  %v6048_v51 = vor.u32 %v7395_v41, %v6047_v50 }
 0x269   : > { %v2390_v52 = vadd.f32 %v2389_v24, %v2361_v36  ;;  %v7409_v24 = vld [vmem:[%s12049_s5 + $0x2ec] sm:$0xf] }
 0x26a   : > { %v2418_v59 = vpop.f32.mrf.mxu2  ;;  %3378 = vmatpush.bf16.msrb.mxu0 %v6048_v51  ;;  %v6191_v51 = vld [vmem:[%s12049_s5 + $0x390] sm:$0xf] }
 0x26b   : > { %5935 = vmatpush.msk.msra.mxu3 %vm2602_vm5, %v2390_v52  ;;  %v7406_v52 = vld [vmem:[%s12049_s5 + $0x2d4] sm:$0xf] }
 0x26d   : > { %2674 = vmatpush.msra.mxu3 %v2387_v55  ;;  %v9955_v18 = vpop.f32.mrf.mxu3  ;;  %v6112_v55 = vor.u32 %v7409_v24, %v6109_v8  ;;  %v6192_v24 = vor.u32 %v7431_v54, %v6191_v51  ;;  %v7460_v51 = vld [vmem:[%s12049_s5 + $0x484] sm:$0xf]  ;;  %v6313_v54 = vld [vmem:[%s12049_s5 + $0x48c] sm:$0xf0] }
 0x26e   : > { %3427 = vmatpush.bf16.msra.mxu0 %v6136_v33 }
 0x26f   : > { %2675 = vmatpush.msra.mxu3 %v2384_v43  ;;  %v6097_v43 = vld [vmem:[%s12049_s5 + $0x2dc] sm:$0xf0] }
 0x270   : > { %v9957_v13 = vpop.f32.mrf.mxu0  ;;  %v6100_v16 = vor.u32 %v7406_v52, %v6097_v43 }
 0x271   : > { %2676 = vmatpush.msra.mxu3 %v2381_v62  ;;  %v2439_v62 = vadd.f32 %v9955_v18, %v9948_v22  ;;  %v7440_v18 = vld [vmem:[%s12049_s5 + $0x3e0] sm:$0xf0] }
 0x272   : > { %5936 = vmatmul.msk.f32.vlgmr.msra.gmra.mxu3 %vm2595_vm6, %v9928_v32  ;;  %v9967_v35 = vpop.f32.mrf.mxu1  ;;  %3428 = vmatpush.bf16.msra.mxu0 %v6124_v15 }
 0x273   : > { %v2468_v19 = vadd.f32 %v9952_v27, %v2439_v62  ;;  %v6203_v27 = vld [vmem:[%s12049_s5 + $0x3a8] sm:$0xf] }
 0x274   : > { %v6204_v26 = vor.u32 %v7434_v23, %v6203_v27  ;;  %v6143_v27 = vld [vmem:[%s12049_s5 + $0x330] sm:$0xf]  ;;  %v7419_v23 = vld [vmem:[%s12049_s5 + $0x338] sm:$0xf0] }
 0x275   : > { %v2441_v17 = vpop.f32.mrf.mxu3 }
 0x276   : > { %v2442_v5 = vadd.f32 %v2441_v17, %v9950_v38  ;;  %3429 = vmatpush.bf16.msra.mxu0 %v6112_v55  ;;  %v6085_v38 = vld [vmem:[%s12049_s5 + $0x2c4] sm:$0xf0]  ;;  %v6227_v17 = vld [vmem:[%s12049_s5 + $0x3d8] sm:$0xf] }
 0x277   : > { %v6179_v55 = vld [vmem:[%s12049_s5 + $0x378] sm:$0xf] }
 0x278   : > { %v2471_v22 = vadd.f32 %v9957_v13, %v2442_v5 }
 0x279   : > { %v2473_v46 = vpop.f32.mrf.mxu0 }
 0x27a   : > { %5937 = vmatmul.msk.f32.gmra.mxu3 %vm2595_vm6, %v9939_v34  ;;  %v9991_v7 = vpop.f32.mrf.mxu2  ;;  %3430 = vmatpush.bf16.msra.mxu0 %v6100_v16  ;;  %v7438_v16 = vld [vmem:[%s12049_s5 + $0x3d0] sm:$0xf0] }
 0x27b   : > { %v9983_v47 = vpop.f32.mrf.mxu1 }
 0x27c   : > { %v2500_v14 = vadd.f32 %v9983_v47, %v2471_v22  ;;  %v7397_v47 = vld [vmem:[%s12049_s5 + $0x28c] sm:$0xf]  ;;  %v6211_v22 = vld [vmem:[%s12049_s5 + $0x3b0] sm:$0xf] }
 0x27d   : > { %v2444_v20 = vpop.f32.mrf.mxu3 }
 0x27e   : > { %v2445_v21 = vadd.f32 %v2444_v20, %v2415_v37 }
 0x280   : > { %v2474_v37 = vadd.f32 %v2473_v46, %v2445_v21  ;;  %v6228_v46 = vor.u32 %v7440_v18, %v6227_v17  ;;  %v6049_v21 = vld [vmem:[%s12049_s5 + $0x27c] sm:$0xf0]  ;;  %v7435_v18 = vld [vmem:[%s12049_s5 + $0x3b8] sm:$0xf0] }
 0x281   : > { %v2476_v1 = vpop.f32.mrf.mxu0 }
 0x282   : > { %3385 = vmatpush.bf16.msrb.mxu2 %v6228_v46 }
 0x283   : > { %v2502_v11 = vpop.f32.mrf.mxu1  ;;  %v10013_v40 = vpop.f32.mrf.mxu2 }
 0x284   : > { %v2503_v20 = vadd.f32 %v2502_v11, %v2474_v37 }
 0x285   : > { %v2447_v6 = vpop.f32.mrf.mxu3 }
 0x286   : > { %v2448_v36 = vadd.f32 %v2447_v6, %v2418_v59  ;;  %v7403_v59 = vld [vmem:[%s12049_s5 + $0x2bc] sm:$0xf]  ;;  %v2497_v6 = vadd.f32 %v9967_v35, %v2468_v19  ;;  %3386 = vmatpush.bf16.msrb.mxu2 %v6216_v2  ;;  %v2529_v35 = vadd.f32 %v10013_v40, %v2500_v14  ;;  %v6064_v40 = vor.u32 %v7397_v47, %v6061_v58  ;;  %v6155_v19 = vld [vmem:[%s12049_s5 + $0x348] sm:$0xf]  ;;  %v7458_v14 = vld [vmem:[%s12049_s5 + $0x470] sm:$0xf0] }
 0x287   : > { %v6299_v2 = vld [vmem:[%s12049_s5 + $0x468] sm:$0xf]  ;;  %v6144_v47 = vor.u32 %v7419_v23, %v6143_v27  ;;  %v7374_v27 = vld [vmem:[%s12049_s5 + $0x1d0] sm:$0xf0] }
 0x288   : > { %v2477_v57 = vadd.f32 %v2476_v1, %v2448_v36  ;;  %v6088_v1 = vor.u32 %v7403_v59, %v6085_v38  ;;  %v2526_v10 = vadd.f32 %v9991_v7, %v2497_v6  ;;  %v6235_v7 = vld [vmem:[%s12049_s5 + $0x3e0] sm:$0xf]  ;;  %v7464_v59 = vld [vmem:[%s12049_s5 + $0x4a0] sm:$0xf0]  ;;  %v6300_v6 = vor.u32 %v7458_v14, %v6299_v2  ;;  %v6265_v2 = vld [vmem:[%s12049_s5 + $0x42c] sm:$0xf0] }
 0x289   : > { %v10005_v45 = vpop.f32.mrf.mxu0  ;;  %v6590_v14 = vld [vmem:[%s12049_s5 + $0x1c8] sm:$0xf] }
 0x28a   : > { %3431 = vmatpush.bf16.msra.mxu0 %v6088_v1  ;;  %3387 = vmatpush.bf16.msrb.mxu2 %v6204_v26  ;;  %v6212_v1 = vor.u32 %v7435_v18, %v6211_v22  ;;  %v6287_v26 = vld [vmem:[%s12049_s5 + $0x450] sm:$0xf]  ;;  %v6602_v22 = vld [vmem:[%s12049_s5 + $0x1e0] sm:$0xf]  ;;  %v7377_v18 = vld [vmem:[%s12049_s5 + $0x1e8] sm:$0xf0] }
 0x28b   : > { %v2505_v63 = vpop.f32.mrf.mxu1  ;;  %v2531_v56 = vpop.f32.mrf.mxu2 }
 0x28c   : > { %v2506_v61 = vadd.f32 %v2505_v63, %v2477_v57  ;;  %v2532_v30 = vadd.f32 %v2531_v56, %v2503_v20  ;;  %v7394_v56 = vld [vmem:[%s12049_s5 + $0x274] sm:$0xf] }
 0x28d   : > { %v6052_v62 = vor.u32 %v7394_v56, %v6049_v21  ;;  %v7422_v20 = vld [vmem:[%s12049_s5 + $0x350] sm:$0xf0]  ;;  %v7457_v56 = vld [vmem:[%s12049_s5 + $0x46c] sm:$0xf]  ;;  %v6301_v21 = vld [vmem:[%s12049_s5 + $0x474] sm:$0xf0] }
 0x28e   : > { %3432 = vmatpush.bf16.msra.mxu0 %v6076_v44  ;;  %3388 = vmatpush.bf16.msrb.mxu2 %v6192_v24  ;;  %v6156_v4 = vor.u32 %v7422_v20, %v6155_v19  ;;  %v6187_v44 = vld [vmem:[%s12049_s5 + $0x380] sm:$0xf]  ;;  %v6163_v24 = vld [vmem:[%s12049_s5 + $0x350] sm:$0xf]  ;;  %v6277_v19 = vld [vmem:[%s12049_s5 + $0x444] sm:$0xf0] }
 0x291   : > { %v10035_v3 = vpop.f32.mrf.mxu0 }
 0x292   : > { %3433 = vmatpush.bf16.msra.mxu0 %v6064_v40 }
 0x293   : > { %v2534_v13 = vpop.f32.mrf.mxu2 }
 0x294   : > { %v2535_v60 = vadd.f32 %v2534_v13, %v2506_v61  ;;  %v6199_v13 = vld [vmem:[%s12049_s5 + $0x398] sm:$0xf] }
 0x295   : > { %v10015_v42 = vpop.f32.mrf.mxu3 }
 0x296   : > { %v2555_v8 = vadd.f32 %v10015_v42, %v2526_v10  ;;  %v7428_v42 = vld [vmem:[%s12049_s5 + $0x380] sm:$0xf0]  ;;  %3434 = vmatpush.bf16.msra.mxu0 %v6052_v62  ;;  %v7426_v10 = vld [vmem:[%s12049_s5 + $0x370] sm:$0xf0] }
 0x297   : > { %v7420_v62 = vld [vmem:[%s12049_s5 + $0x340] sm:$0xf0] }
 0x298   : > { %v2584_v57 = vadd.f32 %v10005_v45, %v2555_v8  ;;  %v7425_v45 = vld [vmem:[%s12049_s5 + $0x368] sm:$0xf0]  ;;  %v7423_v8 = vld [vmem:[%s12049_s5 + $0x358] sm:$0xf0] }
 0x299   : > { %v2589_v48 = vpop.f32.mrf.mxu0 }
 0x29d   : > { %v2557_v49 = vpop.f32.mrf.mxu3 }
 0x29e   : > { %v2558_v63 = vadd.f32 %v2557_v49, %v2529_v35  ;;  %v7441_v49 = vld [vmem:[%s12049_s5 + $0x3e8] sm:$0xf0] }
 0x29f   : > { %v6236_v37 = vor.u32 %v7441_v49, %v6235_v7  ;;  %v6304_v7 = vor.u32 %v7457_v56, %v6301_v21  ;;  %v7454_v49 = vld [vmem:[%s12049_s5 + $0x454] sm:$0xf]  ;;  %v7391_v56 = vld [vmem:[%s12049_s5 + $0x25c] sm:$0xf]  ;;  %v6664_v21 = vld [vmem:[%s12049_s5 + $0x264] sm:$0xf0] }
 0x2a0   : > { %v2632_v29 = vpop.f32.mrf.mxu1  ;;  %v2587_v43 = vadd.f32 %v10035_v3, %v2558_v63  ;;  %v6323_v3 = vld [vmem:[%s12049_s5 + $0x498] sm:$0xf] }
 0x2a1   : > { %v2592_v53 = vpop.f32.mrf.mxu0  ;;  %v6324_v38 = vor.u32 %v7464_v59, %v6323_v3  ;;  %v6626_v3 = vld [vmem:[%s12049_s5 + $0x210] sm:$0xf]  ;;  %v6614_v59 = vld [vmem:[%s12049_s5 + $0x1f8] sm:$0xf] }
 0x2a3   : > { %3399 = vmatpush.bf16.msrb.mxu3 %v6324_v38  ;;  %v7380_v38 = vld [vmem:[%s12049_s5 + $0x200] sm:$0xf0] }
 0x2a5   : > { %v2560_v0 = vpop.f32.mrf.mxu3 }
 0x2a6   : > { %v2561_v50 = vadd.f32 %v2560_v0, %v2532_v30  ;;  %v6167_v0 = vld [vmem:[%s12049_s5 + $0x360] sm:$0xf]  ;;  %v7463_v30 = vld [vmem:[%s12049_s5 + $0x49c] sm:$0xf] }
 0x2a7   : > { %v6168_v46 = vor.u32 %v7425_v45, %v6167_v0  ;;  %v7383_v0 = vld [vmem:[%s12049_s5 + $0x218] sm:$0xf0] }
 0x2a8   : > { %v2635_v28 = vpop.f32.mrf.mxu1  ;;  %v2590_v52 = vadd.f32 %v2589_v48, %v2561_v50  ;;  %v6180_v48 = vor.u32 %v7428_v42, %v6179_v55  ;;  %v6289_v55 = vld [vmem:[%s12049_s5 + $0x45c] sm:$0xf0]  ;;  %v6164_v42 = vor.u32 %v7423_v8, %v6163_v24  ;;  %v6627_v45 = vor.u32 %v7383_v0, %v6626_v3  ;;  %v6347_v24 = vld [vmem:[%s12049_s5 + $0x4c8] sm:$0xf]  ;;  %v7470_v8 = vld [vmem:[%s12049_s5 + $0x4d0] sm:$0xf0] }
 0x2a9   : > { %v10086_v31 = vpack.c.bf16 %v2635_v28, %v2632_v29  ;;  %v6223_v29 = vld [vmem:[%s12049_s5 + $0x3c8] sm:$0xf]  ;;  %v6200_v28 = vor.u32 %v7432_v9, %v6199_v13  ;;  %v7448_v13 = vld [vmem:[%s12049_s5 + $0x424] sm:$0xf]  ;;  %v6603_v9 = vor.u32 %v7377_v18, %v6602_v22  ;;  %v7467_v3 = vld [vmem:[%s12049_s5 + $0x4b8] sm:$0xf0] }
 0x2aa   : > { %v6224_v17 = vor.u32 %v7438_v16, %v6223_v29  ;;  %3389 = vmatpush.bf16.msrb.mxu2 %v6180_v48  ;;  %v6292_v29 = vor.u32 %v7454_v49, %v6289_v55  ;;  %v6268_v23 = vor.u32 %v7448_v13, %v6265_v2  ;;  %v6667_v49 = vor.u32 %v7391_v56, %v6664_v21  ;;  %v7466_v0 = vld [vmem:[%s12049_s5 + $0x4b4] sm:$0xf]  ;;  %v7468_v22 = vld [vmem:[%s12049_s5 + $0x4c0] sm:$0xf0]  ;;  %v7439_v18 = vld [vmem:[%s12049_s5 + $0x3dc] sm:$0xf] }
 0x2ab   : > { %v2921_v39 = vshrl.u32 %v10086_v31, 16  ;;  %v2923_v33 = vshll.u32 %v10086_v31, 16  ;;  %v6348_v55 = vor.u32 %v7470_v8, %v6347_v24  ;;  %v6205_v13 = vld [vmem:[%s12049_s5 + $0x3b4] sm:$0xf0]  ;;  %v6454_v2 = vld [vmem:[%s12049_s5 + $0xb0] sm:$0xf] }
 0x2ac   : > { %v6418_v56 = vld [vmem:[%s12049_s5 + $0x68] sm:$0xf]  ;;  %v7330_v21 = vld [vmem:[%s12049_s5 + $0x70] sm:$0xf0]  ;;  %v6115_v8 = vld [vmem:[%s12049_s5 + $0x2f0] sm:$0xf] }
 0x2ad   : > { %v2563_v11 = vpop.f32.mrf.mxu3  ;;  %v2925_v36 = vrot.slane %v2923_v33, 1  ;;  %v6175_v33 = vld [vmem:[%s12049_s5 + $0x368] sm:$0xf] }
 0x2ae   : > { %v2564_v41 = vadd.f32 %v2563_v11, %v2535_v60  ;;  %3390 = vmatpush.bf16.msrb.mxu2 %v6168_v46  ;;  %v6325_v60 = vld [vmem:[%s12049_s5 + $0x4a4] sm:$0xf0]  ;;  %v7429_v11 = vld [vmem:[%s12049_s5 + $0x388] sm:$0xf0]  ;;  %v6275_v46 = vld [vmem:[%s12049_s5 + $0x438] sm:$0xf] }
 0x2af   : > { %v10118_v5 = vor.u32 %v2925_v36, %v2921_v39  ;;  %v6328_v35 = vor.u32 %v7463_v30, %v6325_v60  ;;  %v6176_v36 = vor.u32 %v7426_v10, %v6175_v33  ;;  %v6578_v30 = vld [vmem:[%s12049_s5 + $0x1b0] sm:$0xf]  ;;  %v7371_v60 = vld [vmem:[%s12049_s5 + $0x1b8] sm:$0xf0]  ;;  %v6241_v33 = vld [vmem:[%s12049_s5 + $0x3fc] sm:$0xf0] }
 0x2b0   : > { %v2593_v15 = vadd.f32 %v2592_v53, %v2564_v41  ;;  %v6188_v53 = vor.u32 %v7429_v11, %v6187_v44  ;;  %v7446_v44 = vld [vmem:[%s12049_s5 + $0x410] sm:$0xf0]  ;;  %v7445_v11 = vld [vmem:[%s12049_s5 + $0x40c] sm:$0xf] }
 0x2b1   : > { %3379 = vmatmul.bf16.vlgmr.msrb.gmra.mxu0 %v10118_v5 }
 0x2b2   : > { %5938 = vmatpush.msk.msrb.mxu1 %vm2602_vm5, %v2593_v15  ;;  %3497 = vmatpush.bf16.msrb.mxu0 %v6236_v37  ;;  %v6316_v15 = vor.u32 %v7460_v51, %v6313_v54  ;;  %v6638_v37 = vld [vmem:[%s12049_s5 + $0x228] sm:$0xf]  ;;  %v7442_v51 = vld [vmem:[%s12049_s5 + $0x3f4] sm:$0xf]  ;;  %v6566_v54 = vld [vmem:[%s12049_s5 + $0x198] sm:$0xf] }
 0x2b3   : > { %v2655_v25 = vpop.f32.mrf.mxu2  ;;  %3391 = vmatpush.bf16.msrb.mxu2 %v6156_v4  ;;  %v6244_v10 = vor.u32 %v7442_v51, %v6241_v33  ;;  %v7333_v51 = vld [vmem:[%s12049_s5 + $0x88] sm:$0xf0] }
 0x2b4   : > { %2697 = vmatpush.msrb.mxu1 %v2590_v52 }
 0x2b6   : > { %2698 = vmatpush.msrb.mxu1 %v2587_v43  ;;  %3498 = vmatpush.bf16.msrb.mxu0 %v6224_v17  ;;  %v6151_v43 = vld [vmem:[%s12049_s5 + $0x338] sm:$0xf]  ;;  %v6615_v17 = vor.u32 %v7380_v38, %v6614_v59 }
 0x2b7   : > { %3392 = vmatpush.bf16.msrb.mxu2 %v6144_v47  ;;  %v6152_v16 = vor.u32 %v7420_v62, %v6151_v43  ;;  %v6355_v43 = vld [vmem:[%s12049_s5 + $0x4d0] sm:$0xf]  ;;  %v7471_v62 = vld [vmem:[%s12049_s5 + $0x4d8] sm:$0xf0] }
 0x2b8   : > { %2699 = vmatpush.msrb.mxu1 %v2584_v57  ;;  %v7386_v57 = vld [vmem:[%s12049_s5 + $0x230] sm:$0xf0] }
 0x2b9   : > { %5939 = vmatmul.msk.f32.vlgmr.msrb.gmra.mxu1 %vm2595_vm6, %v9928_v32  ;;  %v7461_v32 = vld [vmem:[%s12049_s5 + $0x488] sm:$0xf0]  ;;  %v6639_v48 = vor.u32 %v7386_v57, %v6638_v37  ;;  %v7388_v37 = vld [vmem:[%s12049_s5 + $0x244] sm:$0xf]  ;;  %v6652_v57 = vld [vmem:[%s12049_s5 + $0x24c] sm:$0xf0] }
 0x2ba   : > { %v6312_v61 = vor.u32 %v7461_v32, %v6311_v12  ;;  %3499 = vmatpush.bf16.msrb.mxu0 %v6212_v1  ;;  %v7451_v12 = vld [vmem:[%s12049_s5 + $0x43c] sm:$0xf]  ;;  %v7449_v1 = vld [vmem:[%s12049_s5 + $0x428] sm:$0xf0]  ;;  %3419 = vmatpush.bf16.msra.mxu1 %v6348_v55  ;;  %v7332_v55 = vld [vmem:[%s12049_s5 + $0x80] sm:$0xf0] }
 0x2bb   : > { %v2658_v58 = vpop.f32.mrf.mxu2  ;;  %3455 = vmatpush.bf16.msra.mxu2 %v6328_v35  ;;  %v6280_v20 = vor.u32 %v7451_v12, %v6277_v19  ;;  %v6239_v35 = vld [vmem:[%s12049_s5 + $0x3f0] sm:$0xf]  ;;  %v6229_v12 = vld [vmem:[%s12049_s5 + $0x3e4] sm:$0xf0]  ;;  %v7436_v19 = vld [vmem:[%s12049_s5 + $0x3c4] sm:$0xf] }
 0x2bc   : > { %3400 = vmatpush.bf16.msrb.mxu3 %v6312_v61  ;;  %v10205_v50 = vpack.c.bf16 %v2658_v58, %v2655_v25  ;;  %v7452_v25 = vld [vmem:[%s12049_s5 + $0x440] sm:$0xf0]  ;;  %v6263_v61 = vld [vmem:[%s12049_s5 + $0x420] sm:$0xf]  ;;  %v6253_v58 = vld [vmem:[%s12049_s5 + $0x414] sm:$0xf0] }
 0x2bd   : > { %v6276_v32 = vor.u32 %v7452_v25, %v6275_v46  ;;  %v6264_v4 = vor.u32 %v7449_v1, %v6263_v61  ;;  %v6655_v46 = vor.u32 %v7388_v37, %v6652_v57  ;;  %v7433_v1 = vld [vmem:[%s12049_s5 + $0x3ac] sm:$0xf] }
 0x2be   : > { %3500 = vmatpush.bf16.msrb.mxu0 %v6200_v28  ;;  %v2930_v39 = vshll.u32 %v10205_v50, 16  ;;  %v2928_v63 = vshrl.u32 %v10205_v50, 16  ;;  %v6251_v28 = vld [vmem:[%s12049_s5 + $0x408] sm:$0xf] }
 0x2bf   : > { %3456 = vmatpush.bf16.msra.mxu2 %v6316_v15  ;;  %v6252_v47 = vor.u32 %v7446_v44, %v6251_v28  ;;  %v6554_v15 = vld [vmem:[%s12049_s5 + $0x180] sm:$0xf]  ;;  %v7417_v44 = vld [vmem:[%s12049_s5 + $0x328] sm:$0xf0] }
 0x2c0   : > { %3401 = vmatpush.bf16.msrb.mxu3 %v6300_v6  ;;  %v2932_v40 = vrot.slane %v2930_v39, 1  ;;  %v6591_v6 = vor.u32 %v7374_v27, %v6590_v14  ;;  %v7339_v14 = vld [vmem:[%s12049_s5 + $0xb8] sm:$0xf0]  ;;  %v6139_v28 = vld [vmem:[%s12049_s5 + $0x320] sm:$0xf] }
 0x2c1   : > { %5940 = vmatmul.msk.f32.gmra.mxu1 %vm2595_vm6, %v9939_v34  ;;  %v7455_v34 = vld [vmem:[%s12049_s5 + $0x458] sm:$0xf0]  ;;  %3435 = vmatmul.bf16.vlgmr.msra.gmra.mxu0 %v10118_v5 }
 0x2c2   : > { %v6288_v41 = vor.u32 %v7455_v34, %v6287_v26  ;;  %3501 = vmatpush.bf16.msrb.mxu0 %v6188_v53  ;;  %v10234_v52 = vor.u32 %v2932_v40, %v2928_v63  ;;  %v6579_v26 = vor.u32 %v7371_v60, %v6578_v30  ;;  %v6256_v34 = vor.u32 %v7445_v11, %v6253_v58  ;;  %v7368_v53 = vld [vmem:[%s12049_s5 + $0x1a0] sm:$0xf0]  ;;  %v7365_v40 = vld [vmem:[%s12049_s5 + $0x188] sm:$0xf0]  ;;  %v6442_v30 = vld [vmem:[%s12049_s5 + $0x98] sm:$0xf] }
 0x2c3   : > { %3457 = vmatpush.bf16.msra.mxu2 %v6304_v7  ;;  %v6567_v63 = vor.u32 %v7368_v53, %v6566_v54  ;;  %v7469_v7 = vld [vmem:[%s12049_s5 + $0x4cc] sm:$0xf]  ;;  %v7336_v60 = vld [vmem:[%s12049_s5 + $0xa0] sm:$0xf0]  ;;  %v6446_v58 = vld [vmem:[%s12049_s5 + $0xa8] sm:$0xf]  ;;  %v6140_v54 = vor.u32 %v7417_v44, %v6139_v28 }
 0x2c4   : > { %3402 = vmatpush.bf16.msrb.mxu3 %v6288_v41  ;;  %3393 = vmatmul.bf16.vlgmr.msrb.gmra.mxu2 %v10234_v52  ;;  %v7443_v41 = vld [vmem:[%s12049_s5 + $0x3f8] sm:$0xf0]  ;;  %v7402_v44 = vld [vmem:[%s12049_s5 + $0x2b0] sm:$0xf0] }
 0x2c5   : > { %v6240_v39 = vor.u32 %v7443_v41, %v6239_v35  ;;  %v6430_v41 = vld [vmem:[%s12049_s5 + $0x80] sm:$0xf] }
 0x2c6   : > { %3502 = vmatpush.bf16.msrb.mxu0 %v6176_v36  ;;  %v6555_v36 = vor.u32 %v7365_v40, %v6554_v15  ;;  %v7335_v15 = vld [vmem:[%s12049_s5 + $0x98] sm:$0xf0]  ;;  %v6431_v40 = vor.u32 %v7333_v51, %v6430_v41  ;;  %v7421_v51 = vld [vmem:[%s12049_s5 + $0x34c] sm:$0xf] }
 0x2c7   : > { %3458 = vmatpush.bf16.msra.mxu2 %v6292_v29 }
 0x2c8   : > { %3403 = vmatpush.bf16.msrb.mxu3 %v6276_v32  ;;  %v6232_v32 = vor.u32 %v7439_v18, %v6229_v12  ;;  %v6394_v18 = vld [vmem:[%s12049_s5 + $0x38] sm:$0xf]  ;;  %v6181_v12 = vld [vmem:[%s12049_s5 + $0x384] sm:$0xf0] }
 0x2ca   : > { %3503 = vmatpush.bf16.msrb.mxu0 %v6164_v42  ;;  %v6349_v42 = vld [vmem:[%s12049_s5 + $0x4d4] sm:$0xf0] }
 0x2cb   : > { %3459 = vmatpush.bf16.msra.mxu2 %v6280_v20  ;;  %v6352_v29 = vor.u32 %v7469_v7, %v6349_v42  ;;  %v6217_v20 = vld [vmem:[%s12049_s5 + $0x3cc] sm:$0xf0]  ;;  %v7411_v7 = vld [vmem:[%s12049_s5 + $0x2f8] sm:$0xf0]  ;;  %v6419_v42 = vor.u32 %v7330_v21, %v6418_v56  ;;  %v7418_v21 = vld [vmem:[%s12049_s5 + $0x334] sm:$0xf] }
 0x2cc   : > { %3404 = vmatpush.bf16.msrb.mxu3 %v6264_v4  ;;  %v6220_v61 = vor.u32 %v7436_v19, %v6217_v20  ;;  %v6116_v37 = vor.u32 %v7411_v7, %v6115_v8  ;;  %v7396_v7 = vld [vmem:[%s12049_s5 + $0x280] sm:$0xf0] }
 0x2ce   : > { %3504 = vmatpush.bf16.msrb.mxu0 %v6152_v16  ;;  %v6356_v16 = vor.u32 %v7471_v62, %v6355_v43  ;;  %v6406_v43 = vld [vmem:[%s12049_s5 + $0x50] sm:$0xf]  ;;  %v7327_v62 = vld [vmem:[%s12049_s5 + $0x58] sm:$0xf0] }
 0x2cf   : > { %3460 = vmatpush.bf16.msra.mxu2 %v6268_v23  ;;  %v6455_v23 = vor.u32 %v7339_v14, %v6454_v2 }
 0x2d0   : > { %3405 = vmatpush.bf16.msrb.mxu3 %v6252_v47 }
 0x2d1   : > { %3505 = vmatmul.bf16.vlgmr.msrb.gmra.mxu0 %v10234_v52 }
 0x2d2   : > { %3985 = vmatpush.bf16.msra.mxu0 %v6639_v48  ;;  %v6335_v48 = vld [vmem:[%s12049_s5 + $0x4b0] sm:$0xf] }
 0x2d3   : > { %3461 = vmatpush.bf16.msra.mxu2 %v6256_v34  ;;  %v6336_v59 = vor.u32 %v7467_v3, %v6335_v48  ;;  %v6443_v34 = vor.u32 %v7336_v60, %v6442_v30  ;;  %v6193_v48 = vld [vmem:[%s12049_s5 + $0x39c] sm:$0xf0]  ;;  %v6103_v3 = vld [vmem:[%s12049_s5 + $0x2d8] sm:$0xf]  ;;  %v6169_v30 = vld [vmem:[%s12049_s5 + $0x36c] sm:$0xf0] }
 0x2d4   : > { %3406 = vmatpush.bf16.msrb.mxu3 %v6240_v39  ;;  %v6127_v39 = vld [vmem:[%s12049_s5 + $0x308] sm:$0xf] }
 0x2d5   : > { %3420 = vmatpush.bf16.msra.mxu1 %v6336_v59  ;;  %v6410_v59 = vld [vmem:[%s12049_s5 + $0x60] sm:$0xf]  ;;  %v6079_v60 = vld [vmem:[%s12049_s5 + $0x2a8] sm:$0xf] }
 0x2d6   : > { %3986 = vmatpush.bf16.msra.mxu0 %v6627_v45  ;;  %v6337_v45 = vld [vmem:[%s12049_s5 + $0x4bc] sm:$0xf0] }
 0x2d7   : > { %3462 = vmatpush.bf16.msra.mxu2 %v6244_v10  ;;  %v6340_v38 = vor.u32 %v7466_v0, %v6337_v45  ;;  %v7414_v10 = vld [vmem:[%s12049_s5 + $0x310] sm:$0xf0]  ;;  %v7408_v45 = vld [vmem:[%s12049_s5 + $0x2e0] sm:$0xf0] }
 0x2d8   : > { %3475 = vmatpush.bf16.msra.mxu3 %v6352_v29  ;;  %v6407_v29 = vor.u32 %v7327_v62, %v6406_v43 }
 0x2d9   : > { %3441 = vmatpush.bf16.msrb.mxu1 %v6232_v32  ;;  %v6091_v32 = vld [vmem:[%s12049_s5 + $0x2c0] sm:$0xf] }
 0x2da   : > { %3987 = vmatpush.bf16.msra.mxu0 %v6615_v17  ;;  %v6343_v17 = vld [vmem:[%s12049_s5 + $0x4b8] sm:$0xf] }
 0x2db   : > { %3531 = vmatpush.bf16.msrb.mxu2 %v6356_v16  ;;  %v6344_v25 = vor.u32 %v7468_v22, %v6343_v17  ;;  %v7430_v16 = vld [vmem:[%s12049_s5 + $0x394] sm:$0xf]  ;;  %v6104_v17 = vor.u32 %v7408_v45, %v6103_v3  ;;  %v6949_v3 = vld [vmem:[%s12049_s5 + $0x630] sm:$0xf]  ;;  %v6331_v45 = vld [vmem:[%s12049_s5 + $0x4a0] sm:$0xf] }
 0x2dc   : > { %3476 = vmatpush.bf16.msra.mxu3 %v6340_v38  ;;  %v6196_v0 = vor.u32 %v7430_v16, %v6193_v48  ;;  %v7329_v38 = vld [vmem:[%s12049_s5 + $0x68] sm:$0xf0] }
 0x2dd   : > { %3442 = vmatpush.bf16.msrb.mxu1 %v6220_v61  ;;  %v6411_v22 = vor.u32 %v7329_v38, %v6410_v59  ;;  %v7405_v61 = vld [vmem:[%s12049_s5 + $0x2c8] sm:$0xf0] }
 0x2de   : > { %3988 = vmatpush.bf16.msra.mxu0 %v6603_v9  ;;  %v6208_v9 = vor.u32 %v7433_v1, %v6205_v13  ;;  %v6398_v1 = vld [vmem:[%s12049_s5 + $0x48] sm:$0xf]  ;;  %v7326_v13 = vld [vmem:[%s12049_s5 + $0x50] sm:$0xf0]  ;;  %v6092_v2 = vor.u32 %v7405_v61, %v6091_v32  ;;  %v7465_v38 = vld [vmem:[%s12049_s5 + $0x4a8] sm:$0xf0] }
 0x2df   : > { %3532 = vmatpush.bf16.msrb.mxu2 %v6344_v25  ;;  %v7427_v25 = vld [vmem:[%s12049_s5 + $0x37c] sm:$0xf]  ;;  %v6399_v14 = vor.u32 %v7326_v13, %v6398_v1  ;;  %v6332_v61 = vor.u32 %v7465_v38, %v6331_v45  ;;  %v7349_v45 = vld [vmem:[%s12049_s5 + $0x10c] sm:$0xf] }
 0x2e0   : > { %v6184_v20 = vor.u32 %v7427_v25, %v6181_v12  ;;  %v6544_v25 = vld [vmem:[%s12049_s5 + $0x174] sm:$0xf0] }
 0x2e1   : > { %3443 = vmatpush.bf16.msrb.mxu1 %v6208_v9  ;;  %v6382_v9 = vld [vmem:[%s12049_s5 + $0x20] sm:$0xf] }
 0x2e2   : > { %3989 = vmatpush.bf16.msra.mxu0 %v6591_v6 }
 0x2e5   : > { %3444 = vmatpush.bf16.msrb.mxu1 %v6196_v0  ;;  %v7515_v0 = vld [vmem:[%s12049_s5 + $0x638] sm:$0xf0] }
 0x2e6   : > { %3990 = vmatpush.bf16.msra.mxu0 %v6579_v26  ;;  %v7338_v26 = vld [vmem:[%s12049_s5 + $0xb0] sm:$0xf0] }
 0x2e7   : > { %v6447_v53 = vor.u32 %v7338_v26, %v6446_v58  ;;  %v6080_v58 = vor.u32 %v7402_v44, %v6079_v60  ;;  %v6532_v60 = vld [vmem:[%s12049_s5 + $0x15c] sm:$0xf0]  ;;  %v7509_v44 = vld [vmem:[%s12049_s5 + $0x608] sm:$0xf0] }
 0x2e9   : > { %3445 = vmatpush.bf16.msrb.mxu1 %v6184_v20  ;;  %v7512_v20 = vld [vmem:[%s12049_s5 + $0x620] sm:$0xf0] }
 0x2ea   : > { %3991 = vmatpush.bf16.msra.mxu0 %v6567_v63  ;;  %v6434_v63 = vld [vmem:[%s12049_s5 + $0x90] sm:$0xf] }
 0x2eb   : > { %v6435_v24 = vor.u32 %v7335_v15, %v6434_v63  ;;  %v6374_v63 = vld [vmem:[%s12049_s5 + $0x18] sm:$0xf] }
 0x2ee   : > { %3992 = vmatpush.bf16.msra.mxu0 %v6555_v36  ;;  %v6128_v36 = vor.u32 %v7414_v10, %v6127_v39  ;;  %v6067_v39 = vld [vmem:[%s12049_s5 + $0x290] sm:$0xf]  ;;  %v7399_v10 = vld [vmem:[%s12049_s5 + $0x298] sm:$0xf0] }
 0x2ef   : > { %v6068_v15 = vor.u32 %v7399_v10, %v6067_v39  ;;  %v6913_v10 = vld [vmem:[%s12049_s5 + $0x5e8] sm:$0xf] }
 0x2f2   : > { %4061 = vmatpush.bf16.msrb.mxu0 %v6667_v49  ;;  %v6422_v49 = vld [vmem:[%s12049_s5 + $0x78] sm:$0xf] }
 0x2f3   : > { %v6423_v57 = vor.u32 %v7332_v55, %v6422_v49  ;;  %v6362_v49 = vld [vmem:[%s12049_s5] sm:$0xf]  ;;  %v7317_v55 = vld [vmem:[%s12049_s5 + $0x8] sm:$0xf0] }
 0x2f4   : > { %v6363_v43 = vor.u32 %v7317_v55, %v6362_v49 }
 0x2f5   : > { %v2678_v4 = vpop.f32.mrf.mxu3 }
 0x2f6   : > { %4062 = vmatpush.bf16.msrb.mxu0 %v6655_v46  ;;  %v7324_v46 = vld [vmem:[%s12049_s5 + $0x40] sm:$0xf0] }
 0x2f7   : > { %v6395_v19 = vor.u32 %v7324_v46, %v6394_v18  ;;  %v7362_v18 = vld [vmem:[%s12049_s5 + $0x170] sm:$0xf0]  ;;  %v7361_v46 = vld [vmem:[%s12049_s5 + $0x16c] sm:$0xf] }
 0x2fd   : > { %v2681_v27 = vpop.f32.mrf.mxu3 }
 0x2fe   : > { %v10418_v6 = vpack.c.bf16 %v2681_v27, %v2678_v4  ;;  %v7321_v4 = vld [vmem:[%s12049_s5 + $0x28] sm:$0xf0] }
 0x2ff   : > { %v6383_v27 = vor.u32 %v7321_v4, %v6382_v9  ;;  %v6547_v9 = vor.u32 %v7361_v46, %v6544_v25  ;;  %v6319_v4 = vld [vmem:[%s12049_s5 + $0x488] sm:$0xf]  ;;  %v7450_v25 = vld [vmem:[%s12049_s5 + $0x430] sm:$0xf0] }
 0x300   : > { %3993 = vmatmul.bf16.vlgmr.msra.gmra.mxu0 %v10418_v6  ;;  %v2935_v11 = vshrl.u32 %v10418_v6, 16  ;;  %v2937_v47 = vshll.u32 %v10418_v6, 16  ;;  %v6271_v46 = vld [vmem:[%s12049_s5 + $0x428] sm:$0xf] }
 0x301   : > { %4069 = vmatpush.bf16.msra.mxu0 %v6455_v23  ;;  %v7424_v23 = vld [vmem:[%s12049_s5 + $0x364] sm:$0xf] }
 0x302   : > { %v2939_v35 = vrot.slane %v2937_v47, 1  ;;  %v6172_v28 = vor.u32 %v7424_v23, %v6169_v30  ;;  %v7323_v47 = vld [vmem:[%s12049_s5 + $0x38] sm:$0xf0]  ;;  %v7358_v30 = vld [vmem:[%s12049_s5 + $0x154] sm:$0xf] }
 0x303   : > { %v7359_v23 = vld [vmem:[%s12049_s5 + $0x158] sm:$0xf0] }
 0x304   : > { %v10450_v33 = vor.u32 %v2939_v35, %v2935_v11  ;;  %v6386_v11 = vld [vmem:[%s12049_s5 + $0x30] sm:$0xf]  ;;  %v7318_v35 = vld [vmem:[%s12049_s5 + $0x10] sm:$0xf0]  ;;  %3446 = vmatpush.bf16.msrb.mxu1 %v6172_v28  ;;  %v6925_v28 = vld [vmem:[%s12049_s5 + $0x600] sm:$0xf] }
 0x305   : > { %4070 = vmatpush.bf16.msra.mxu0 %v6443_v34  ;;  %v6387_v26 = vor.u32 %v7323_v47, %v6386_v11  ;;  %v6370_v34 = vld [vmem:[%s12049_s5 + $0x8] sm:$0xf] }
 0x306   : > { %3407 = vmatmul.bf16.vlgmr.msrb.gmra.mxu3 %v10450_v33  ;;  %3463 = vmatmul.bf16.vlgmr.msra.gmra.mxu2 %v10450_v33  ;;  %v6371_v41 = vor.u32 %v7318_v35, %v6370_v34  ;;  %v7459_v34 = vld [vmem:[%s12049_s5 + $0x478] sm:$0xf0]  ;;  %v6518_v35 = vld [vmem:[%s12049_s5 + $0x138] sm:$0xf] }
 0x307   : > { %3483 = vmatpush.bf16.msrb.mxu3 %v6140_v54  ;;  %3957 = vmatpush.bf16.msra.mxu2 %v6447_v53  ;;  %v6157_v54 = vld [vmem:[%s12049_s5 + $0x354] sm:$0xf0] }
 0x308   : > { %v6160_v53 = vor.u32 %v7421_v51, %v6157_v54  ;;  %v7356_v51 = vld [vmem:[%s12049_s5 + $0x140] sm:$0xf0]  ;;  %v7355_v54 = vld [vmem:[%s12049_s5 + $0x13c] sm:$0xf] }
 0x309   : > { %4071 = vmatpush.bf16.msra.mxu0 %v6431_v40  ;;  %v7320_v40 = vld [vmem:[%s12049_s5 + $0x20] sm:$0xf0] }
 0x30a   : > { %3447 = vmatpush.bf16.msrb.mxu1 %v6160_v53  ;;  %v6375_v56 = vor.u32 %v7320_v40, %v6374_v63  ;;  %v6520_v53 = vld [vmem:[%s12049_s5 + $0x144] sm:$0xf0]  ;;  %v7506_v63 = vld [vmem:[%s12049_s5 + $0x5f0] sm:$0xf0] }
 0x30b   : > { %3484 = vmatpush.bf16.msrb.mxu3 %v6128_v36  ;;  %3958 = vmatpush.bf16.msra.mxu2 %v6435_v24  ;;  %v6145_v36 = vld [vmem:[%s12049_s5 + $0x33c] sm:$0xf0]  ;;  %v6055_v24 = vld [vmem:[%s12049_s5 + $0x278] sm:$0xf]  ;;  %v6523_v40 = vor.u32 %v7355_v54, %v6520_v53  ;;  %v6914_v49 = vor.u32 %v7506_v63, %v6913_v10  ;;  %v7341_v53 = vld [vmem:[%s12049_s5 + $0xc8] sm:$0xf0] }
 0x30c   : > { %v6148_v8 = vor.u32 %v7418_v21, %v6145_v36  ;;  %v7456_v21 = vld [vmem:[%s12049_s5 + $0x460] sm:$0xf0]  ;;  %v6506_v36 = vld [vmem:[%s12049_s5 + $0x120] sm:$0xf]  ;;  %v6662_v63 = vld [vmem:[%s12049_s5 + $0x258] sm:$0xf] }
 0x30d   : > { %4072 = vmatpush.bf16.msra.mxu0 %v6419_v42  ;;  %v6056_v42 = vor.u32 %v7396_v7, %v6055_v24  ;;  %v7353_v24 = vld [vmem:[%s12049_s5 + $0x128] sm:$0xf0]  ;;  %v6508_v7 = vld [vmem:[%s12049_s5 + $0x12c] sm:$0xf0]  ;;  %v6458_v54 = vld [vmem:[%s12049_s5 + $0xc0] sm:$0xf] }
 0x30e   : > { %3448 = vmatpush.bf16.msrb.mxu1 %v6148_v8  ;;  %v7352_v8 = vld [vmem:[%s12049_s5 + $0x124] sm:$0xf] }
 0x30f   : > { %3485 = vmatpush.bf16.msrb.mxu3 %v6116_v37  ;;  %3959 = vmatpush.bf16.msra.mxu2 %v6423_v57  ;;  %v6961_v37 = vld [vmem:[%s12049_s5 + $0x648] sm:$0xf]  ;;  %v7518_v57 = vld [vmem:[%s12049_s5 + $0x650] sm:$0xf0]  ;;  %v7340_v10 = vld [vmem:[%s12049_s5 + $0xc4] sm:$0xf] }
 0x310   : > { %v6962_v16 = vor.u32 %v7518_v57, %v6961_v37  ;;  %v6511_v37 = vor.u32 %v7352_v8, %v6508_v7  ;;  %v6283_v57 = vld [vmem:[%s12049_s5 + $0x440] sm:$0xf]  ;;  %v6646_v7 = vld [vmem:[%s12049_s5 + $0x230] sm:$0xf] }
 0x311   : > { %4073 = vmatpush.bf16.msra.mxu0 %v6407_v29 }
 0x313   : > { %3486 = vmatpush.bf16.msrb.mxu3 %v6104_v17  ;;  %3960 = vmatpush.bf16.msra.mxu2 %v6411_v22  ;;  %v6542_v17 = vld [vmem:[%s12049_s5 + $0x168] sm:$0xf]  ;;  %v6950_v22 = vor.u32 %v7515_v0, %v6949_v3  ;;  %v7350_v3 = vld [vmem:[%s12049_s5 + $0x110] sm:$0xf0] }
 0x314   : > { %v6543_v13 = vor.u32 %v7362_v18, %v6542_v17  ;;  %v6889_v17 = vld [vmem:[%s12049_s5 + $0x5b8] sm:$0xf] }
 0x315   : > { %4074 = vmatpush.bf16.msra.mxu0 %v6395_v19  ;;  %v6937_v19 = vld [vmem:[%s12049_s5 + $0x618] sm:$0xf] }
 0x317   : > { %3487 = vmatpush.bf16.msrb.mxu3 %v6092_v2  ;;  %3961 = vmatpush.bf16.msra.mxu2 %v6399_v14  ;;  %v7462_v2 = vld [vmem:[%s12049_s5 + $0x490] sm:$0xf0]  ;;  %v6530_v14 = vld [vmem:[%s12049_s5 + $0x150] sm:$0xf] }
 0x318   : > { %v6320_v11 = vor.u32 %v7462_v2, %v6319_v4  ;;  %v6531_v47 = vor.u32 %v7359_v23, %v6530_v14  ;;  %v7541_v4 = vld [vmem:[%s12049_s5 + $0x70c] sm:$0xf]  ;;  %v6259_v14 = vld [vmem:[%s12049_s5 + $0x410] sm:$0xf] }
 0x319   : > { %4075 = vmatpush.bf16.msra.mxu0 %v6383_v27  ;;  %v6938_v27 = vor.u32 %v7512_v20, %v6937_v19  ;;  %v7347_v19 = vld [vmem:[%s12049_s5 + $0xf8] sm:$0xf0] }
 0x31b   : > { %3488 = vmatpush.bf16.msrb.mxu3 %v6080_v58  ;;  %3962 = vmatpush.bf16.msra.mxu2 %v6387_v26  ;;  %v6535_v58 = vor.u32 %v7358_v30, %v6532_v60  ;;  %v6307_v26 = vld [vmem:[%s12049_s5 + $0x470] sm:$0xf]  ;;  %v6470_v30 = vld [vmem:[%s12049_s5 + $0xd8] sm:$0xf]  ;;  %v7344_v60 = vld [vmem:[%s12049_s5 + $0xe0] sm:$0xf0] }
 0x31c   : > { %v6308_v39 = vor.u32 %v7459_v34, %v6307_v26  ;;  %v7538_v26 = vld [vmem:[%s12049_s5 + $0x6f4] sm:$0xf]  ;;  %v7047_v34 = vld [vmem:[%s12049_s5 + $0x6fc] sm:$0xf0] }
 0x31d   : > { %4076 = vmatpush.bf16.msra.mxu0 %v6371_v41  ;;  %v6926_v41 = vor.u32 %v7509_v44, %v6925_v28  ;;  %v7343_v44 = vld [vmem:[%s12049_s5 + $0xdc] sm:$0xf] }
 0x31f   : > { %3489 = vmatpush.bf16.msrb.mxu3 %v6068_v15  ;;  %3963 = vmatpush.bf16.msra.mxu2 %v6375_v56  ;;  %v6519_v15 = vor.u32 %v7356_v51, %v6518_v35  ;;  %v6295_v56 = vld [vmem:[%s12049_s5 + $0x458] sm:$0xf]  ;;  %v7444_v51 = vld [vmem:[%s12049_s5 + $0x400] sm:$0xf0] }
 0x320   : > { %v6296_v55 = vor.u32 %v7456_v21, %v6295_v56  ;;  %v6247_v35 = vld [vmem:[%s12049_s5 + $0x3f8] sm:$0xf]  ;;  %v7385_v56 = vld [vmem:[%s12049_s5 + $0x22c] sm:$0xf] }
 0x321   : > { %v6640_v21 = vld [vmem:[%s12049_s5 + $0x234] sm:$0xf0]  ;;  %v6248_v8 = vor.u32 %v7444_v51, %v6247_v35  ;;  %v7373_v51 = vld [vmem:[%s12049_s5 + $0x1cc] sm:$0xf] }
 0x323   : > { %3490 = vmatpush.bf16.msrb.mxu3 %v6056_v42  ;;  %3964 = vmatpush.bf16.msra.mxu2 %v6363_v43  ;;  %v6901_v42 = vld [vmem:[%s12049_s5 + $0x5d0] sm:$0xf]  ;;  %v7503_v43 = vld [vmem:[%s12049_s5 + $0x5d8] sm:$0xf0] }
 0x324   : > { %v6902_v0 = vor.u32 %v7503_v43, %v6901_v42  ;;  %v7535_v43 = vld [vmem:[%s12049_s5 + $0x6dc] sm:$0xf] }
 0x336   : > { %v2701_v62 = vpop.f32.mrf.mxu1 }
 0x33e   : > { %v2704_v29 = vpop.f32.mrf.mxu1 }
 0x33f   : > { %v10601_v48 = vpack.c.bf16 %v2704_v29, %v2701_v62  ;;  %v6507_v62 = vor.u32 %v7353_v24, %v6506_v36  ;;  %v7453_v29 = vld [vmem:[%s12049_s5 + $0x448] sm:$0xf0]  ;;  %v10825_v36 = vrot.slane %v10205_v50, 1  ;;  %v7050_v24 = vor.u32 %v7538_v26, %v7047_v34  ;;  %v7526_v26 = vld [vmem:[%s12049_s5 + $0x694] sm:$0xf] }
 0x340   : > { %v6284_v38 = vor.u32 %v7453_v29, %v6283_v57  ;;  %v6643_v57 = vor.u32 %v7385_v56, %v6640_v21  ;;  %v6650_v29 = vld [vmem:[%s12049_s5 + $0x240] sm:$0xf]  ;;  %v7523_v56 = vld [vmem:[%s12049_s5 + $0x67c] sm:$0xf]  ;;  %v6987_v21 = vld [vmem:[%s12049_s5 + $0x684] sm:$0xf0] }
 0x341   : > { %v2944_v59 = vshll.u32 %v10601_v48, 16  ;;  %6673 = vmatmul.msk.bf16.vlgmr.msrb.gmra.mxu0 %vm3367_vm7, %v10601_v48  ;;  %v2942_v12 = vshrl.u32 %v10601_v48, 16  ;;  %v6999_v34 = vld [vmem:[%s12049_s5 + $0x69c] sm:$0xf0] }
 0x342   : > { %4674 = vmatpush.bf16.msrb.mxu0 %v6962_v16  ;;  %v6494_v16 = vld [vmem:[%s12049_s5 + $0x108] sm:$0xf] }
 0x343   : > { %v2946_v32 = vrot.slane %v2944_v59, 1  ;;  %v6496_v59 = vld [vmem:[%s12049_s5 + $0x114] sm:$0xf0]  ;;  %v6495_v18 = vor.u32 %v7350_v3, %v6494_v16  ;;  %v7389_v16 = vld [vmem:[%s12049_s5 + $0x248] sm:$0xf0] }
 0x344   : > { %v7382_v3 = vld [vmem:[%s12049_s5 + $0x214] sm:$0xf] }
 0x345   : > { %v2947_v1 = vor.u32 %v2946_v32, %v2942_v12  ;;  %v6499_v12 = vor.u32 %v7349_v45, %v6496_v59  ;;  %v6482_v32 = vld [vmem:[%s12049_s5 + $0xf0] sm:$0xf]  ;;  %v6628_v45 = vld [vmem:[%s12049_s5 + $0x21c] sm:$0xf0]  ;;  %v7337_v59 = vld [vmem:[%s12049_s5 + $0xac] sm:$0xf] }
 0x346   : > { %4675 = vmatpush.bf16.msrb.mxu0 %v6950_v22  ;;  %v7500_v22 = vld [vmem:[%s12049_s5 + $0x5c0] sm:$0xf0]  ;;  %v6483_v2 = vor.u32 %v7347_v19, %v6482_v32  ;;  %v6631_v32 = vor.u32 %v7382_v3, %v6628_v45  ;;  %v7367_v45 = vld [vmem:[%s12049_s5 + $0x19c] sm:$0xf] }
 0x347   : > { %6357 = vmatmul.msk.bf16.vlgmr.msra.gmra.mxu1 %vm3367_vm7, %v2947_v1  ;;  %6358 = vmatmul.msk.bf16.vlgmr.msra.gmra.mxu3 %vm3367_vm7, %v2947_v1  ;;  %v6890_v20 = vor.u32 %v7500_v22, %v6889_v17  ;;  %v6634_v22 = vld [vmem:[%s12049_s5 + $0x218] sm:$0xf] }
 0x348   : > { %3511 = vmatpush.bf16.msra.mxu1 %v6332_v61  ;;  %6359 = vmatmul.msk.bf16.vlgmr.msrb.gmra.mxu2 %vm3367_vm7, %v2947_v1  ;;  %v7346_v61 = vld [vmem:[%s12049_s5 + $0xf4] sm:$0xf]  ;;  %v6484_v1 = vld [vmem:[%s12049_s5 + $0xfc] sm:$0xf0] }
 0x349   : > { %3971 = vmatpush.bf16.msra.mxu3 %v6543_v13  ;;  %4027 = vmatpush.bf16.msrb.mxu2 %v6547_v9  ;;  %v6272_v13 = vor.u32 %v7450_v25, %v6271_v46  ;;  %v6877_v9 = vld [vmem:[%s12049_s5 + $0x5a0] sm:$0xf]  ;;  %v6487_v23 = vor.u32 %v7346_v61, %v6484_v1  ;;  %v6651_v46 = vor.u32 %v7389_v16, %v6650_v29  ;;  %v7532_v25 = vld [vmem:[%s12049_s5 + $0x6c4] sm:$0xf]  ;;  %v6616_v1 = vld [vmem:[%s12049_s5 + $0x204] sm:$0xf0] }
 0x34a   : > { %4676 = vmatpush.bf16.msrb.mxu0 %v6938_v27  ;;  %v7447_v27 = vld [vmem:[%s12049_s5 + $0x418] sm:$0xf0]  ;;  %v7520_v29 = vld [vmem:[%s12049_s5 + $0x664] sm:$0xf]  ;;  %v6975_v16 = vld [vmem:[%s12049_s5 + $0x66c] sm:$0xf0] }
 0x34c   : > { %3512 = vmatpush.bf16.msra.mxu1 %v6320_v11  ;;  %v6472_v11 = vld [vmem:[%s12049_s5 + $0xe4] sm:$0xf0] }
 0x34d   : > { %3972 = vmatpush.bf16.msra.mxu3 %v6531_v47  ;;  %4028 = vmatpush.bf16.msrb.mxu2 %v6535_v58  ;;  %v6260_v58 = vor.u32 %v7447_v27, %v6259_v14 }
 0x34e   : > { %4677 = vmatpush.bf16.msrb.mxu0 %v6926_v41  ;;  %v6471_v41 = vor.u32 %v7344_v60, %v6470_v30  ;;  %v6604_v60 = vld [vmem:[%s12049_s5 + $0x1ec] sm:$0xf0] }
 0x350   : > { %3513 = vmatpush.bf16.msra.mxu1 %v6308_v39  ;;  %v6475_v39 = vor.u32 %v7343_v44, %v6472_v11  ;;  %v6424_v44 = vld [vmem:[%s12049_s5 + $0x84] sm:$0xf0] }
 0x351   : > { %3973 = vmatpush.bf16.msra.mxu3 %v6519_v15  ;;  %4029 = vmatpush.bf16.msrb.mxu2 %v6523_v40  ;;  %v7392_v15 = vld [vmem:[%s12049_s5 + $0x260] sm:$0xf0]  ;;  %v6460_v40 = vld [vmem:[%s12049_s5 + $0xcc] sm:$0xf0] }
 0x352   : > { %4077 = vmatmul.bf16.vlgmr.msra.gmra.mxu0 %v10086_v31  ;;  %v6663_v42 = vor.u32 %v7392_v15, %v6662_v63  ;;  %v7002_v63 = vor.u32 %v7526_v26, %v6999_v34  ;;  %v6598_v15 = vld [vmem:[%s12049_s5 + $0x1d0] sm:$0xf] }
 0x353   : > { %4678 = vmatpush.bf16.msrb.mxu0 %v6914_v49  ;;  %v7387_v49 = vld [vmem:[%s12049_s5 + $0x238] sm:$0xf0] }
 0x354   : > { %3514 = vmatpush.bf16.msra.mxu1 %v6296_v55  ;;  %v6459_v55 = vor.u32 %v7341_v53, %v6458_v54  ;;  %v6592_v53 = vld [vmem:[%s12049_s5 + $0x1d4] sm:$0xf0] }
 0x355   : > { %3974 = vmatpush.bf16.msra.mxu3 %v6507_v62  ;;  %4030 = vmatpush.bf16.msrb.mxu2 %v6511_v37  ;;  %v7035_v62 = vld [vmem:[%s12049_s5 + $0x6e4] sm:$0xf0]  ;;  %v6463_v37 = vor.u32 %v7340_v10, %v6460_v40  ;;  %v6412_v10 = vld [vmem:[%s12049_s5 + $0x6c] sm:$0xf0]  ;;  %v7375_v40 = vld [vmem:[%s12049_s5 + $0x1d8] sm:$0xf0] }
 0x356   : > { %v7038_v17 = vor.u32 %v7535_v43, %v7035_v62  ;;  %v6400_v43 = vld [vmem:[%s12049_s5 + $0x54] sm:$0xf0]  ;;  %v6990_v62 = vor.u32 %v7523_v56, %v6987_v21  ;;  %v7493_v21 = vld [vmem:[%s12049_s5 + $0x58c] sm:$0xf] }
 0x357   : > { %4679 = vmatpush.bf16.msrb.mxu0 %v6902_v0  ;;  %3449 = vmatmul.bf16.vlgmr.msrb.gmra.mxu1 %v10234_v52  ;;  %v7497_v52 = vld [vmem:[%s12049_s5 + $0x5a8] sm:$0xf0]  ;;  %v6647_v0 = vor.u32 %v7387_v49, %v6646_v7  ;;  %v7370_v7 = vld [vmem:[%s12049_s5 + $0x1b4] sm:$0xf]  ;;  %v6599_v49 = vor.u32 %v7375_v40, %v6598_v15  ;;  %v6865_v15 = vld [vmem:[%s12049_s5 + $0x588] sm:$0xf] }
 0x358   : > { %3491 = vmatmul.bf16.vlgmr.msrb.gmra.mxu3 %v10118_v5  ;;  %3515 = vmatpush.bf16.msra.mxu1 %v6284_v38  ;;  %v7059_v5 = vld [vmem:[%s12049_s5 + $0x714] sm:$0xf0]  ;;  %v6878_v28 = vor.u32 %v7497_v52, %v6877_v9  ;;  %v6436_v9 = vld [vmem:[%s12049_s5 + $0x9c] sm:$0xf0]  ;;  %v7494_v40 = vld [vmem:[%s12049_s5 + $0x590] sm:$0xf0] }
 0x359   : > { %3965 = vmatmul.bf16.vlgmr.msra.gmra.mxu2 %v10086_v31  ;;  %3975 = vmatpush.bf16.msra.mxu3 %v6495_v18  ;;  %v7062_v47 = vor.u32 %v7541_v4, %v7059_v5  ;;  %v6448_v38 = vld [vmem:[%s12049_s5 + $0xb4] sm:$0xf0]  ;;  %v7384_v18 = vld [vmem:[%s12049_s5 + $0x220] sm:$0xf0]  ;;  %v7381_v4 = vld [vmem:[%s12049_s5 + $0x208] sm:$0xf0] }
 0x35a   : > { %4031 = vmatpush.bf16.msrb.mxu2 %v6499_v12  ;;  %v7023_v12 = vld [vmem:[%s12049_s5 + $0x6cc] sm:$0xf0]  ;;  %v6451_v19 = vor.u32 %v7337_v59, %v6448_v38  ;;  %v6635_v61 = vor.u32 %v7384_v18, %v6634_v22  ;;  %v7011_v5 = vld [vmem:[%s12049_s5 + $0x6b4] sm:$0xf0]  ;;  %v7089_v59 = vld [vmem:[%s12049_s5 + $0x740] sm:$0xf] }
 0x35b   : > { %4680 = vmatpush.bf16.msrb.mxu0 %v6890_v20  ;;  %v7379_v20 = vld [vmem:[%s12049_s5 + $0x1fc] sm:$0xf]  ;;  %v7026_v52 = vor.u32 %v7532_v25, %v7023_v12  ;;  %v7549_v38 = vld [vmem:[%s12049_s5 + $0x748] sm:$0xf0]  ;;  %v6568_v22 = vld [vmem:[%s12049_s5 + $0x1a4] sm:$0xf0]  ;;  %v6978_v25 = vor.u32 %v7520_v29, %v6975_v16 }
 0x35c   : > { %3516 = vmatpush.bf16.msra.mxu1 %v6272_v13  ;;  %v7334_v13 = vld [vmem:[%s12049_s5 + $0x94] sm:$0xf]  ;;  %v6619_v14 = vor.u32 %v7379_v20, %v6616_v1  ;;  %v6574_v12 = vld [vmem:[%s12049_s5 + $0x1a0] sm:$0xf]  ;;  %v7090_v20 = vor.u32 %v7549_v38, %v7089_v59  ;;  %v11097_v59 = vpop.f32.mrf.mxu0 }
 0x35d   : > { %3976 = vmatpush.bf16.msra.mxu3 %v6483_v2  ;;  %v7529_v2 = vld [vmem:[%s12049_s5 + $0x6ac] sm:$0xf]  ;;  %v6439_v27 = vor.u32 %v7334_v13, %v6436_v9  ;;  %v7322_v18 = vld [vmem:[%s12049_s5 + $0x34] sm:$0xf]  ;;  %v6556_v13 = vld [vmem:[%s12049_s5 + $0x18c] sm:$0xf0] }
 0x35e   : > { %4032 = vmatpush.bf16.msrb.mxu2 %v6487_v23  ;;  %v7376_v23 = vld [vmem:[%s12049_s5 + $0x1e4] sm:$0xf]  ;;  %v7014_v11 = vor.u32 %v7529_v2, %v7011_v5  ;;  %v7077_v9 = vld [vmem:[%s12049_s5 + $0x728] sm:$0xf]  ;;  %v7319_v2 = vld [vmem:[%s12049_s5 + $0x1c] sm:$0xf] }
 0x35f   : > { %4681 = vmatpush.bf16.msrb.mxu0 %v6878_v28  ;;  %v7331_v28 = vld [vmem:[%s12049_s5 + $0x7c] sm:$0xf]  ;;  %v6607_v35 = vor.u32 %v7376_v23, %v6604_v60  ;;  %v6376_v5 = vld [vmem:[%s12049_s5 + $0x24] sm:$0xf0]  ;;  %v7393_v23 = vld [vmem:[%s12049_s5 + $0x268] sm:$0xf0] }
 0x360   : > { %3517 = vmatpush.bf16.msra.mxu1 %v6260_v58  ;;  %v7378_v58 = vld [vmem:[%s12049_s5 + $0x1f0] sm:$0xf0]  ;;  %v7081_v60 = vld [vmem:[%s12049_s5 + $0x738] sm:$0xf]  ;;  %v6855_v16 = vld [vmem:[%s12049_s5 + $0x57c] sm:$0xf0] }
 0x361   : > { %3977 = vmatpush.bf16.msra.mxu3 %v6471_v41  ;;  %v6427_v41 = vor.u32 %v7331_v28, %v6424_v44  ;;  %v7548_v28 = vld [vmem:[%s12049_s5 + $0x740] sm:$0xf0]  ;;  %v7490_v29 = vld [vmem:[%s12049_s5 + $0x574] sm:$0xf] }
 0x362   : > { %4033 = vmatpush.bf16.msrb.mxu2 %v6475_v39  ;;  %4682 = vmatmul.bf16.vlgmr.msrb.gmra.mxu0 %v10825_v36  ;;  %v7328_v39 = vld [vmem:[%s12049_s5 + $0x64] sm:$0xf]  ;;  %v6858_v38 = vor.u32 %v7490_v29, %v6855_v16  ;;  %v6781_v29 = vld [vmem:[%s12049_s5 + $0x4e0] sm:$0xf]  ;;  %v7473_v16 = vld [vmem:[%s12049_s5 + $0x4e8] sm:$0xf0] }
 0x363   : > { %4744 = vmatpush.bf16.msra.mxu0 %v7062_v47  ;;  %v6610_v47 = vld [vmem:[%s12049_s5 + $0x1e8] sm:$0xf] }
 0x364   : > { %3518 = vmatpush.bf16.msra.mxu1 %v6248_v8  ;;  %v6611_v54 = vor.u32 %v7378_v58, %v6610_v47  ;;  %v6415_v8 = vor.u32 %v7328_v39, %v6412_v10  ;;  %v6379_v47 = vor.u32 %v7319_v2, %v6376_v5  ;;  %v7316_v58 = vld [vmem:[%s12049_s5 + $0x4] sm:$0xf]  ;;  %v6550_v39 = vld [vmem:[%s12049_s5 + $0x170] sm:$0xf]  ;;  %v7363_v10 = vld [vmem:[%s12049_s5 + $0x178] sm:$0xf0] }
 0x365   : > { %3978 = vmatpush.bf16.msra.mxu3 %v6459_v55  ;;  %v6580_v55 = vld [vmem:[%s12049_s5 + $0x1bc] sm:$0xf0] }
 0x366   : > { %4034 = vmatpush.bf16.msrb.mxu2 %v6463_v37  ;;  %v6586_v37 = vld [vmem:[%s12049_s5 + $0x1b8] sm:$0xf]  ;;  %v6583_v3 = vor.u32 %v7370_v7, %v6580_v55  ;;  %v6551_v7 = vor.u32 %v7363_v10, %v6550_v39  ;;  %v6866_v55 = vor.u32 %v7494_v40, %v6865_v15  ;;  %v7479_v39 = vld [vmem:[%s12049_s5 + $0x518] sm:$0xf0]  ;;  %v7478_v10 = vld [vmem:[%s12049_s5 + $0x514] sm:$0xf] }
 0x367   : > { %4745 = vmatpush.bf16.msra.mxu0 %v7050_v24  ;;  %3519 = vmatmul.bf16.vlgmr.msra.gmra.mxu1 %v10450_v33  ;;  %v6622_v33 = vld [vmem:[%s12049_s5 + $0x200] sm:$0xf]  ;;  %v6595_v24 = vor.u32 %v7373_v51, %v6592_v53  ;;  %v7390_v51 = vld [vmem:[%s12049_s5 + $0x250] sm:$0xf0] }
 0x368   : > { %4005 = vmatpush.bf16.msrb.mxu1 %v6663_v42  ;;  %3979 = vmatmul.bf16.vlgmr.msra.gmra.mxu3 %v10205_v50  ;;  %v6623_v30 = vor.u32 %v7381_v4, %v6622_v33  ;;  %v7325_v42 = vld [vmem:[%s12049_s5 + $0x4c] sm:$0xf]  ;;  %v6562_v4 = vld [vmem:[%s12049_s5 + $0x188] sm:$0xf]  ;;  %v7069_v53 = vld [vmem:[%s12049_s5 + $0x720] sm:$0xf] }
 0x369   : > { %4041 = vmatpush.bf16.msrb.mxu3 %v6643_v57  ;;  %4035 = vmatmul.bf16.vlgmr.msrb.gmra.mxu2 %v10205_v50  ;;  %v7372_v57 = vld [vmem:[%s12049_s5 + $0x1c0] sm:$0xf0] }
 0x36a   : > { %4097 = vmatpush.bf16.msra.mxu2 %v6647_v0  ;;  %v6403_v0 = vor.u32 %v7325_v42, %v6400_v43  ;;  %v6538_v42 = vld [vmem:[%s12049_s5 + $0x158] sm:$0xf]  ;;  %v7360_v43 = vld [vmem:[%s12049_s5 + $0x160] sm:$0xf0] }
 0x36b   : > { %4746 = vmatpush.bf16.msra.mxu0 %v7038_v17  ;;  %v6587_v17 = vor.u32 %v7372_v57, %v6586_v37  ;;  %v6853_v37 = vld [vmem:[%s12049_s5 + $0x570] sm:$0xf]  ;;  %v7491_v57 = vld [vmem:[%s12049_s5 + $0x578] sm:$0xf0] }
 0x36c   : > { %4006 = vmatpush.bf16.msrb.mxu1 %v6651_v46  ;;  %v6388_v46 = vld [vmem:[%s12049_s5 + $0x3c] sm:$0xf0] }
 0x36d   : > { %4042 = vmatpush.bf16.msrb.mxu3 %v6631_v32  ;;  %v7369_v32 = vld [vmem:[%s12049_s5 + $0x1a8] sm:$0xf0]  ;;  %v6391_v1 = vor.u32 %v7322_v18, %v6388_v46  ;;  %v7488_v18 = vld [vmem:[%s12049_s5 + $0x560] sm:$0xf0]  ;;  %v7487_v46 = vld [vmem:[%s12049_s5 + $0x55c] sm:$0xf] }
 0x36e   : > { %4098 = vmatpush.bf16.msra.mxu2 %v6635_v61  ;;  %v6571_v61 = vor.u32 %v7367_v45, %v6568_v22  ;;  %v6575_v33 = vor.u32 %v7369_v32, %v6574_v12  ;;  %v6526_v45 = vld [vmem:[%s12049_s5 + $0x140] sm:$0xf]  ;;  %v6841_v22 = vld [vmem:[%s12049_s5 + $0x558] sm:$0xf] }
 0x36f   : > { %4747 = vmatpush.bf16.msra.mxu0 %v7026_v52  ;;  %v7546_v52 = vld [vmem:[%s12049_s5 + $0x730] sm:$0xf0]  ;;  %v6842_v32 = vor.u32 %v7488_v18, %v6841_v22  ;;  %v7517_v22 = vld [vmem:[%s12049_s5 + $0x64c] sm:$0xf]  ;;  %v6963_v18 = vld [vmem:[%s12049_s5 + $0x654] sm:$0xf0] }
 0x370   : > { %4013 = vmatpush.bf16.msra.mxu1 %v6451_v19  ;;  %v7364_v19 = vld [vmem:[%s12049_s5 + $0x184] sm:$0xf]  ;;  %v7078_v44 = vor.u32 %v7546_v52, %v7077_v9  ;;  %v7485_v9 = vld [vmem:[%s12049_s5 + $0x548] sm:$0xf0] }
 0x371   : > { %4043 = vmatpush.bf16.msrb.mxu3 %v6619_v14  ;;  %v7366_v14 = vld [vmem:[%s12049_s5 + $0x190] sm:$0xf0]  ;;  %v7484_v52 = vld [vmem:[%s12049_s5 + $0x544] sm:$0xf] }
 0x372   : > { %4099 = vmatpush.bf16.msra.mxu2 %v6623_v30  ;;  %v11026_v30 = vrot.slane %v10418_v6, 1  ;;  %v6563_v26 = vor.u32 %v7366_v14, %v6562_v4  ;;  %v6502_v14 = vld [vmem:[%s12049_s5 + $0x110] sm:$0xf] }
 0x373   : > { %4748 = vmatpush.bf16.msra.mxu0 %v7014_v11  ;;  %v6559_v11 = vor.u32 %v7364_v19, %v6556_v13  ;;  %v6514_v19 = vld [vmem:[%s12049_s5 + $0x128] sm:$0xf]  ;;  %v6829_v13 = vld [vmem:[%s12049_s5 + $0x540] sm:$0xf] }
 0x374   : > { %4014 = vmatpush.bf16.msra.mxu1 %v6439_v27  ;;  %v6670_v27 = vld [vmem:[%s12049_s5 + $0x260] sm:$0xf]  ;;  %v6830_v5 = vor.u32 %v7485_v9, %v6829_v13  ;;  %v7045_v13 = vld [vmem:[%s12049_s5 + $0x6f0] sm:$0xf]  ;;  %v7539_v9 = vld [vmem:[%s12049_s5 + $0x6f8] sm:$0xf0] }
 0x375   : > { %4044 = vmatpush.bf16.msrb.mxu3 %v6607_v35  ;;  %v6671_v34 = vor.u32 %v7393_v23, %v6670_v27  ;;  %v6364_v35 = vld [vmem:[%s12049_s5 + $0xc] sm:$0xf0]  ;;  %v7351_v27 = vld [vmem:[%s12049_s5 + $0x118] sm:$0xf0] }
 0x376   : > { %4100 = vmatpush.bf16.msra.mxu2 %v6611_v54  ;;  %v7082_v54 = vor.u32 %v7548_v28, %v7081_v60  ;;  %v6367_v56 = vor.u32 %v7316_v58, %v6364_v35  ;;  %v6817_v60 = vld [vmem:[%s12049_s5 + $0x528] sm:$0xf]  ;;  %v7482_v28 = vld [vmem:[%s12049_s5 + $0x530] sm:$0xf0] }
 0x377   : > { %4749 = vmatpush.bf16.msra.mxu0 %v7002_v63  ;;  %6672 = vmatmul.msk.bf16.vlgmr.msrb.gmra.mxu1 %vm3367_vm7, %v10601_v48  ;;  %v7545_v63 = vld [vmem:[%s12049_s5 + $0x728] sm:$0xf0]  ;;  %v6818_v35 = vor.u32 %v7482_v28, %v6817_v60  ;;  %v7033_v28 = vld [vmem:[%s12049_s5 + $0x6d8] sm:$0xf] }
 0x378   : > { %4015 = vmatpush.bf16.msra.mxu1 %v6427_v41  ;;  %v6658_v41 = vld [vmem:[%s12049_s5 + $0x248] sm:$0xf] }
 0x379   : > { %4045 = vmatpush.bf16.msrb.mxu3 %v6595_v24  ;;  %v6867_v24 = vld [vmem:[%s12049_s5 + $0x594] sm:$0xf0] }
 0x37a   : > { %4101 = vmatpush.bf16.msra.mxu2 %v6599_v49  ;;  %v7070_v49 = vor.u32 %v7545_v63, %v7069_v53  ;;  %v6805_v53 = vld [vmem:[%s12049_s5 + $0x510] sm:$0xf] }
 0x37b   : > { %4750 = vmatpush.bf16.msra.mxu0 %v6990_v62  ;;  %v6870_v62 = vor.u32 %v7493_v21, %v6867_v24  ;;  %v6806_v40 = vor.u32 %v7479_v39, %v6805_v53  ;;  %v7345_v21 = vld [vmem:[%s12049_s5 + $0xe8] sm:$0xf0]  ;;  %v6927_v53 = vld [vmem:[%s12049_s5 + $0x60c] sm:$0xf0]  ;;  %v6933_v39 = vld [vmem:[%s12049_s5 + $0x608] sm:$0xf] }
 0x37c   : > { %4016 = vmatpush.bf16.msra.mxu1 %v6415_v8  ;;  %v6659_v8 = vor.u32 %v7390_v51, %v6658_v41  ;;  %v6490_v41 = vld [vmem:[%s12049_s5 + $0xf8] sm:$0xf]  ;;  %v7348_v51 = vld [vmem:[%s12049_s5 + $0x100] sm:$0xf0] }
 0x37d   : > { %4046 = vmatpush.bf16.msrb.mxu3 %v6583_v3  ;;  %v6539_v3 = vor.u32 %v7360_v43, %v6538_v42  ;;  %v6491_v63 = vor.u32 %v7348_v51, %v6490_v41  ;;  %v6795_v42 = vld [vmem:[%s12049_s5 + $0x504] sm:$0xf0]  ;;  %v7533_v41 = vld [vmem:[%s12049_s5 + $0x6c8] sm:$0xf0] }
 0x37e   : > { %4102 = vmatpush.bf16.msra.mxu2 %v6587_v17  ;;  %v11100_v17 = vpop.f32.mrf.mxu2 }
 0x37f   : > { %4751 = vmatpush.bf16.msra.mxu0 %v6978_v25  ;;  %v6843_v25 = vld [vmem:[%s12049_s5 + $0x564] sm:$0xf0] }
 0x380   : > { %4017 = vmatpush.bf16.msra.mxu1 %v6403_v0  ;;  %v6854_v0 = vor.u32 %v7491_v57, %v6853_v37  ;;  %v7342_v57 = vld [vmem:[%s12049_s5 + $0xd0] sm:$0xf0] }
 0x381   : > { %4047 = vmatpush.bf16.msrb.mxu3 %v6571_v61  ;;  %v11121_v61 = vrot.slane %v10601_v48, 1 }
 0x382   : > { %4103 = vmatpush.bf16.msra.mxu2 %v6575_v33  ;;  %4752 = vmatmul.bf16.vlgmr.msra.gmra.mxu0 %v11026_v30  ;;  %v6831_v33 = vld [vmem:[%s12049_s5 + $0x54c] sm:$0xf0] }
 0x383   : > { %4820 = vmatpush.bf16.msrb.mxu0 %v7090_v20  ;;  %v7354_v20 = vld [vmem:[%s12049_s5 + $0x130] sm:$0xf0]  ;;  %v6834_v23 = vor.u32 %v7484_v52, %v6831_v33 }
 0x384   : > { %4018 = vmatpush.bf16.msra.mxu1 %v6391_v1  ;;  %v6846_v1 = vor.u32 %v7487_v46, %v6843_v25  ;;  %v6515_v4 = vor.u32 %v7354_v20, %v6514_v19  ;;  %v6969_v25 = vld [vmem:[%s12049_s5 + $0x650] sm:$0xf]  ;;  %v7514_v33 = vld [vmem:[%s12049_s5 + $0x634] sm:$0xf] }
 0x385   : > { %4048 = vmatpush.bf16.msrb.mxu3 %v6559_v11  ;;  %v6819_v11 = vld [vmem:[%s12049_s5 + $0x534] sm:$0xf0] }
 0x386   : > { %4104 = vmatpush.bf16.msra.mxu2 %v6563_v26  ;;  %v3396_v58 = vpop.f32.mrf.mxu2  ;;  %v6503_v26 = vor.u32 %v7351_v27, %v6502_v14  ;;  %v7516_v14 = vld [vmem:[%s12049_s5 + $0x640] sm:$0xf0]  ;;  %v7046_v27 = vor.u32 %v7539_v9, %v7045_v13  ;;  %v6879_v9 = vld [vmem:[%s12049_s5 + $0x5ac] sm:$0xf0] }
 0x387   : > { %4821 = vmatpush.bf16.msrb.mxu0 %v7078_v44  ;;  %v7481_v44 = vld [vmem:[%s12049_s5 + $0x52c] sm:$0xf]  ;;  %v7496_v13 = vld [vmem:[%s12049_s5 + $0x5a4] sm:$0xf] }
 0x388   : > { %4019 = vmatpush.bf16.msra.mxu1 %v6379_v47  ;;  %4049 = vmatmul.bf16.vlgmr.msrb.gmra.mxu3 %v10418_v6  ;;  %v3382_v47 = vpop.f32.mrf.mxu0 }
 0x389   : > { %4117 = vmatpush.bf16.msra.mxu3 %v6671_v34  ;;  %4105 = vmatmul.bf16.vlgmr.msra.gmra.mxu2 %v10418_v6  ;;  %v7357_v6 = vld [vmem:[%s12049_s5 + $0x148] sm:$0xf0]  ;;  %v11137_v2 = vpop.f32.mrf.mxu3  ;;  %v3397_v34 = vadd.f32 %v3396_v58, %v3382_v47  ;;  %v7511_v47 = vld [vmem:[%s12049_s5 + $0x61c] sm:$0xf]  ;;  %v6945_v58 = vld [vmem:[%s12049_s5 + $0x620] sm:$0xf] }
 0x38a   : > { %4708 = vmatpush.bf16.msrb.mxu2 %v7082_v54  ;;  %v6527_v12 = vor.u32 %v7357_v6, %v6526_v45  ;;  %v6822_v54 = vor.u32 %v7481_v44, %v6819_v11  ;;  %v7057_v45 = vld [vmem:[%s12049_s5 + $0x708] sm:$0xf]  ;;  %v7542_v6 = vld [vmem:[%s12049_s5 + $0x710] sm:$0xf0]  ;;  %v7536_v44 = vld [vmem:[%s12049_s5 + $0x6e0] sm:$0xf0] }
 0x38b   : > { %v7058_v19 = vor.u32 %v7542_v6, %v7057_v45  ;;  %v6985_v6 = vld [vmem:[%s12049_s5 + $0x678] sm:$0xf] }
 0x38c   : > { %4020 = vmatpush.bf16.msra.mxu1 %v6367_v56  ;;  %v6478_v56 = vld [vmem:[%s12049_s5 + $0xe0] sm:$0xf] }
 0x38d   : > { %4118 = vmatpush.bf16.msra.mxu3 %v6659_v8  ;;  %v6479_v43 = vor.u32 %v7345_v21, %v6478_v56  ;;  %v7505_v21 = vld [vmem:[%s12049_s5 + $0x5ec] sm:$0xf] }
 0x38e   : > { %4709 = vmatpush.bf16.msrb.mxu2 %v7070_v49  ;;  %v7476_v49 = vld [vmem:[%s12049_s5 + $0x500] sm:$0xf0] }
 0x38f   : > { %4021 = vmatmul.bf16.vlgmr.msra.gmra.mxu1 %v10086_v31 }
 0x390   : > { %4083 = vmatpush.bf16.msrb.mxu1 %v6551_v7  ;;  %v6793_v7 = vld [vmem:[%s12049_s5 + $0x4f8] sm:$0xf] }
 0x391   : > { %4660 = vmatpush.bf16.msrb.mxu3 %v6866_v55  ;;  %v3410_v15 = vpop.f32.mrf.mxu3  ;;  %v7475_v55 = vld [vmem:[%s12049_s5 + $0x4fc] sm:$0xf]  ;;  %v6794_v37 = vor.u32 %v7476_v49, %v6793_v7  ;;  %v6921_v7 = vld [vmem:[%s12049_s5 + $0x5f0] sm:$0xf] }
 0x392   : > { %4716 = vmatpush.bf16.msra.mxu2 %v6870_v62  ;;  %7093 = vmatmul.msk.bf16.vlgmr.msrb.gmra.mxu0 %vm3367_vm7, %v11121_v61  ;;  %v11185_v24 = vadd.f32 %v3410_v15, %v3397_v34  ;;  %v6466_v62 = vld [vmem:[%s12049_s5 + $0xc8] sm:$0xf]  ;;  %v7507_v49 = vld [vmem:[%s12049_s5 + $0x5f8] sm:$0xf0] }
 0x393   : > { %v6467_v46 = vor.u32 %v7342_v57, %v6466_v62  ;;  %v7009_v15 = vld [vmem:[%s12049_s5 + $0x6a8] sm:$0xf]  ;;  %v7527_v62 = vld [vmem:[%s12049_s5 + $0x698] sm:$0xf0]  ;;  %v7502_v57 = vld [vmem:[%s12049_s5 + $0x5d4] sm:$0xf] }
 0x394   : > { %4084 = vmatpush.bf16.msrb.mxu1 %v6539_v3  ;;  %v6798_v3 = vor.u32 %v7475_v55, %v6795_v42 }
 0x395   : > { %4661 = vmatpush.bf16.msrb.mxu3 %v6854_v0  ;;  %v7472_v0 = vld [vmem:[%s12049_s5 + $0x4e4] sm:$0xf] }
 0x396   : > { %4717 = vmatpush.bf16.msra.mxu2 %v6858_v38  ;;  %v6783_v38 = vld [vmem:[%s12049_s5 + $0x4ec] sm:$0xf0] }
 0x397   : > { %v6786_v20 = vor.u32 %v7472_v0, %v6783_v38  ;;  %v7524_v38 = vld [vmem:[%s12049_s5 + $0x680] sm:$0xf0] }
 0x398   : > { %4085 = vmatpush.bf16.msrb.mxu1 %v6527_v12  ;;  %6674 = vmatmul.msk.bf16.vlgmr.msra.gmra.mxu3 %vm3367_vm7, %v10601_v48  ;;  %v6807_v48 = vld [vmem:[%s12049_s5 + $0x51c] sm:$0xf0]  ;;  %v7519_v12 = vld [vmem:[%s12049_s5 + $0x658] sm:$0xf0] }
 0x399   : > { %4662 = vmatpush.bf16.msrb.mxu3 %v6842_v32  ;;  %7091 = vmatmul.msk.bf16.vlgmr.msrb.gmra.mxu2 %vm3367_vm7, %v11121_v61  ;;  %v6810_v8 = vor.u32 %v7478_v10, %v6807_v48  ;;  %v6782_v32 = vor.u32 %v7473_v16, %v6781_v29  ;;  %v6970_v52 = vor.u32 %v7519_v12, %v6969_v25  ;;  %v7510_v10 = vld [vmem:[%s12049_s5 + $0x610] sm:$0xf0]  ;;  %v6903_v29 = vld [vmem:[%s12049_s5 + $0x5dc] sm:$0xf0]  ;;  %v6909_v16 = vld [vmem:[%s12049_s5 + $0x5d8] sm:$0xf] }
 0x39a   : > { %4718 = vmatpush.bf16.msra.mxu2 %v6846_v1  ;;  %v6966_v1 = vor.u32 %v7517_v22, %v6963_v18  ;;  %v6934_v56 = vor.u32 %v7510_v10, %v6933_v39  ;;  %v6906_v45 = vor.u32 %v7502_v57, %v6903_v29  ;;  %v7499_v18 = vld [vmem:[%s12049_s5 + $0x5bc] sm:$0xf]  ;;  %v6897_v25 = vld [vmem:[%s12049_s5 + $0x5c0] sm:$0xf]  ;;  %v7501_v12 = vld [vmem:[%s12049_s5 + $0x5c8] sm:$0xf0]  ;;  %v3436_v29 = vpop.f32.mrf.mxu0 }
 0x39b   : > { %v7537_v10 = vld [vmem:[%s12049_s5 + $0x6e8] sm:$0xf0]  ;;  %v7486_v57 = vld [vmem:[%s12049_s5 + $0x550] sm:$0xf0] }
 0x39c   : > { %4086 = vmatpush.bf16.msrb.mxu1 %v6515_v4  ;;  %v6951_v4 = vld [vmem:[%s12049_s5 + $0x63c] sm:$0xf0] }
 0x39d   : > { %4663 = vmatpush.bf16.msrb.mxu3 %v6830_v5  ;;  %v6957_v5 = vld [vmem:[%s12049_s5 + $0x638] sm:$0xf]  ;;  %v6954_v60 = vor.u32 %v7514_v33, %v6951_v4  ;;  %v6885_v33 = vld [vmem:[%s12049_s5 + $0x5a8] sm:$0xf]  ;;  %v7547_v4 = vld [vmem:[%s12049_s5 + $0x73c] sm:$0xf] }
 0x39e   : > { %4719 = vmatpush.bf16.msra.mxu2 %v6834_v23  ;;  %v11254_v23 = vrot.slane %v10086_v31, 1  ;;  %v6958_v11 = vor.u32 %v7516_v14, %v6957_v5  ;;  %v6939_v31 = vld [vmem:[%s12049_s5 + $0x624] sm:$0xf0]  ;;  %v7498_v14 = vld [vmem:[%s12049_s5 + $0x5b0] sm:$0xf0] }
 0x39f   : > { %v6942_v34 = vor.u32 %v7511_v47, %v6939_v31  ;;  %v7083_v5 = vld [vmem:[%s12049_s5 + $0x744] sm:$0xf0]  ;;  %v6886_v47 = vor.u32 %v7498_v14, %v6885_v33  ;;  %v7522_v14 = vld [vmem:[%s12049_s5 + $0x670] sm:$0xf0] }
 0x3a0   : > { %4087 = vmatpush.bf16.msrb.mxu1 %v6503_v26  ;;  %v7513_v26 = vld [vmem:[%s12049_s5 + $0x628] sm:$0xf0] }
 0x3a1   : > { %4664 = vmatpush.bf16.msrb.mxu3 %v6818_v35  ;;  %v7021_v35 = vld [vmem:[%s12049_s5 + $0x6c0] sm:$0xf]  ;;  %v6946_v51 = vor.u32 %v7513_v26, %v6945_v58  ;;  %v7544_v58 = vld [vmem:[%s12049_s5 + $0x724] sm:$0xf]  ;;  %v7071_v26 = vld [vmem:[%s12049_s5 + $0x72c] sm:$0xf0] }
 0x3a2   : > { %4720 = vmatpush.bf16.msra.mxu2 %v6822_v54  ;;  %v7508_v54 = vld [vmem:[%s12049_s5 + $0x604] sm:$0xf]  ;;  %v7022_v48 = vor.u32 %v7533_v41, %v7021_v35  ;;  %v6873_v41 = vld [vmem:[%s12049_s5 + $0x590] sm:$0xf] }
 0x3a3   : > { %v7540_v35 = vld [vmem:[%s12049_s5 + $0x700] sm:$0xf0] }
 0x3a4   : > { %4088 = vmatpush.bf16.msrb.mxu1 %v6491_v63  ;;  %v6930_v63 = vor.u32 %v7508_v54, %v6927_v53  ;;  %v7074_v54 = vor.u32 %v7544_v58, %v7071_v26 }
 0x3a5   : > { %4665 = vmatpush.bf16.msrb.mxu3 %v6806_v40  ;;  %v7530_v40 = vld [vmem:[%s12049_s5 + $0x6b0] sm:$0xf0] }
 0x3a6   : > { %4721 = vmatpush.bf16.msra.mxu2 %v6810_v8  ;;  %v6915_v8 = vld [vmem:[%s12049_s5 + $0x5f4] sm:$0xf0]  ;;  %v7010_v55 = vor.u32 %v7530_v40, %v7009_v15 }
 0x3a7   : > { %v6918_v42 = vor.u32 %v7505_v21, %v6915_v8  ;;  %v7029_v21 = vld [vmem:[%s12049_s5 + $0x6c8] sm:$0xf]  ;;  %v7534_v8 = vld [vmem:[%s12049_s5 + $0x6d0] sm:$0xf0] }
 0x3a8   : > { %4089 = vmatpush.bf16.msrb.mxu1 %v6479_v43  ;;  %v6997_v43 = vld [vmem:[%s12049_s5 + $0x690] sm:$0xf] }
 0x3a9   : > { %4666 = vmatpush.bf16.msrb.mxu3 %v6794_v37  ;;  %v6922_v37 = vor.u32 %v7507_v49, %v6921_v7  ;;  %v6998_v0 = vor.u32 %v7527_v62, %v6997_v43  ;;  %v6849_v7 = vld [vmem:[%s12049_s5 + $0x560] sm:$0xf]  ;;  %v7017_v43 = vld [vmem:[%s12049_s5 + $0x6b0] sm:$0xf]  ;;  %v7531_v62 = vld [vmem:[%s12049_s5 + $0x6b8] sm:$0xf0] }
 0x3aa   : > { %4722 = vmatpush.bf16.msra.mxu2 %v6798_v3  ;;  %v7504_v3 = vld [vmem:[%s12049_s5 + $0x5e0] sm:$0xf0] }
 0x3ab   : > { %v6910_v22 = vor.u32 %v7504_v3, %v6909_v16 }
 0x3ac   : > { %4090 = vmatpush.bf16.msrb.mxu1 %v6467_v46  ;;  %v6891_v46 = vld [vmem:[%s12049_s5 + $0x5c4] sm:$0xf0] }
 0x3ad   : > { %4667 = vmatpush.bf16.msrb.mxu3 %v6782_v32  ;;  %v6986_v32 = vor.u32 %v7524_v38, %v6985_v6  ;;  %v7005_v6 = vld [vmem:[%s12049_s5 + $0x698] sm:$0xf]  ;;  %v7528_v38 = vld [vmem:[%s12049_s5 + $0x6a0] sm:$0xf0] }
 0x3ae   : > { %4723 = vmatpush.bf16.msra.mxu2 %v6786_v20  ;;  %v6894_v20 = vor.u32 %v7499_v18, %v6891_v46  ;;  %v3464_v18 = vpop.f32.mrf.mxu2  ;;  %v7006_v46 = vor.u32 %v7528_v38, %v7005_v6 }
 0x3af   : > { %4091 = vmatmul.bf16.vlgmr.msrb.gmra.mxu1 %v10205_v50  ;;  %v7034_v50 = vor.u32 %v7536_v44, %v7033_v28  ;;  %v6882_v44 = vor.u32 %v7496_v13, %v6879_v9 }
 0x3b0   : > { %4688 = vmatpush.bf16.msra.mxu1 %v7058_v19  ;;  %4668 = vmatmul.bf16.vlgmr.msrb.gmra.mxu3 %v11254_v23  ;;  %v6973_v19 = vld [vmem:[%s12049_s5 + $0x660] sm:$0xf] }
 0x3b1   : > { %4730 = vmatpush.bf16.msra.mxu3 %v6966_v1  ;;  %4724 = vmatmul.bf16.vlgmr.msra.gmra.mxu2 %v11254_v23  ;;  %v7521_v1 = vld [vmem:[%s12049_s5 + $0x668] sm:$0xf0] }
 0x3b2   : > { %4786 = vmatpush.bf16.msrb.mxu2 %v6970_v52  ;;  %v6898_v52 = vor.u32 %v7501_v12, %v6897_v25  ;;  %v6974_v28 = vor.u32 %v7521_v1, %v6973_v19  ;;  %v6993_v12 = vld [vmem:[%s12049_s5 + $0x680] sm:$0xf]  ;;  %v6813_v19 = vld [vmem:[%s12049_s5 + $0x518] sm:$0xf] }
 0x3b4   : > { %4689 = vmatpush.bf16.msra.mxu1 %v7046_v27  ;;  %v7065_v27 = vld [vmem:[%s12049_s5 + $0x710] sm:$0xf] }
 0x3b5   : > { %4731 = vmatpush.bf16.msra.mxu3 %v6954_v60  ;;  %v7543_v60 = vld [vmem:[%s12049_s5 + $0x718] sm:$0xf0] }
 0x3b6   : > { %4787 = vmatpush.bf16.msrb.mxu2 %v6958_v11  ;;  %v7086_v11 = vor.u32 %v7547_v4, %v7083_v5  ;;  %v7066_v31 = vor.u32 %v7543_v60, %v7065_v27  ;;  %v6981_v4 = vld [vmem:[%s12049_s5 + $0x668] sm:$0xf]  ;;  %v6801_v27 = vld [vmem:[%s12049_s5 + $0x500] sm:$0xf]  ;;  %v7477_v60 = vld [vmem:[%s12049_s5 + $0x508] sm:$0xf0]  ;;  %v3466_v58 = vpop.f32.mrf.mxu2 }
 0x3b8   : > { %4690 = vmatpush.bf16.msra.mxu1 %v7034_v50  ;;  %v7053_v50 = vld [vmem:[%s12049_s5 + $0x6f8] sm:$0xf] }
 0x3b9   : > { %4732 = vmatpush.bf16.msra.mxu3 %v6942_v34  ;;  %v3395_v34 = vadd.f32 %v11100_v17, %v11097_v59  ;;  %v7054_v53 = vor.u32 %v7540_v35, %v7053_v50  ;;  %v7041_v17 = vld [vmem:[%s12049_s5 + $0x6e0] sm:$0xf] }
 0x3ba   : > { %4788 = vmatpush.bf16.msrb.mxu2 %v6946_v51  ;;  %v7495_v51 = vld [vmem:[%s12049_s5 + $0x598] sm:$0xf0]  ;;  %v7042_v40 = vor.u32 %v7537_v10, %v7041_v17 }
 0x3bb   : > { %v6874_v59 = vor.u32 %v7495_v51, %v6873_v41  ;;  %v3409_v39 = vadd.f32 %v11137_v2, %v3395_v34 }
 0x3bc   : > { %4691 = vmatpush.bf16.msra.mxu1 %v7022_v48  ;;  %v6861_v48 = vld [vmem:[%s12049_s5 + $0x578] sm:$0xf] }
 0x3bd   : > { %4733 = vmatpush.bf16.msra.mxu3 %v6930_v63  ;;  %v7492_v63 = vld [vmem:[%s12049_s5 + $0x580] sm:$0xf0] }
 0x3be   : > { %4789 = vmatpush.bf16.msrb.mxu2 %v6934_v56  ;;  %v6862_v56 = vor.u32 %v7492_v63, %v6861_v48 }
 0x3c0   : > { %4692 = vmatpush.bf16.msra.mxu1 %v7010_v55  ;;  %v7030_v55 = vor.u32 %v7534_v8, %v7029_v21 }
 0x3c1   : > { %4734 = vmatpush.bf16.msra.mxu3 %v6918_v42 }
 0x3c2   : > { %4790 = vmatpush.bf16.msrb.mxu2 %v6922_v37  ;;  %v6837_v37 = vld [vmem:[%s12049_s5 + $0x548] sm:$0xf] }
 0x3c4   : > { %4693 = vmatpush.bf16.msra.mxu1 %v6998_v0  ;;  %v3422_v15 = vpop.f32.mrf.mxu1  ;;  %v7018_v0 = vor.u32 %v7531_v62, %v7017_v43  ;;  %v4885_v43 = vld [vmem:[%s12052_s8 + $0xf0] sm:$0xff]  ;;  %v4886_v62 = vld [vmem:[%s12052_s8 + $0xf8] sm:$0xff] }
 0x3c5   : > { %4735 = vmatpush.bf16.msra.mxu3 %v6906_v45  ;;  %v11415_v2 = vadd.f32 %v3422_v15, %v3409_v39  ;;  %v6838_v45 = vor.u32 %v7486_v57, %v6837_v37  ;;  %4950 = vmatpush.msra.mxu0 %v4885_v43  ;;  %v4883_v57 = vld [vmem:[%s12052_s8 + $0xe0] sm:$0xff] }
 0x3c6   : > { %4791 = vmatpush.bf16.msrb.mxu2 %v6910_v22  ;;  %v6825_v22 = vld [vmem:[%s12049_s5 + $0x530] sm:$0xf]  ;;  %v4855_v43 = vld [vmem:[%s12052_s8] sm:$0xff] }
 0x3c7   : > { %4951 = vmatpush.msra.mxu0 %v4883_v57  ;;  %v4856_v57 = vld [vmem:[%s12052_s8 + $0x8] sm:$0xff] }
 0x3c8   : > { %4694 = vmatpush.bf16.msra.mxu1 %v6986_v32  ;;  %v7525_v32 = vld [vmem:[%s12049_s5 + $0x688] sm:$0xf0] }
 0x3c9   : > { %4736 = vmatpush.bf16.msra.mxu3 %v6894_v20  ;;  %v7480_v20 = vld [vmem:[%s12049_s5 + $0x520] sm:$0xf0]  ;;  %v6994_v33 = vor.u32 %v7525_v32, %v6993_v12  ;;  %v4876_v12 = vld [vmem:[%s12052_s8 + $0xa8] sm:$0xff]  ;;  %v4917_v32 = vld [vmem:[%s12052_s8 + $0x1f0] sm:$0xff] }
 0x3ca   : > { %4792 = vmatpush.bf16.msrb.mxu2 %v6898_v52  ;;  %v3478_v49 = vpop.f32.mrf.mxu3  ;;  %v3438_v52 = vpop.f32.mrf.mxu0 }
 0x3cc   : > { %4695 = vmatpush.bf16.msra.mxu1 %v6974_v28  ;;  %v3424_v16 = vpop.f32.mrf.mxu1 }
 0x3cd   : > { %4737 = vmatpush.bf16.msra.mxu3 %v6882_v44  ;;  %v11442_v3 = vadd.f32 %v3424_v16, %v11185_v24  ;;  %v7483_v24 = vld [vmem:[%s12049_s5 + $0x538] sm:$0xf0]  ;;  %v6982_v44 = vor.u32 %v7522_v14, %v6981_v4  ;;  %v4869_v4 = vld [vmem:[%s12052_s8 + $0x70] sm:$0xff] }
 0x3ce   : > { %4793 = vmatpush.bf16.msrb.mxu2 %v6886_v47  ;;  %v6826_v25 = vor.u32 %v7483_v24, %v6825_v22  ;;  %v6789_v47 = vld [vmem:[%s12049_s5 + $0x4e8] sm:$0xf]  ;;  %v4879_v22 = vld [vmem:[%s12052_s8 + $0xc0] sm:$0xff] }
 0x3cf   : > { %4696 = vmatmul.bf16.vlgmr.msra.gmra.mxu1 %v11026_v30  ;;  %v4880_v24 = vld [vmem:[%s12052_s8 + $0xc8] sm:$0xff] }
 0x3d0   : > { %4764 = vmatpush.bf16.msrb.mxu1 %v7086_v11  ;;  %4738 = vmatmul.bf16.vlgmr.msra.gmra.mxu3 %v10825_v36  ;;  %v6802_v11 = vor.u32 %v7477_v60, %v6801_v27  ;;  %v4867_v60 = vld [vmem:[%s12052_s8 + $0x60] sm:$0xff] }
 0x3d1   : > { %4800 = vmatpush.bf16.msrb.mxu3 %v7066_v31  ;;  %4794 = vmatmul.bf16.vlgmr.msrb.gmra.mxu2 %v10825_v36  ;;  %v7489_v36 = vld [vmem:[%s12049_s5 + $0x568] sm:$0xf0]  ;;  %v7474_v31 = vld [vmem:[%s12049_s5 + $0x4f0] sm:$0xf0] }
 0x3d2   : > { %v6850_v42 = vor.u32 %v7489_v36, %v6849_v7  ;;  %v3480_v1 = vpop.f32.mrf.mxu3  ;;  %v6790_v35 = vor.u32 %v7474_v31, %v6789_v47  ;;  %v3506_v51 = vpop.f32.mrf.mxu0  ;;  %v4911_v47 = vld [vmem:[%s12052_s8 + $0x1c0] sm:$0xff]  ;;  %v4866_v31 = vld [vmem:[%s12052_s8 + $0x58] sm:$0xff] }
 0x3d4   : > { %4765 = vmatpush.bf16.msrb.mxu1 %v7074_v54  ;;  %v3450_v13 = vpop.f32.mrf.mxu1 }
 0x3d5   : > { %4801 = vmatpush.bf16.msrb.mxu3 %v7054_v53  ;;  %v3451_v9 = vadd.f32 %v3450_v13, %v3436_v29  ;;  %v4884_v29 = vld [vmem:[%s12052_s8 + $0xe8] sm:$0xff]  ;;  %v4913_v13 = vld [vmem:[%s12052_s8 + $0x1d0] sm:$0xff] }
 0x3d7   : > { %v3465_v5 = vadd.f32 %v3464_v18, %v3451_v9  ;;  %v4877_v18 = vld [vmem:[%s12052_s8 + $0xb0] sm:$0xff] }
 0x3d8   : > { %4772 = vmatpush.bf16.msra.mxu1 %v6874_v59  ;;  %v3534_v59 = vpop.f32.mrf.mxu2 }
 0x3d9   : > { %4802 = vmatpush.bf16.msrb.mxu3 %v7042_v40  ;;  %v11482_v28 = vadd.f32 %v3478_v49, %v3465_v5  ;;  %v4870_v5 = vld [vmem:[%s12052_s8 + $0x78] sm:$0xff] }
 0x3da   : > { %v3508_v63 = vpop.f32.mrf.mxu0 }
 0x3db   : > { %v3492_v34 = vpop.f32.mrf.mxu3 }
 0x3dc   : > { %4773 = vmatpush.bf16.msra.mxu1 %v6862_v56  ;;  %v3452_v26 = vpop.f32.mrf.mxu1  ;;  %v3507_v53 = vadd.f32 %v3506_v51, %v3492_v34  ;;  %v4909_v34 = vld [vmem:[%s12052_s8 + $0x1b0] sm:$0xff]  ;;  %v4907_v51 = vld [vmem:[%s12052_s8 + $0x1a0] sm:$0xff] }
 0x3dd   : > { %4803 = vmatpush.bf16.msrb.mxu3 %v7030_v55  ;;  %v3453_v50 = vadd.f32 %v3452_v26, %v3438_v52  ;;  %v4871_v52 = vld [vmem:[%s12052_s8 + $0x80] sm:$0xff] }
 0x3df   : > { %7092 = vmatmul.msk.bf16.vlgmr.msrb.gmra.mxu1 %vm3367_vm7, %v11121_v61  ;;  %v6814_v61 = vor.u32 %v7480_v20, %v6813_v19  ;;  %v3467_v41 = vadd.f32 %v3466_v58, %v3453_v50  ;;  %v4873_v19 = vld [vmem:[%s12052_s8 + $0x90] sm:$0xff]  ;;  %v4874_v20 = vld [vmem:[%s12052_s8 + $0x98] sm:$0xff]  ;;  %v4863_v50 = vld [vmem:[%s12052_s8 + $0x40] sm:$0xff] }
 0x3e0   : > { %4774 = vmatpush.bf16.msra.mxu1 %v6850_v42  ;;  %v3536_v21 = vpop.f32.mrf.mxu2 }
 0x3e1   : > { %4804 = vmatpush.bf16.msrb.mxu3 %v7018_v0  ;;  %v11491_v54 = vadd.f32 %v3480_v1, %v3467_v41  ;;  %v4881_v0 = vld [vmem:[%s12052_s8 + $0xd0] sm:$0xff]  ;;  %v4915_v1 = vld [vmem:[%s12052_s8 + $0x1e0] sm:$0xff] }
 0x3e2   : > { %v11502_v36 = vpop.f32.mrf.mxu0  ;;  %4952 = vmatpush.msra.mxu0 %v4881_v0  ;;  %v4861_v41 = vld [vmem:[%s12052_s8 + $0x30] sm:$0xff]  ;;  %v4939_v0 = vld [vmem:[%s12052_s8 + $0x2a0] sm:$0xff] }
 0x3e3   : > { %v3494_v48 = vpop.f32.mrf.mxu3 }
 0x3e4   : > { %4775 = vmatpush.bf16.msra.mxu1 %v6838_v45  ;;  %v3520_v17 = vpop.f32.mrf.mxu1  ;;  %v3509_v15 = vadd.f32 %v3508_v63, %v3494_v48  ;;  %v4882_v45 = vld [vmem:[%s12052_s8 + $0xd8] sm:$0xff]  ;;  %4953 = vmatpush.msra.mxu0 %v4879_v22  ;;  %v4905_v48 = vld [vmem:[%s12052_s8 + $0x190] sm:$0xff]  ;;  %v4860_v63 = vld [vmem:[%s12052_s8 + $0x28] sm:$0xff] }
 0x3e5   : > { %4805 = vmatpush.bf16.msrb.mxu3 %v7006_v46  ;;  %v3521_v39 = vadd.f32 %v3520_v17, %v3507_v53  ;;  %v4878_v46 = vld [vmem:[%s12052_s8 + $0xb8] sm:$0xff]  ;;  %v4899_v22 = vld [vmem:[%s12052_s8 + $0x160] sm:$0xff] }
 0x3e6   : > { %4954 = vmatpush.msra.mxu0 %v4877_v18  ;;  %v4862_v17 = vld [vmem:[%s12052_s8 + $0x38] sm:$0xff] }
 0x3e7   : > { %v11494_v10 = vadd.f32 %v3534_v59, %v3521_v39  ;;  %v4859_v39 = vld [vmem:[%s12052_s8 + $0x20] sm:$0xff] }
 0x3e8   : > { %4776 = vmatpush.bf16.msra.mxu1 %v6826_v25  ;;  %v4875_v25 = vld [vmem:[%s12052_s8 + $0xa0] sm:$0xff] }
 0x3e9   : > { %4806 = vmatpush.bf16.msrb.mxu3 %v6994_v33  ;;  %4955 = vmatpush.msra.mxu0 %v4875_v25  ;;  %v4872_v33 = vld [vmem:[%s12052_s8 + $0x88] sm:$0xff] }
 0x3ea   : > { %v11510_v42 = vpop.f32.mrf.mxu0 }
 0x3eb   : > { %v11500_v7 = vpop.f32.mrf.mxu3  ;;  %4956 = vmatpush.msra.mxu0 %v4873_v19  ;;  %v4933_v19 = vld [vmem:[%s12052_s8 + $0x270] sm:$0xff] }
 0x3ec   : > { %4777 = vmatpush.bf16.msra.mxu1 %v6814_v61  ;;  %v3522_v40 = vpop.f32.mrf.mxu1 }
 0x3ed   : > { %4807 = vmatpush.bf16.msrb.mxu3 %v6982_v44  ;;  %v3523_v56 = vadd.f32 %v3522_v40, %v3509_v15  ;;  %4957 = vmatpush.msra.mxu0 %v4871_v52  ;;  %v4868_v44 = vld [vmem:[%s12052_s8 + $0x68] sm:$0xff]  ;;  %v4857_v15 = vld [vmem:[%s12052_s8 + $0x10] sm:$0xff]  ;;  %v4903_v40 = vld [vmem:[%s12052_s8 + $0x180] sm:$0xff] }
 0x3ee   : > { %v4891_v52 = vld [vmem:[%s12052_s8 + $0x120] sm:$0xff] }
 0x3ef   : > { %v11496_v8 = vadd.f32 %v3536_v21, %v3523_v56  ;;  %4958 = vmatpush.msra.mxu0 %v4869_v4  ;;  %v4858_v56 = vld [vmem:[%s12052_s8 + $0x18] sm:$0xff]  ;;  %v4941_v21 = vld [vmem:[%s12052_s8 + $0x2b0] sm:$0xff] }
 0x3f0   : > { %4778 = vmatpush.bf16.msra.mxu1 %v6802_v11  ;;  %4808 = vmatmul.bf16.vlgmr.msrb.gmra.mxu3 %v11026_v30  ;;  %v11498_v30 = vpop.f32.mrf.mxu2  ;;  %v4865_v11 = vld [vmem:[%s12052_s8 + $0x50] sm:$0xff] }
 0x3f1   : > { %5019 = vmatpush.msra.mxu3 %v4886_v62  ;;  %4959 = vmatpush.msra.mxu0 %v4867_v60  ;;  %v4901_v62 = vld [vmem:[%s12052_s8 + $0x170] sm:$0xff]  ;;  %v4927_v60 = vld [vmem:[%s12052_s8 + $0x240] sm:$0xff] }
 0x3f2   : > { %v11534_v6 = vpop.f32.mrf.mxu0  ;;  %5000 = vmatpush.msra.mxu2 %v4941_v21  ;;  %v4929_v4 = vld [vmem:[%s12052_s8 + $0x250] sm:$0xff]  ;;  %v11750_v21 = vld [vmem:[%s12050_s6] sm:$0x7] }
 0x3f3   : > { %v11506_v55 = vpop.f32.mrf.mxu3  ;;  %5020 = vmatpush.msra.mxu3 %v4884_v29  ;;  %4960 = vmatpush.msra.mxu0 %v4865_v11  ;;  %v4887_v11 = vld [vmem:[%s12052_s8 + $0x100] sm:$0xff] }
 0x3f4   : > { %4779 = vmatpush.bf16.msra.mxu1 %v6790_v35  ;;  %v4864_v35 = vld [vmem:[%s12052_s8 + $0x48] sm:$0xff]  ;;  %5001 = vmatpush.msra.mxu2 %v4939_v0 }
 0x3f5   : > { %5021 = vmatpush.msra.mxu3 %v4882_v45  ;;  %4961 = vmatpush.msra.mxu0 %v4863_v50  ;;  %v4925_v50 = vld [vmem:[%s12052_s8 + $0x230] sm:$0xff] }
 0x3f7   : > { %4780 = vmatmul.bf16.vlgmr.msra.gmra.mxu1 %v11254_v23  ;;  %v11508_v23 = vpop.f32.mrf.mxu1  ;;  %5022 = vmatpush.msra.mxu3 %v4880_v24  ;;  %v4937_v24 = vld [vmem:[%s12052_s8 + $0x290] sm:$0xff] }
 0x3f8   : > { %v11504_v49 = vpop.f32.mrf.mxu2  ;;  %4973 = vmatpush.msrb.mxu1 %v4917_v32  ;;  %4962 = vmatpush.msra.mxu0 %v4861_v41  ;;  %v4895_v32 = vld [vmem:[%s12052_s8 + $0x140] sm:$0xff] }
 0x3f9   : > { %5023 = vmatpush.msra.mxu3 %v4878_v46  ;;  %5002 = vmatpush.msra.mxu2 %v4937_v24  ;;  %v4897_v46 = vld [vmem:[%s12052_s8 + $0x150] sm:$0xff]  ;;  %v4923_v41 = vld [vmem:[%s12052_s8 + $0x220] sm:$0xff]  ;;  %v4836_v24 = vperm.slane %v11750_v21, 0 }
 0x3fa   : > { %4974 = vmatpush.msrb.mxu1 %v4915_v1  ;;  %v11587_v14 = vpop.f32.mrf.mxu0  ;;  %4963 = vmatpush.msra.mxu0 %v4859_v39  ;;  %v4931_v1 = vld [vmem:[%s12052_s8 + $0x260] sm:$0xff] }
 0x3fb   : > { %5024 = vmatpush.msra.mxu3 %v4876_v12  ;;  %v4935_v12 = vld [vmem:[%s12052_s8 + $0x280] sm:$0xff] }
 0x3fc   : > { %4975 = vmatpush.msrb.mxu1 %v4913_v13  ;;  %4964 = vmatpush.msra.mxu0 %v4857_v15  ;;  %v4919_v39 = vld [vmem:[%s12052_s8 + $0x200] sm:$0xff]  ;;  %v4918_v15 = vld [vmem:[%s12052_s8 + $0x1f8] sm:$0xff] }
 0x3fd   : > { %5025 = vmatpush.msra.mxu3 %v4874_v20  ;;  %5003 = vmatpush.msra.mxu2 %v4935_v12  ;;  %v4893_v20 = vld [vmem:[%s12052_s8 + $0x130] sm:$0xff] }
 0x3fe   : > { %4976 = vmatpush.msrb.mxu1 %v4911_v47  ;;  %4965 = vmatpush.msra.mxu0 %v4855_v43  ;;  %v4942_v47 = vld [vmem:[%s12052_s8 + $0x2b8] sm:$0xff] }
 0x3ff   : > { %v11536_v38 = vpop.f32.mrf.mxu1  ;;  %5026 = vmatpush.msra.mxu3 %v4872_v33  ;;  %5004 = vmatpush.msra.mxu2 %v4933_v19  ;;  %v4930_v19 = vld [vmem:[%s12052_s8 + $0x258] sm:$0xff] }
 0x400   : > { %v11526_v16 = vpop.f32.mrf.mxu2  ;;  %4977 = vmatpush.msrb.mxu1 %v4909_v34  ;;  %5069 = vmatpush.msrb.mxu0 %v4942_v47  ;;  %v3967_v34 = vadd.f32 %v11498_v30, %v11415_v2  ;;  %v4936_v30 = vld [vmem:[%s12052_s8 + $0x288] sm:$0xff]  ;;  %v4926_v47 = vld [vmem:[%s12052_s8 + $0x238] sm:$0xff] }
 0x401   : > { %5027 = vmatpush.msra.mxu3 %v4870_v5  ;;  %5005 = vmatpush.msra.mxu2 %v4931_v1  ;;  %v4889_v5 = vld [vmem:[%s12052_s8 + $0x110] sm:$0xff] }
 0x402   : > { %v11625_v53 = vpop.f32.mrf.mxu0  ;;  %4978 = vmatpush.msrb.mxu1 %v4907_v51  ;;  %v4938_v51 = vld [vmem:[%s12052_s8 + $0x298] sm:$0xff]  ;;  %v3981_v2 = vadd.f32 %v11500_v7, %v3967_v34  ;;  %v4924_v34 = vld [vmem:[%s12052_s8 + $0x228] sm:$0xff] }
 0x403   : > { %5028 = vmatpush.msra.mxu3 %v4868_v44  ;;  %5006 = vmatpush.msra.mxu2 %v4929_v4  ;;  %v4934_v7 = vld [vmem:[%s12052_s8 + $0x278] sm:$0xff] }
 0x404   : > { %4979 = vmatpush.msrb.mxu1 %v4905_v48  ;;  %v3995_v43 = vadd.f32 %v11502_v36, %v3981_v2  ;;  %v4932_v36 = vld [vmem:[%s12052_s8 + $0x268] sm:$0xff]  ;;  %v4922_v2 = vld [vmem:[%s12052_s8 + $0x218] sm:$0xff] }
 0x405   : > { %5029 = vmatpush.msra.mxu3 %v4866_v31  ;;  %5007 = vmatpush.msra.mxu2 %v4927_v60 }
 0x406   : > { %4980 = vmatpush.msrb.mxu1 %v4903_v40  ;;  %v4009_v0 = vadd.f32 %v11508_v23, %v3995_v43  ;;  %v4914_v23 = vld [vmem:[%s12052_s8 + $0x1d8] sm:$0xff] }
 0x407   : > { %5030 = vmatpush.msra.mxu3 %v4864_v35  ;;  %5008 = vmatpush.msra.mxu2 %v4925_v50  ;;  %v4940_v35 = vld [vmem:[%s12052_s8 + $0x2a8] sm:$0xff]  ;;  %v4902_v43 = vld [vmem:[%s12052_s8 + $0x178] sm:$0xff] }
 0x408   : > { %v11579_v61 = vpop.f32.mrf.mxu2  ;;  %4981 = vmatpush.msrb.mxu1 %v4901_v62  ;;  %5070 = vmatpush.msrb.mxu0 %v4940_v35 }
 0x409   : > { %5031 = vmatpush.msra.mxu3 %v4862_v17  ;;  %v4921_v17 = vld [vmem:[%s12052_s8 + $0x210] sm:$0xff]  ;;  %5009 = vmatpush.msra.mxu2 %v4923_v41 }
 0x40a   : > { %4982 = vmatpush.msrb.mxu1 %v4899_v22  ;;  %v11680_v25 = vpop.f32.mrf.mxu0  ;;  %5071 = vmatpush.msrb.mxu0 %v4938_v51 }
 0x40b   : > { %v11518_v37 = vpop.f32.mrf.mxu3  ;;  %5032 = vmatpush.msra.mxu3 %v4860_v63  ;;  %5010 = vmatpush.msra.mxu2 %v4921_v17  ;;  %v4906_v17 = vld [vmem:[%s12052_s8 + $0x198] sm:$0xff] }
 0x40c   : > { %v11589_v27 = vpop.f32.mrf.mxu1  ;;  %4983 = vmatpush.msrb.mxu1 %v4897_v46  ;;  %5072 = vmatpush.msrb.mxu0 %v4936_v30  ;;  %v4916_v46 = vld [vmem:[%s12052_s8 + $0x1e8] sm:$0xff] }
 0x40d   : > { %5033 = vmatpush.msra.mxu3 %v4858_v56  ;;  %5011 = vmatpush.msra.mxu2 %v4919_v39 }
 0x40e   : > { %4984 = vmatpush.msrb.mxu1 %v4895_v32  ;;  %5073 = vmatpush.msrb.mxu0 %v4934_v7  ;;  %v4023_v32 = vadd.f32 %v11589_v27, %v11482_v28  ;;  %v4912_v28 = vld [vmem:[%s12052_s8 + $0x1c8] sm:$0xff] }
 0x40f   : > { %5034 = vmatpush.msra.mxu3 %v4856_v57  ;;  %5042 = vmatpush.msrb.mxu2 %v4918_v15  ;;  %v3969_v57 = vadd.f32 %v11504_v49, %v11442_v3 }
 0x410   : > { %v11606_v58 = vpop.f32.mrf.mxu2  ;;  %4985 = vmatpush.msrb.mxu1 %v4893_v20  ;;  %5074 = vmatpush.msrb.mxu0 %v4932_v36  ;;  %v4037_v27 = vadd.f32 %v11526_v16, %v4023_v32 }
 0x411   : > { %5043 = vmatpush.msrb.mxu2 %v4916_v46  ;;  %v3983_v3 = vadd.f32 %v11506_v55, %v3969_v57  ;;  %v4928_v55 = vld [vmem:[%s12052_s8 + $0x248] sm:$0xff] }
 0x412   : > { %4986 = vmatpush.msrb.mxu1 %v4891_v52  ;;  %v4683_v31 = vpop.f32.mrf.mxu0  ;;  %5075 = vmatpush.msrb.mxu0 %v4930_v19  ;;  %v4051_v41 = vadd.f32 %v11518_v37, %v4037_v27  ;;  %v4904_v37 = vld [vmem:[%s12052_s8 + $0x188] sm:$0xff] }
 0x413   : > { %v11571_v9 = vpop.f32.mrf.mxu3  ;;  %5044 = vmatpush.msrb.mxu2 %v4914_v23  ;;  %v3997_v4 = vadd.f32 %v11510_v42, %v3983_v3  ;;  %v4908_v42 = vld [vmem:[%s12052_s8 + $0x1a8] sm:$0xff]  ;;  %v4894_v3 = vld [vmem:[%s12052_s8 + $0x138] sm:$0xff] }
 0x414   : > { %v11627_v59 = vpop.f32.mrf.mxu1  ;;  %4987 = vmatpush.msrb.mxu1 %v4889_v5  ;;  %5076 = vmatpush.msrb.mxu0 %v4928_v55  ;;  %v4896_v46 = vld [vmem:[%s12052_s8 + $0x148] sm:$0xff] }
 0x415   : > { %5045 = vmatpush.msrb.mxu2 %v4912_v28  ;;  %v4011_v16 = vadd.f32 %v11536_v38, %v3997_v4  ;;  %v4025_v38 = vadd.f32 %v11627_v59, %v11491_v54  ;;  %v4920_v54 = vld [vmem:[%s12052_s8 + $0x208] sm:$0xff]  ;;  %v4065_v59 = vadd.f32 %v11534_v6, %v4051_v41 }
 0x416   : > { %4988 = vmatpush.msrb.mxu1 %v4887_v11  ;;  %v4910_v11 = vld [vmem:[%s12052_s8 + $0x1b8] sm:$0xff]  ;;  %5077 = vmatpush.msrb.mxu0 %v4926_v47  ;;  %v4900_v6 = vld [vmem:[%s12052_s8 + $0x168] sm:$0xff] }
 0x417   : > { %5046 = vmatpush.msrb.mxu2 %v4910_v11  ;;  %v4039_v15 = vadd.f32 %v11579_v61, %v4025_v38  ;;  %v4892_v19 = vld [vmem:[%s12052_s8 + $0x128] sm:$0xff] }
 0x418   : > { %v11662_v29 = vpop.f32.mrf.mxu2  ;;  %5078 = vmatpush.msrb.mxu0 %v4924_v34 }
 0x419   : > { %5047 = vmatpush.msrb.mxu2 %v4908_v42  ;;  %v4053_v61 = vadd.f32 %v11571_v9, %v4039_v15 }
 0x41a   : > { %v4685_v12 = vpop.f32.mrf.mxu0  ;;  %5079 = vmatpush.msrb.mxu0 %v4922_v2 }
 0x41b   : > { %v11608_v26 = vpop.f32.mrf.mxu3  ;;  %5048 = vmatpush.msrb.mxu2 %v4906_v17  ;;  %v4067_v9 = vadd.f32 %v11587_v14, %v4053_v61  ;;  %v4888_v14 = vld [vmem:[%s12052_s8 + $0x108] sm:$0xff]  ;;  %v7553_v61 = vld [vmem:[%s12053_s9 + $0x18] sm:$0xff] }
 0x41c   : > { %5080 = vmatpush.msrb.mxu0 %v4920_v54 }
 0x41d   : > { %5049 = vmatpush.msrb.mxu2 %v4904_v37  ;;  %v7556_v37 = vld [vmem:[%s12053_s9 + $0x30] sm:$0xff] }
 0x41f   : > { %5050 = vmatpush.msrb.mxu2 %v4902_v43  ;;  %v7554_v43 = vld [vmem:[%s12053_s9 + $0x20] sm:$0xff] }
 0x420   : > { %v4711_v33 = vpop.f32.mrf.mxu2 }
 0x421   : > { %5051 = vmatpush.msrb.mxu2 %v4900_v6 }
 0x422   : > { %v4753_v35 = vpop.f32.mrf.mxu0 }
 0x423   : > { %v11667_v45 = vpop.f32.mrf.mxu3 }
 0x428   : > { %v4713_v40 = vpop.f32.mrf.mxu2 }
 0x42a   : > { %v4755_v36 = vpop.f32.mrf.mxu0 }
 0x42c   : > { %v11675_v18 = vpop.f32.mrf.mxu1 }
 0x433   : > { %v4669_v13 = vpop.f32.mrf.mxu3 }
 0x434   : > { %v11709_v44 = vpop.f32.mrf.mxu1  ;;  %v4684_v48 = vadd.f32 %v4683_v31, %v4669_v13  ;;  %v4725_v52 = vpop.f32.mrf.mxu2 }
 0x43b   : > { %v4671_v63 = vpop.f32.mrf.mxu3 }
 0x43c   : > { %v4686_v20 = vadd.f32 %v4685_v12, %v4671_v63 }
 0x44c   : > { %v4697_v56 = vpop.f32.mrf.mxu1 }
 0x44d   : > { %v4698_v62 = vadd.f32 %v4697_v56, %v4684_v48 }
 0x44f   : > { %v4712_v22 = vadd.f32 %v4711_v33, %v4698_v62  ;;  %v4727_v62 = vpop.f32.mrf.mxu2 }
 0x451   : > { %v4828_v49 = vadd.f32 %v4712_v22, %v4009_v0 }
 0x453   : > { %v4842_v1 = vadd.f32 %v4836_v24, %v4828_v49  ;;  %v4739_v13 = vpop.f32.mrf.mxu3 }
 0x454   : > { %v4699_v33 = vpop.f32.mrf.mxu1  ;;  %v4740_v31 = vadd.f32 %v4739_v13, %v4725_v52  ;;  %v4079_v13 = vadd.f32 %v11625_v53, %v11494_v10  ;;  %v4081_v10 = vadd.f32 %v11680_v25, %v11496_v8 }
 0x455   : > { %v4848_v5 = vmax.f32 %v4842_v1, 0.0  ;;  %v4700_v60 = vadd.f32 %v4699_v33, %v4686_v20  ;;  %v4890_v1 = vld [vmem:[%s12052_s8 + $0x118] sm:$0xff] }
 0x456   : > { %v4754_v30 = vadd.f32 %v4753_v35, %v4740_v31  ;;  %v4093_v55 = vadd.f32 %v11675_v18, %v4079_v13  ;;  %v4838_v18 = vperm.slane %v11750_v21, 2  ;;  %v7568_v13 = vld [vmem:[%s12053_s9 + $0x90] sm:$0xff] }
 0x457   : > { %v4714_v50 = vadd.f32 %v4713_v40, %v4700_v60  ;;  %4966 = vmatmul.f32.vlgmr.msra.gmra.mxu0 %v4848_v5  ;;  %5035 = vmatmul.f32.vlgmr.msra.gmra.mxu3 %v4848_v5  ;;  %v4837_v40 = vperm.slane %v11750_v21, 1  ;;  %v4795_v52 = vpop.f32.mrf.mxu2  ;;  %v4823_v60 = vpop.f32.mrf.mxu0 }
 0x458   : > { %v4107_v4 = vadd.f32 %v11606_v58, %v4093_v55  ;;  %v7563_v55 = vld [vmem:[%s12053_s9 + $0x68] sm:$0xff] }
 0x459   : > { %v4831_v51 = vadd.f32 %v4714_v50, %v4011_v16  ;;  %v4095_v16 = vadd.f32 %v11709_v44, %v4081_v10 }
 0x45a   : > { %v4121_v47 = vadd.f32 %v11608_v26, %v4107_v4  ;;  %v7562_v4 = vld [vmem:[%s12053_s9 + $0x60] sm:$0xff] }
 0x45b   : > { %v4845_v39 = vadd.f32 %v4836_v24, %v4831_v51  ;;  %v4741_v48 = vpop.f32.mrf.mxu3  ;;  %v4898_v24 = vld [vmem:[%s12052_s8 + $0x158] sm:$0xff]  ;;  %v4109_v35 = vadd.f32 %v11662_v29, %v4095_v16 }
 0x45c   : > { %v4767_v63 = vpop.f32.mrf.mxu1  ;;  %v4742_v57 = vadd.f32 %v4741_v48, %v4727_v62  ;;  %5052 = vmatpush.msrb.mxu2 %v4898_v24  ;;  %v7555_v48 = vld [vmem:[%s12053_s9 + $0x28] sm:$0xff]  ;;  %v7573_v16 = vld [vmem:[%s12053_s9 + $0xb8] sm:$0xff] }
 0x45d   : > { %v4768_v7 = vadd.f32 %v4767_v63, %v4754_v30  ;;  %v4851_v56 = vmax.f32 %v4845_v39, 0.0  ;;  %v4123_v25 = vadd.f32 %v11667_v45, %v4109_v35  ;;  %v7557_v45 = vld [vmem:[%s12053_s9 + $0x38] sm:$0xff]  ;;  %v7559_v63 = vld [vmem:[%s12053_s9 + $0x48] sm:$0xff] }
 0x45e   : > { %v4756_v32 = vadd.f32 %v4755_v36, %v4742_v57  ;;  %5053 = vmatpush.msrb.mxu2 %v4896_v46  ;;  %5348 = vmatpush.bf16.msra.mxu0 %v7557_v45  ;;  %v7567_v57 = vld [vmem:[%s12053_s9 + $0x88] sm:$0xff]  ;;  %v7565_v36 = vld [vmem:[%s12053_s9 + $0x78] sm:$0xff] }
 0x45f   : > { %v4829_v0 = vadd.f32 %v4768_v7, %v4065_v59  ;;  %4969 = vmatmul.f32.gmra.mxu0 %v4851_v56  ;;  %5038 = vmatmul.f32.gmra.mxu3 %v4851_v56  ;;  %v4797_v42 = vpop.f32.mrf.mxu2  ;;  %v4825_v8 = vpop.f32.mrf.mxu0  ;;  %v5508_v45 = vld [vmem:[%s12056_s12 + $0x58] sm:$0xff] }
 0x460   : > { %5054 = vmatpush.msrb.mxu2 %v4894_v3 }
 0x461   : > { %v4843_v22 = vadd.f32 %v4837_v40, %v4829_v0  ;;  %v4854_v0 = vld [vmem:[%s12051_s7] sm:$0x1f] }
 0x462   : > { %5055 = vmatpush.msrb.mxu2 %v4892_v19  ;;  %5349 = vmatpush.bf16.msra.mxu0 %v7556_v37  ;;  %v5507_v37 = vld [vmem:[%s12056_s12 + $0x50] sm:$0xff] }
 0x463   : > { %v4849_v12 = vmax.f32 %v4843_v22, 0.0  ;;  %v7566_v22 = vld [vmem:[%s12053_s9 + $0x80] sm:$0xff] }
 0x464   : > { %v4769_v49 = vpop.f32.mrf.mxu1  ;;  %5056 = vmatpush.msrb.mxu2 %v4890_v1  ;;  %v7569_v1 = vld [vmem:[%s12053_s9 + $0x98] sm:$0xff] }
 0x465   : > { %v4770_v23 = vadd.f32 %v4769_v49, %v4756_v32  ;;  %4989 = vmatmul.f32.vlgmr.msrb.gmra.mxu1 %v4849_v12 }
 0x466   : > { %5057 = vmatpush.msrb.mxu2 %v4888_v14  ;;  %5350 = vmatpush.bf16.msra.mxu0 %v7555_v48  ;;  %v7576_v14 = vld [vmem:[%s12053_s9 + $0xd0] sm:$0xff]  ;;  %v5505_v48 = vld [vmem:[%s12056_s12 + $0x40] sm:$0xff] }
 0x467   : > { %v4832_v20 = vadd.f32 %v4770_v23, %v4067_v9 }
 0x469   : > { %v4846_v28 = vadd.f32 %v4837_v40, %v4832_v20 }
 0x46a   : > { %5351 = vmatpush.bf16.msra.mxu0 %v7554_v43  ;;  %v5500_v43 = vld [vmem:[%s12056_s12 + $0x18] sm:$0xff] }
 0x46b   : > { %v4852_v27 = vmax.f32 %v4846_v28, 0.0  ;;  %v7577_v28 = vld [vmem:[%s12053_s9 + $0xd8] sm:$0xff] }
 0x46d   : > { %4992 = vmatmul.f32.gmra.mxu1 %v4852_v27 }
 0x46e   : > { %5352 = vmatpush.bf16.msra.mxu0 %v7553_v61 }
 0x473   : > { %v4809_v11 = vpop.f32.mrf.mxu3 }
 0x474   : > { %v4781_v33 = vpop.f32.mrf.mxu1 }
 0x475   : > { %v4796_v5 = vadd.f32 %v4795_v52, %v4781_v33  ;;  %v7552_v52 = vld [vmem:[%s12053_s9 + $0x10] sm:$0xff]  ;;  %v7575_v33 = vld [vmem:[%s12053_s9 + $0xc8] sm:$0xff] }
 0x476   : > { %5353 = vmatpush.bf16.msra.mxu0 %v7552_v52  ;;  %v5496_v52 = vld [vmem:[%s12055_s11] sm:$0x1] }
 0x477   : > { %v4810_v53 = vadd.f32 %v4809_v11, %v4796_v5  ;;  %v7551_v5 = vld [vmem:[%s12053_s9 + $0x8] sm:$0xff]  ;;  %v7561_v11 = vld [vmem:[%s12053_s9 + $0x58] sm:$0xff] }
 0x479   : > { %v4824_v31 = vadd.f32 %v4823_v60, %v4810_v53  ;;  %v7574_v60 = vld [vmem:[%s12053_s9 + $0xc0] sm:$0xff] }
 0x47a   : > { %5354 = vmatpush.bf16.msra.mxu0 %v7551_v5  ;;  %v5563_v5 = vld [vmem:[%s12058_s14] sm:$0x1] }
 0x47b   : > { %v4830_v50 = vadd.f32 %v4824_v31, %v4121_v47  ;;  %v4811_v38 = vpop.f32.mrf.mxu3  ;;  %v7550_v47 = vld [vmem:[%s12053_s9] sm:$0xff]  ;;  %v7560_v31 = vld [vmem:[%s12053_s9 + $0x50] sm:$0xff] }
 0x47c   : > { %v4783_v34 = vpop.f32.mrf.mxu1 }
 0x47d   : > { %v4844_v58 = vadd.f32 %v4838_v18, %v4830_v50  ;;  %v4798_v41 = vadd.f32 %v4797_v42, %v4783_v34  ;;  %v7572_v34 = vld [vmem:[%s12053_s9 + $0xb0] sm:$0xff] }
 0x47e   : > { %5355 = vmatpush.bf16.msra.mxu0 %v7550_v47 }
 0x47f   : > { %v4850_v51 = vmax.f32 %v4844_v58, 0.0  ;;  %v4812_v17 = vadd.f32 %v4811_v38, %v4798_v41  ;;  %v7578_v58 = vld [vmem:[%s12053_s9 + $0xe0] sm:$0xff]  ;;  %v7571_v38 = vld [vmem:[%s12053_s9 + $0xa8] sm:$0xff] }
 0x481   : > { %v4826_v26 = vadd.f32 %v4825_v8, %v4812_v17  ;;  %7094 = vmatmul.msk.f32.vlgmr.msra.gmra.mxu2 %vm4943_vm8, %v4850_v51  ;;  %7096 = vmatmul.msk.f32.vlgmr.msrb.gmra.mxu0 %vm4943_vm8, %v4850_v51  ;;  %v7570_v51 = vld [vmem:[%s12053_s9 + $0xa0] sm:$0xff] }
 0x482   : > { %5367 = vmatpush.bf16.msra.mxu2 %v7559_v63 }
 0x483   : > { %v4833_v44 = vadd.f32 %v4826_v26, %v4123_v25 }
 0x485   : > { %v4847_v21 = vadd.f32 %v4838_v18, %v4833_v44  ;;  %v7579_v18 = vld [vmem:[%s12053_s9 + $0xe8] sm:$0xff] }
 0x487   : > { %v4853_v2 = vmax.f32 %v4847_v21, 0.0 }
 0x489   : > { %7095 = vmatmul.msk.f32.gmra.mxu2 %vm4943_vm8, %v4853_v2  ;;  %7097 = vmatmul.msk.f32.gmra.mxu0 %vm4943_vm8, %v4853_v2 }
 0x491   : > { %5058 = vmatmul.f32.vlgmr.msrb.gmra.mxu2 %v4849_v12  ;;  %v7564_v12 = vld [vmem:[%s12053_s9 + $0x70] sm:$0xff] }
 0x499   : > { %5061 = vmatmul.f32.gmra.mxu2 %v4852_v27  ;;  %v7558_v27 = vld [vmem:[%s12053_s9 + $0x40] sm:$0xff] }
 0x49a   : > { %5368 = vmatpush.bf16.msra.mxu2 %v7558_v27  ;;  %v5559_v27 = vld [vmem:[%s12057_s13] sm:$0xff] }
 0x49e   : > { %5482 = vmatpush.bf16.msrb.mxu2 %v7579_v18 }
 0x4a2   : > { %5483 = vmatpush.bf16.msrb.mxu2 %v7578_v58 }
 0x4d4   : > { %v4967_v30 = vpop.f32.mrf.mxu0 }
 0x4da   : > { %v5036_v6 = vpop.f32.mrf.mxu3 }
 0x4dc   : > { %v4970_v59 = vpop.f32.mrf.mxu0 }
 0x4e2   : > { %v4990_v29 = vpop.f32.mrf.mxu1  ;;  %v5039_v32 = vpop.f32.mrf.mxu3 }
 0x4e3   : > { %v4991_v40 = vadd.f32 %v4990_v29, %v4967_v30 }
 0x4ea   : > { %v4993_v54 = vpop.f32.mrf.mxu1 }
 0x4eb   : > { %v4994_v15 = vadd.f32 %v4993_v54, %v4970_v59  ;;  %v5506_v54 = vld [vmem:[%s12056_s12 + $0x48] sm:$0xff] }
 0x4fe   : > { %v5082_v24 = vpop.f32.mrf.mxu0 }
 0x504   : > { %v5013_v39 = vpop.f32.mrf.mxu2 }
 0x505   : > { %v5014_v62 = vadd.f32 %v5013_v39, %v4991_v40  ;;  %v5502_v40 = vld [vmem:[%s12056_s12 + $0x28] sm:$0xff] }
 0x506   : > { %v5085_v23 = vpop.f32.mrf.mxu0 }
 0x50c   : > { %v5016_v7 = vpop.f32.mrf.mxu2 }
 0x50d   : > { %v5017_v56 = vadd.f32 %v5016_v7, %v4994_v15  ;;  %v5504_v15 = vld [vmem:[%s12056_s12 + $0x38] sm:$0xff]  ;;  %v5503_v7 = vld [vmem:[%s12056_s12 + $0x30] sm:$0xff] }
 0x50f   : > { %7098 = vmatpush.msk.msra.mxu1 %vm5092_vm9, %v5017_v56  ;;  %v5501_v56 = vld [vmem:[%s12056_s12 + $0x20] sm:$0xff] }
 0x511   : > { %5114 = vmatpush.msra.mxu1 %v5014_v62  ;;  %v5499_v62 = vld [vmem:[%s12056_s12 + $0x10] sm:$0xff] }
 0x512   : > { %7099 = vmatmul.msk.f32.vlgmr.msra.gmra.mxu1 %vm5088_vm10, %v4854_v0 }
 0x513   : > { %5260 = vmatpush.bf16.msrb.mxu1 %v7567_v57  ;;  %v5498_v57 = vld [vmem:[%s12056_s12 + $0x8] sm:$0xff] }
 0x514   : > { %v5059_v46 = vpop.f32.mrf.mxu2 }
 0x515   : > { %v5060_v49 = vadd.f32 %v5059_v46, %v5036_v6 }
 0x517   : > { %5261 = vmatpush.bf16.msrb.mxu1 %v7566_v22  ;;  %v5083_v20 = vadd.f32 %v5082_v24, %v5060_v49 }
 0x51b   : > { %5262 = vmatpush.bf16.msrb.mxu1 %v7565_v36 }
 0x51c   : > { %v5062_v3 = vpop.f32.mrf.mxu2 }
 0x51d   : > { %v5063_v9 = vadd.f32 %v5062_v3, %v5039_v32 }
 0x51f   : > { %v5086_v19 = vadd.f32 %v5085_v23, %v5063_v9  ;;  %5263 = vmatpush.bf16.msrb.mxu1 %v7564_v12  ;;  %v7619_v9 = vld [vmem:[%s12054_s10] ss:$0 sm:$0xff] }
 0x521   : > { %7100 = vmatpush.msk.msrb.mxu3 %vm5092_vm9, %v5086_v19 }
 0x523   : > { %5134 = vmatpush.msrb.mxu3 %v5083_v20  ;;  %5264 = vmatpush.bf16.msrb.mxu1 %v7563_v55  ;;  %v5560_v55 = vld [vmem:[%s12057_s13 + $0x8] sm:$0xff] }
 0x524   : > { %7101 = vmatmul.msk.f32.vlgmr.msrb.gmra.mxu3 %vm5088_vm10, %v4854_v0  ;;  %v5497_v0 = vld [vmem:[%s12056_s12] sm:$0xff] }
 0x525   : > { %5279 = vmatpush.bf16.msra.mxu3 %v7569_v1 }
 0x527   : > { %5265 = vmatpush.bf16.msrb.mxu1 %v7562_v4 }
 0x529   : > { %5280 = vmatpush.bf16.msra.mxu3 %v7568_v13 }
 0x52b   : > { %5266 = vmatpush.bf16.msrb.mxu1 %v7561_v11 }
 0x52d   : > { %5463 = vmatpush.bf16.msrb.mxu3 %v7577_v28  ;;  %v5562_v28 = vld [vmem:[%s12057_s13 + $0x18] sm:$0xff] }
 0x52f   : > { %5267 = vmatpush.bf16.msrb.mxu1 %v7560_v31 }
 0x531   : > { %5464 = vmatpush.bf16.msrb.mxu3 %v7576_v14  ;;  %v5561_v14 = vld [vmem:[%s12057_s13 + $0x10] sm:$0xff] }
 0x533   : > { %5516 = vmatpush.msra.mxu1 %v5508_v45 }
 0x535   : > { %5465 = vmatpush.bf16.msrb.mxu3 %v7575_v33  ;;  %5517 = vmatpush.msra.mxu1 %v5507_v37 }
 0x537   : > { %5518 = vmatpush.msra.mxu1 %v5506_v54 }
 0x539   : > { %5466 = vmatpush.bf16.msrb.mxu3 %v7574_v60  ;;  %5519 = vmatpush.msra.mxu1 %v5505_v48 }
 0x53b   : > { %5520 = vmatpush.msra.mxu1 %v5504_v15 }
 0x53d   : > { %5467 = vmatpush.bf16.msrb.mxu3 %v7573_v16  ;;  %5521 = vmatpush.msra.mxu1 %v5503_v7 }
 0x53f   : > { %5522 = vmatpush.msra.mxu1 %v5502_v40 }
 0x541   : > { %5468 = vmatpush.bf16.msrb.mxu3 %v7572_v34  ;;  %5523 = vmatpush.msra.mxu1 %v5501_v56 }
 0x543   : > { %5524 = vmatpush.msra.mxu1 %v5500_v43 }
 0x545   : > { %5469 = vmatpush.bf16.msrb.mxu3 %v7571_v38  ;;  %5525 = vmatpush.msra.mxu1 %v5499_v62 }
 0x547   : > { %5526 = vmatpush.msra.mxu1 %v5498_v57 }
 0x549   : > { %5470 = vmatpush.bf16.msrb.mxu3 %v7570_v51  ;;  %5527 = vmatpush.msra.mxu1 %v5497_v0 }
 0x58f   : > { %v5116_v10 = vpop.f32.mrf.mxu1 }
 0x590   : > { %v5139_v53 = vpack.c.bf16 %v5116_v10, %v5116_v10 }
 0x592   : > { %v5183_v50 = vshrl.u32 %v5139_v53, 16  ;;  %v5185_v42 = vshll.u32 %v5139_v53, 16  ;;  %5356 = vmatmul.bf16.vlgmr.msra.gmra.mxu0 %v5139_v53  ;;  %v5397_v29 = vrot.slane %v5139_v53, 1 }
 0x594   : > { %v5187_v35 = vrot.slane %v5185_v42, 1 }
 0x596   : > { %v5188_v41 = vor.u32 %v5187_v35, %v5183_v50 }
 0x598   : > { %5268 = vmatmul.bf16.vlgmr.msrb.gmra.mxu1 %v5188_v41 }
 0x5a7   : > { %v5136_v17 = vpop.f32.mrf.mxu3 }
 0x5a8   : > { %v5140_v8 = vpack.c.bf16 %v5136_v17, %v5136_v17 }
 0x5aa   : > { %v5192_v25 = vshll.u32 %v5140_v8, 16  ;;  %7203 = vmatmul.msk.bf16.vlgmr.msra.gmra.mxu2 %vm3367_vm7, %v5140_v8  ;;  %v5190_v26 = vshrl.u32 %v5140_v8, 16  ;;  %v5398_v2 = vrot.slane %v5140_v8, 1 }
 0x5ab   : > { %5579 = vmatpush.msra.mxu2 %v5562_v28 }
 0x5ac   : > { %v5194_v44 = vrot.slane %v5192_v25, 1 }
 0x5ad   : > { %5580 = vmatpush.msra.mxu2 %v5561_v14 }
 0x5ae   : > { %v5195_v21 = vor.u32 %v5194_v44, %v5190_v26 }
 0x5af   : > { %5581 = vmatpush.msra.mxu2 %v5560_v55 }
 0x5b0   : > { %7162 = vmatmul.msk.bf16.vlgmr.msra.gmra.mxu3 %vm3367_vm7, %v5195_v21 }
 0x5b1   : > { %5582 = vmatpush.msra.mxu2 %v5559_v27 }
 0x5ba   : > { %7264 = vmatmul.msk.bf16.vlgmr.msrb.gmra.mxu2 %vm3367_vm7, %v5398_v2 }
 0x5c0   : > { %5471 = vmatmul.bf16.vlgmr.msrb.gmra.mxu3 %v5397_v29 }
 0x60f   : > { %v5357_v30 = vpop.f32.mrf.mxu0 }
 0x615   : > { %v5269_v39 = vpop.f32.mrf.mxu1 }
 0x617   : > { %v5359_v59 = vpop.f32.mrf.mxu0 }
 0x61d   : > { %v5271_v63 = vpop.f32.mrf.mxu1 }
 0x62d   : > { %v5370_v6 = vpop.f32.mrf.mxu2 }
 0x633   : > { %v5282_v61 = vpop.f32.mrf.mxu3 }
 0x634   : > { %v5283_v46 = vadd.f32 %v5282_v61, %v5269_v39 }
 0x635   : > { %v5372_v22 = vpop.f32.mrf.mxu2 }
 0x636   : > { %v5358_v12 = vadd.f32 %v5357_v30, %v5283_v46 }
 0x638   : > { %v5371_v3 = vadd.f32 %v5370_v6, %v5358_v12 }
 0x63b   : > { %v5284_v24 = vpop.f32.mrf.mxu3 }
 0x63d   : > { %v5485_v36 = vpop.f32.mrf.mxu2 }
 0x643   : > { %v5472_v32 = vpop.f32.mrf.mxu3 }
 0x644   : > { %v5486_v49 = vadd.f32 %v5485_v36, %v5472_v32 }
 0x645   : > { %v5487_v23 = vpop.f32.mrf.mxu2 }
 0x646   : > { %v5489_v19 = vadd.f32 %v5486_v49, %v5371_v3 }
 0x648   : > { %v5494_v20 = vadd.f32 %v7619_v9, %v5489_v19 }
 0x64a   : > { %v5495_v1 = vmax.f32 %v5494_v20, 0.0 }
 0x64b   : > { %v5474_v13 = vpop.f32.mrf.mxu3 }
 0x64c   : > { %7265 = vmatmul.msk.f32.vlgmr.msra.gmra.mxu1 %vm4943_vm8, %v5495_v1 }
 0x6c9   : > { %v5529_v33 = vpop.f32.mrf.mxu1 }
 0x6ca   : > { %7266 = vmatpush.msk.msrb.mxu0 %vm5092_vm9, %v5529_v33 }
 0x6cb   : > { %7267 = vmatmul.msk.f32.vlgmr.msrb.gmra.mxu0 %vm5532_vm11, %v5496_v52 }
 0x748   : > { %v5556_v4 = vpop.f32.mrf.mxu0 }
 0x749   : > { %7268 = vmatmul.msk.f32.vlgmr.msra.gmra.mxu2 %vm3367_vm7, %v5556_v4 }
 0x7cc   : > { %v5584_v60 = vpop.f32.mrf.mxu2 }
 0x7cd   : > { %v5585_v11 = vadd.f32 %v5584_v60, %v5563_v5 }
 0x7cf   : > { %5588 = vst.msk [vmem:[%s486_s21] sm:$0x1] %vm5587_vm12, %v5585_v11 }
 0x7d0   : > { %7647 = shalt.err (!%p7644_p3)
}
 0x7d1   : > { %7580 = dma.vmem_to_hbm [thread:$0]  (%p7802_p5), %s5601_s28, 16, %s5603_s29, %s5590_s17  }
 0x7d2 PF: > { %s12090_s20 = sld [smem:[#allocation7_spill]] }
 0x7d3   : > { %s12091_s18 = sld [smem:[#allocation5_spill]] }
 0x7d8   : > { %p7586_p4 = scmp.ge.s32.totalorder %s12090_s20, 2 }
 0x7d9   : > { %s5614_s0 = sand.u32 1, %s12091_s18  }
 0x7da   : > { %p7583_p7 = pnand %p7586_p4, %p7806_p6  ;;  %s5615_s22 = scalar_lea.sflag [#allocation3], %s5614_s0 }
 0x7dc   : > { %p7584_p8 = pneg %p7583_p7 }
 0x7de   : > { %7665 = dma.done.wait (%p7584_p8), %s5615_s22, 16  }
 0x7df   : > { %7667 = vsyncadd (%p7584_p8), %s5615_s22, 4294967280  ;;  %s12093_s21 = sld [smem:[#allocation8_spill]]  ;;  %s12096_s18 = smov %s7674_s19 }
 0x7e0   : > { %s12094_s23 = sld [smem:[#allocation6_spill]] }
 0x7e1   : > { %s12095_s20 = sld [smem:[#allocation9_spill]] }
 0x7e5   : > { %p25_p9 = scmp.ge.s32.totalorder %s12093_s21, 4  }
 0x7e6   : > { %s12097_s19 = smov %s12094_s23 }
 0x7e7   :  { %27 = sbr.rel (!%p25_p9) target bundleno = 5 (0x5), region = 121 }
 0x7ec   :  { %5620 = vsyncpa [#allocation3], 1 }
 0x7ed   :  { %5622 = vsyncpa [#allocation3 + $0x1], 1 }

</bundles_post_ra>
